<compile_context>
chip_gen: v7x
topology: tpu7x:2x2x1
jax: 0.10.0
libtpu: 0.0.40
codegen_flags: <defaults>
</compile_context>

<pallas_src>
import jax
import jax.numpy as jnp
from jax.experimental import pallas as pl
from jax.experimental.pallas import tpu as pltpu


def _decoder_kernel(enc_ref, y_ref, rows_ref, wd_ref, udw_ref, whh_ref, wy_ref,
                    scal_ref, out_ref):
    enc = enc_ref[...]                       # (B, T, M) f32
    yv = y_ref[...]                          # (B, T, F) f32
    B, T, M = enc.shape
    Fd = yv.shape[2]
    P, G = whh_ref.shape                     # (P, 4P)

    # Unpack the packed row slab (loop-invariant, hoisted).
    rows = rows_ref[...]                     # (8, L)
    abw = rows[0:1, 0:Fd]                    # A_b weight row, pre-scaled by wty
    vdw = rows[1:2, 0:M]                     # v_d row
    wtc = rows[2:3, 0:M]                     # W_tilda c-part row
    wdb = rows[3:4, 0:M]                     # W_d bias
    wih = rows[4:5, 0:G]                     # LSTM w_ih (input width 1), order i,f,o,g
    lstmb = rows[5:6, 0:G]                   # LSTM b_ih + b_hh, order i,f,o,g
    wyb = rows[6:7, 0:P]                     # W_y bias
    vyw = rows[7:8, 0:P]                     # v_y row

    wd = wd_ref[...]                         # (2P, M)
    wdw_d = wd[0:P, :]
    wdw_c = wd[P:2 * P, :]
    udw = udw_ref[...]                       # (M, M)
    whh = whh_ref[...]                       # (P, 4P), order i,f,o,g
    wy = wy_ref[...]                         # (P+M, P)
    wyw_d = wy[0:P, :]
    wyw_c = wy[P:P + M, :]

    yb_comb = scal_ref[0]                    # A_b_b*wty + W_tilda_b
    vyb = scal_ref[1]                        # v_y bias
    l_shift = scal_ref[2]                    # static exp shift = ||v_d||_1

    # A_b(y) folded with W_tilda's y coefficient and biases -> (B, T), hoisted.
    y_contrib = jnp.sum(yv * abw, axis=-1) + yb_comb

    # U_d(encoded_inputs) is loop-invariant -> hoist; explicit 2-D MXU dot.
    y1 = jnp.dot(enc.reshape(B * T, M), udw,
                 preferred_element_type=jnp.float32).reshape(B, T, M)

    d = jnp.zeros((B, P), jnp.float32)
    c = jnp.zeros((B, P), jnp.float32)
    c_t = jnp.zeros((B, M), jnp.float32)

    # Fully unrolled recurrence (T is a small static constant).
    for t in range(T):
        # x1 = W_d([d ; c])  -> (B, M)   (two split dots; no lane concat)
        x1 = (jnp.dot(d, wdw_d, preferred_element_type=jnp.float32)
              + jnp.dot(c, wdw_c, preferred_element_type=jnp.float32)
              + wdb)
        # z1 = tanh(x1 broadcast over T + U_d(enc))  -> (B, T, M)
        z1 = jnp.tanh(x1[:, None, :] + y1)
        # l = v_d(z1)  -> (B, T)   (elementwise + lane reduce, no MXU)
        l = jnp.sum(z1 * vdw, axis=-1)
        # Deferred-normalization softmax: static shift (cancels in u/Z),
        # independent Z and context reductions, EUP reciprocal off-chain.
        e = jnp.exp(l - l_shift)
        z_den = jnp.sum(e, axis=1, keepdims=True)             # (B, 1)
        u_ctx = jnp.sum(e[:, :, None] * enc, axis=1)          # (B, M)
        c_t = u_ctx * pl.reciprocal(z_den, approx=True)
        # y_tilda = W_tilda([c_t ; y_t])  -> (B, 1)
        y_tilda = (jnp.sum(c_t * wtc, axis=-1, keepdims=True)
                   + y_contrib[:, t:t + 1])
        # LSTMCell(y_tilda, (d, c)); gate columns pre-ordered (i, f, o, g).
        # Input matmul inner dim is 1 -> broadcast multiply.
        gates = (y_tilda * wih
                 + jnp.dot(d, whh, preferred_element_type=jnp.float32)
                 + lstmb)                                      # (B, 4P)
        sg = jax.nn.sigmoid(gates)                             # one full-vreg EUP op
        i_g = sg[:, 0:P]
        f_g = sg[:, P:2 * P]
        o_g = sg[:, 2 * P:3 * P]
        g_g = jnp.tanh(gates[:, 3 * P:4 * P])
        c = f_g * c + i_g * g_g
        d = o_g * jnp.tanh(c)

    # y_hat = v_y(W_y([d ; c_t]))  -> (B, 1)
    h = (jnp.dot(d, wyw_d, preferred_element_type=jnp.float32)
         + jnp.dot(c_t, wyw_c, preferred_element_type=jnp.float32)
         + wyb)
    out_ref[...] = jnp.sum(h * vyw, axis=-1, keepdims=True) + vyb


def pack_params(params):
    """One-time parameter packing (cache the result; do NOT call per forward)."""
    P = params['lstm_w_hh'].shape[0]
    M = params['U_d_w'].shape[0]

    wty = params['W_tilda_w'][M:, :][0, 0]                # scalar y coefficient
    abw_scaled = params['A_b_w'].T * wty                  # (1, F), wty folded in
    yb_comb = params['A_b_b'][0, 0] * wty + params['W_tilda_b'][0, 0]
    vdw_row = params['v_d_w'].T                           # (1, M)
    wtc_row = params['W_tilda_w'][:M, :].T                # (1, M)
    l_shift = jnp.sum(jnp.abs(params['v_d_w']))           # |l| <= ||v_d||_1
    lstm_b = params['lstm_b_ih'] + params['lstm_b_hh']    # (1, 4P)

    def reorder_gates(w):  # (i, f, g, o) -> (i, f, o, g) along the last axis
        return jnp.concatenate([w[..., 0:P], w[..., P:2 * P],
                                w[..., 3 * P:4 * P], w[..., 2 * P:3 * P]], axis=-1)

    wih = reorder_gates(params['lstm_w_ih'])               # (1, 4P)
    whh = reorder_gates(params['lstm_w_hh'])               # (P, 4P)
    lstmb = reorder_gates(lstm_b)                          # (1, 4P)
    vyw_row = params['v_y_w'].T                            # (1, P)

    row_list = [abw_scaled, vdw_row, wtc_row, params['W_d_b'],
                wih, lstmb, params['W_y_b'], vyw_row]
    L = max(int(r.shape[1]) for r in row_list)
    L = ((L + 127) // 128) * 128
    slab = jnp.zeros((8, L), jnp.float32)
    for i, r in enumerate(row_list):
        slab = slab.at[i, :r.shape[1]].set(r[0].astype(jnp.float32))

    scalars = jnp.stack([yb_comb, params['v_y_b'][0, 0], l_shift,
                         jnp.float32(0.0)]).astype(jnp.float32)   # (4,)

    return {
        'rows': slab,                                  # (8, L) VMEM slab
        'W_d': params['W_d_w'].astype(jnp.float32),    # (2P, M)
        'U_d': params['U_d_w'].astype(jnp.float32),    # (M, M)
        'W_hh': whh.astype(jnp.float32),               # (P, 4P)
        'W_y': params['W_y_w'].astype(jnp.float32),    # (P+M, P)
        'scalars': scalars,                            # (4,) SMEM
    }


def temporal_attention_decoder(encoded, y, packed):
    B = encoded.shape[0]
    vmem_inputs = [encoded, y, packed['rows'], packed['W_d'], packed['U_d'],
                   packed['W_hh'], packed['W_y']]
    smem_inputs = [packed['scalars']]

    in_specs = ([pl.BlockSpec(memory_space=pltpu.MemorySpace.VMEM)]
                * len(vmem_inputs)
                + [pl.BlockSpec(memory_space=pltpu.MemorySpace.SMEM)]
                * len(smem_inputs))

    return pl.pallas_call(
        _decoder_kernel,
        out_shape=jax.ShapeDtypeStruct((B, 1), jnp.float32),
        in_specs=in_specs,
        out_specs=pl.BlockSpec(memory_space=pltpu.MemorySpace.VMEM),
    )(*vmem_inputs, *smem_inputs)


def make_params(key, M, P, T, F_dim):
    """Deterministic synthetic parameters. Linear weights stored as
    (in_features, out_features) so the math is x @ W."""
    ks = jax.random.split(key, 16)
    s = 0.1
    return {
        'A_b_w':     s * jax.random.normal(ks[0], (F_dim, 1), jnp.float32),
        'A_b_b':     s * jax.random.normal(ks[1], (1, 1), jnp.float32),
        'W_d_w':     s * jax.random.normal(ks[2], (2 * P, M), jnp.float32),
        'W_d_b':     s * jax.random.normal(ks[3], (1, M), jnp.float32),
        'U_d_w':     s * jax.random.normal(ks[4], (M, M), jnp.float32),
        'v_d_w':     s * jax.random.normal(ks[5], (M, 1), jnp.float32),
        'W_tilda_w': s * jax.random.normal(ks[6], (M + 1, 1), jnp.float32),
        'W_tilda_b': s * jax.random.normal(ks[7], (1, 1), jnp.float32),
        'lstm_w_ih': s * jax.random.normal(ks[8], (1, 4 * P), jnp.float32),
        'lstm_w_hh': s * jax.random.normal(ks[9], (P, 4 * P), jnp.float32),
        'lstm_b_ih': s * jax.random.normal(ks[10], (1, 4 * P), jnp.float32),
        'lstm_b_hh': s * jax.random.normal(ks[11], (1, 4 * P), jnp.float32),
        'W_y_w':     s * jax.random.normal(ks[12], (P + M, P), jnp.float32),
        'W_y_b':     s * jax.random.normal(ks[13], (1, P), jnp.float32),
        'v_y_w':     s * jax.random.normal(ks[14], (P, 1), jnp.float32),
        'v_y_b':     s * jax.random.normal(ks[15], (1, 1), jnp.float32),
    }


def reference_forward(encoded, y, params):
    """Pure-JAX replica of the PyTorch forward for verification."""
    B, T, M = encoded.shape
    P = params['lstm_w_hh'].shape[0]
    y_proj = jnp.einsum('btf,fo->bto', y, params['A_b_w'])[..., 0] + params['A_b_b'][0, 0]
    d = jnp.zeros((B, P)); c = jnp.zeros((B, P)); c_t = jnp.zeros((B, M))
    for t in range(T):
        ds = jnp.concatenate([d, c], axis=1)
        x1 = ds @ params['W_d_w'] + params['W_d_b']
        y1 = jnp.einsum('btm,mn->btn', encoded, params['U_d_w'])
        z1 = jnp.tanh(x1[:, None, :] + y1)
        l = jnp.einsum('btm,mo->bto', z1, params['v_d_w'])
        b = jax.nn.softmax(l, axis=1)
        c_t = jnp.sum(b * encoded, axis=1)
        yc = jnp.concatenate([c_t, y_proj[:, t:t + 1]], axis=1)
        y_tilda = yc @ params['W_tilda_w'] + params['W_tilda_b'][0, 0]
        gates = (y_tilda @ params['lstm_w_ih'] + params['lstm_b_ih']
                 + d @ params['lstm_w_hh'] + params['lstm_b_hh'])
        i_g = jax.nn.sigmoid(gates[:, 0:P]); f_g = jax.nn.sigmoid(gates[:, P:2 * P])
        g_g = jnp.tanh(gates[:, 2 * P:3 * P]); o_g = jax.nn.sigmoid(gates[:, 3 * P:4 * P])
        c = f_g * c + i_g * g_g
        d = o_g * jnp.tanh(c)
    dc = jnp.concatenate([d, c_t], axis=1)
    return (dc @ params['W_y_w'] + params['W_y_b']) @ params['v_y_w'] + params['v_y_b'][0, 0]


if __name__ == "__main__":
    # B=8 fills the f32 sublane count (perf review item 7); shapes stay small.
    B, M, P, T, F_dim = 8, 32, 32, 8, 16
    key = jax.random.PRNGKey(0)
    k_enc, k_y, k_p = jax.random.split(key, 3)
    encoded = jax.random.normal(k_enc, (B, T, M), jnp.float32)
    y = jax.random.normal(k_y, (B, T, F_dim), jnp.float32)
    params = make_params(k_p, M, P, T, F_dim)

    packed = jax.tree.map(jax.block_until_ready, pack_params(params))  # cache once

    out = jax.block_until_ready(temporal_attention_decoder(encoded, y, packed))
    ref = jax.block_until_ready(reference_forward(encoded, y, params))
    assert out.shape == (B, 1)
    assert jnp.allclose(out, ref, rtol=2e-2, atol=2e-2), (out, ref)
    print("KERNEL_OK")
</pallas_src>

<mosaic_0001>
module attributes {stable_mosaic.version = 11 : i64} {
  func.func @_decoder_kernel(%arg0: memref<8x8x32xf32, #tpu.memory_space<vmem>>, %arg1: memref<8x8x16xf32, #tpu.memory_space<vmem>>, %arg2: memref<8x128xf32, #tpu.memory_space<vmem>>, %arg3: memref<64x32xf32, #tpu.memory_space<vmem>>, %arg4: memref<32x32xf32, #tpu.memory_space<vmem>>, %arg5: memref<32x128xf32, #tpu.memory_space<vmem>>, %arg6: memref<64x32xf32, #tpu.memory_space<vmem>>, %arg7: memref<4xf32, #tpu.memory_space<smem>>, %arg8: memref<8x1xf32, #tpu.memory_space<vmem>>) attributes {dimension_semantics = [], scalar_prefetch = 0 : i64, scratch_operands = 0 : i64, tpu.core_type = #tpu.core_type<tc>} {
    %c0 = arith.constant 0 : index
    %c0_0 = arith.constant 0 : index
    %c0_1 = arith.constant 0 : index
    %0 = vector.load %arg0[%c0, %c0_0, %c0_1] : memref<8x8x32xf32, #tpu.memory_space<vmem>>, vector<8x8x32xf32>
    %c0_2 = arith.constant 0 : index
    %c0_3 = arith.constant 0 : index
    %c0_4 = arith.constant 0 : index
    %1 = vector.load %arg1[%c0_2, %c0_3, %c0_4] : memref<8x8x16xf32, #tpu.memory_space<vmem>>, vector<8x8x16xf32>
    %c0_5 = arith.constant 0 : index
    %c0_6 = arith.constant 0 : index
    %2 = vector.load %arg2[%c0_5, %c0_6] : memref<8x128xf32, #tpu.memory_space<vmem>>, vector<8x128xf32>
    %3 = vector.extract_strided_slice %2 {offsets = [0, 0], sizes = [1, 16], strides = [1, 1]} : vector<8x128xf32> to vector<1x16xf32>
    %4 = vector.extract_strided_slice %2 {offsets = [1, 0], sizes = [1, 32], strides = [1, 1]} : vector<8x128xf32> to vector<1x32xf32>
    %5 = vector.extract_strided_slice %2 {offsets = [2, 0], sizes = [1, 32], strides = [1, 1]} : vector<8x128xf32> to vector<1x32xf32>
    %6 = vector.extract_strided_slice %2 {offsets = [3, 0], sizes = [1, 32], strides = [1, 1]} : vector<8x128xf32> to vector<1x32xf32>
    %7 = vector.extract_strided_slice %2 {offsets = [4, 0], sizes = [1, 128], strides = [1, 1]} : vector<8x128xf32> to vector<1x128xf32>
    %8 = vector.extract_strided_slice %2 {offsets = [5, 0], sizes = [1, 128], strides = [1, 1]} : vector<8x128xf32> to vector<1x128xf32>
    %9 = vector.extract_strided_slice %2 {offsets = [6, 0], sizes = [1, 32], strides = [1, 1]} : vector<8x128xf32> to vector<1x32xf32>
    %10 = vector.extract_strided_slice %2 {offsets = [7, 0], sizes = [1, 32], strides = [1, 1]} : vector<8x128xf32> to vector<1x32xf32>
    %c0_7 = arith.constant 0 : index
    %c0_8 = arith.constant 0 : index
    %11 = vector.load %arg3[%c0_7, %c0_8] : memref<64x32xf32, #tpu.memory_space<vmem>>, vector<64x32xf32>
    %12 = vector.extract_strided_slice %11 {offsets = [0, 0], sizes = [32, 32], strides = [1, 1]} : vector<64x32xf32> to vector<32x32xf32>
    %13 = vector.extract_strided_slice %11 {offsets = [32, 0], sizes = [32, 32], strides = [1, 1]} : vector<64x32xf32> to vector<32x32xf32>
    %c0_9 = arith.constant 0 : index
    %c0_10 = arith.constant 0 : index
    %14 = vector.load %arg4[%c0_9, %c0_10] : memref<32x32xf32, #tpu.memory_space<vmem>>, vector<32x32xf32>
    %c0_11 = arith.constant 0 : index
    %c0_12 = arith.constant 0 : index
    %15 = vector.load %arg5[%c0_11, %c0_12] : memref<32x128xf32, #tpu.memory_space<vmem>>, vector<32x128xf32>
    %c0_13 = arith.constant 0 : index
    %c0_14 = arith.constant 0 : index
    %16 = vector.load %arg6[%c0_13, %c0_14] : memref<64x32xf32, #tpu.memory_space<vmem>>, vector<64x32xf32>
    %17 = vector.extract_strided_slice %16 {offsets = [0, 0], sizes = [32, 32], strides = [1, 1]} : vector<64x32xf32> to vector<32x32xf32>
    %18 = vector.extract_strided_slice %16 {offsets = [32, 0], sizes = [32, 32], strides = [1, 1]} : vector<64x32xf32> to vector<32x32xf32>
    %c0_15 = arith.constant 0 : index
    %19 = memref.load %arg7[%c0_15] : memref<4xf32, #tpu.memory_space<smem>>
    %c1 = arith.constant 1 : index
    %20 = memref.load %arg7[%c1] : memref<4xf32, #tpu.memory_space<smem>>
    %c2 = arith.constant 2 : index
    %21 = memref.load %arg7[%c2] : memref<4xf32, #tpu.memory_space<smem>>
    %22 = vector.shape_cast %3 : vector<1x16xf32> to vector<1x1x16xf32>
    %23 = vector.broadcast %22 : vector<1x1x16xf32> to vector<8x8x16xf32>
    %24 = arith.mulf %1, %23 : vector<8x8x16xf32>
    %cst = arith.constant dense<0.000000e+00> : vector<8x8xf32>
    %25 = vector.multi_reduction <add>, %24, %cst [2] : vector<8x8x16xf32> to vector<8x8xf32>
    %26 = vector.broadcast %19 : f32 to vector<8x8xf32>
    %27 = arith.addf %25, %26 : vector<8x8xf32>
    %28 = vector.shape_cast %0 : vector<8x8x32xf32> to vector<64x32xf32>
    %cst_16 = arith.constant dense<0.000000e+00> : vector<64x32xf32>
    %29 = tpu.matmul %28, %14, %cst_16 {dimension_numbers = #tpu.dot_dimension_numbers<[1], [0], [0], [1], [0, 0, 1, 1], [], []>} : vector<64x32xf32>, vector<32x32xf32>, vector<64x32xf32> -> vector<64x32xf32>
    %30 = vector.shape_cast %29 : vector<64x32xf32> to vector<8x8x32xf32>
    %cst_17 = arith.constant 0.000000e+00 : f32
    %31 = vector.broadcast %cst_17 : f32 to vector<8x32xf32>
    %cst_18 = arith.constant 0.000000e+00 : f32
    %32 = vector.broadcast %cst_18 : f32 to vector<8x32xf32>
    %cst_19 = arith.constant dense<0.000000e+00> : vector<8x32xf32>
    %33 = tpu.matmul %31, %12, %cst_19 {dimension_numbers = #tpu.dot_dimension_numbers<[1], [0], [0], [1], [0, 0, 1, 1], [], []>} : vector<8x32xf32>, vector<32x32xf32>, vector<8x32xf32> -> vector<8x32xf32>
    %cst_20 = arith.constant dense<0.000000e+00> : vector<8x32xf32>
    %34 = tpu.matmul %32, %13, %cst_20 {dimension_numbers = #tpu.dot_dimension_numbers<[1], [0], [0], [1], [0, 0, 1, 1], [], []>} : vector<8x32xf32>, vector<32x32xf32>, vector<8x32xf32> -> vector<8x32xf32>
    %35 = arith.addf %33, %34 : vector<8x32xf32>
    %36 = vector.broadcast %6 : vector<1x32xf32> to vector<8x32xf32>
    %37 = arith.addf %35, %36 : vector<8x32xf32>
    %38 = vector.shape_cast %37 : vector<8x32xf32> to vector<8x1x32xf32>
    %39 = vector.broadcast %38 : vector<8x1x32xf32> to vector<8x8x32xf32>
    %40 = arith.addf %39, %30 : vector<8x8x32xf32>
    %41 = math.tanh %40 : vector<8x8x32xf32>
    %42 = vector.shape_cast %4 : vector<1x32xf32> to vector<1x1x32xf32>
    %43 = vector.broadcast %42 : vector<1x1x32xf32> to vector<8x8x32xf32>
    %44 = arith.mulf %41, %43 : vector<8x8x32xf32>
    %cst_21 = arith.constant dense<0.000000e+00> : vector<8x8xf32>
    %45 = vector.multi_reduction <add>, %44, %cst_21 [2] : vector<8x8x32xf32> to vector<8x8xf32>
    %46 = vector.broadcast %21 : f32 to vector<8x8xf32>
    %47 = arith.subf %45, %46 : vector<8x8xf32>
    %48 = math.exp %47 : vector<8x8xf32>
    %cst_22 = arith.constant dense<0.000000e+00> : vector<8xf32>
    %49 = vector.multi_reduction <add>, %48, %cst_22 [1] : vector<8x8xf32> to vector<8xf32>
    %50 = vector.shape_cast %49 : vector<8xf32> to vector<8x1xf32>
    %51 = vector.shape_cast %48 : vector<8x8xf32> to vector<8x8x1xf32>
    %52 = vector.broadcast %51 : vector<8x8x1xf32> to vector<8x8x32xf32>
    %53 = arith.mulf %52, %0 : vector<8x8x32xf32>
    %cst_23 = arith.constant dense<0.000000e+00> : vector<8x32xf32>
    %54 = vector.multi_reduction <add>, %53, %cst_23 [1] : vector<8x8x32xf32> to vector<8x32xf32>
    %55 = tpu.reciprocal %50 {approx = true} : vector<8x1xf32> -> vector<8x1xf32>
    %56 = vector.broadcast %55 : vector<8x1xf32> to vector<8x32xf32>
    %57 = arith.mulf %54, %56 : vector<8x32xf32>
    %58 = vector.broadcast %5 : vector<1x32xf32> to vector<8x32xf32>
    %59 = arith.mulf %57, %58 : vector<8x32xf32>
    %cst_24 = arith.constant dense<0.000000e+00> : vector<8xf32>
    %60 = vector.multi_reduction <add>, %59, %cst_24 [1] : vector<8x32xf32> to vector<8xf32>
    %61 = vector.shape_cast %60 : vector<8xf32> to vector<8x1xf32>
    %62 = vector.extract_strided_slice %27 {offsets = [0, 0], sizes = [8, 1], strides = [1, 1]} : vector<8x8xf32> to vector<8x1xf32>
    %63 = arith.addf %61, %62 : vector<8x1xf32>
    %64 = vector.broadcast %63 : vector<8x1xf32> to vector<8x128xf32>
    %65 = vector.broadcast %7 : vector<1x128xf32> to vector<8x128xf32>
    %66 = arith.mulf %64, %65 : vector<8x128xf32>
    %cst_25 = arith.constant dense<0.000000e+00> : vector<8x128xf32>
    %67 = tpu.matmul %31, %15, %cst_25 {dimension_numbers = #tpu.dot_dimension_numbers<[1], [0], [0], [1], [0, 0, 1, 1], [], []>} : vector<8x32xf32>, vector<32x128xf32>, vector<8x128xf32> -> vector<8x128xf32>
    %68 = arith.addf %66, %67 : vector<8x128xf32>
    %69 = vector.broadcast %8 : vector<1x128xf32> to vector<8x128xf32>
    %70 = arith.addf %68, %69 : vector<8x128xf32>
    %71 = arith.negf %70 : vector<8x128xf32>
    %72 = math.exp %71 : vector<8x128xf32>
    %cst_26 = arith.constant 1.000000e+00 : f32
    %73 = vector.broadcast %cst_26 : f32 to vector<8x128xf32>
    %74 = arith.addf %73, %72 : vector<8x128xf32>
    %75 = arith.divf %73, %74 : vector<8x128xf32>
    %76 = vector.extract_strided_slice %75 {offsets = [0, 0], sizes = [8, 32], strides = [1, 1]} : vector<8x128xf32> to vector<8x32xf32>
    %77 = vector.extract_strided_slice %75 {offsets = [0, 32], sizes = [8, 32], strides = [1, 1]} : vector<8x128xf32> to vector<8x32xf32>
    %78 = vector.extract_strided_slice %75 {offsets = [0, 64], sizes = [8, 32], strides = [1, 1]} : vector<8x128xf32> to vector<8x32xf32>
    %79 = vector.extract_strided_slice %70 {offsets = [0, 96], sizes = [8, 32], strides = [1, 1]} : vector<8x128xf32> to vector<8x32xf32>
    %80 = math.tanh %79 : vector<8x32xf32>
    %81 = arith.mulf %77, %32 : vector<8x32xf32>
    %82 = arith.mulf %76, %80 : vector<8x32xf32>
    %83 = arith.addf %81, %82 : vector<8x32xf32>
    %84 = math.tanh %83 : vector<8x32xf32>
    %85 = arith.mulf %78, %84 : vector<8x32xf32>
    %cst_27 = arith.constant dense<0.000000e+00> : vector<8x32xf32>
    %86 = tpu.matmul %85, %12, %cst_27 {dimension_numbers = #tpu.dot_dimension_numbers<[1], [0], [0], [1], [0, 0, 1, 1], [], []>} : vector<8x32xf32>, vector<32x32xf32>, vector<8x32xf32> -> vector<8x32xf32>
    %cst_28 = arith.constant dense<0.000000e+00> : vector<8x32xf32>
    %87 = tpu.matmul %83, %13, %cst_28 {dimension_numbers = #tpu.dot_dimension_numbers<[1], [0], [0], [1], [0, 0, 1, 1], [], []>} : vector<8x32xf32>, vector<32x32xf32>, vector<8x32xf32> -> vector<8x32xf32>
    %88 = arith.addf %86, %87 : vector<8x32xf32>
    %89 = vector.broadcast %6 : vector<1x32xf32> to vector<8x32xf32>
    %90 = arith.addf %88, %89 : vector<8x32xf32>
    %91 = vector.shape_cast %90 : vector<8x32xf32> to vector<8x1x32xf32>
    %92 = vector.broadcast %91 : vector<8x1x32xf32> to vector<8x8x32xf32>
    %93 = arith.addf %92, %30 : vector<8x8x32xf32>
    %94 = math.tanh %93 : vector<8x8x32xf32>
    %95 = vector.shape_cast %4 : vector<1x32xf32> to vector<1x1x32xf32>
    %96 = vector.broadcast %95 : vector<1x1x32xf32> to vector<8x8x32xf32>
    %97 = arith.mulf %94, %96 : vector<8x8x32xf32>
    %cst_29 = arith.constant dense<0.000000e+00> : vector<8x8xf32>
    %98 = vector.multi_reduction <add>, %97, %cst_29 [2] : vector<8x8x32xf32> to vector<8x8xf32>
    %99 = vector.broadcast %21 : f32 to vector<8x8xf32>
    %100 = arith.subf %98, %99 : vector<8x8xf32>
    %101 = math.exp %100 : vector<8x8xf32>
    %cst_30 = arith.constant dense<0.000000e+00> : vector<8xf32>
    %102 = vector.multi_reduction <add>, %101, %cst_30 [1] : vector<8x8xf32> to vector<8xf32>
    %103 = vector.shape_cast %102 : vector<8xf32> to vector<8x1xf32>
    %104 = vector.shape_cast %101 : vector<8x8xf32> to vector<8x8x1xf32>
    %105 = vector.broadcast %104 : vector<8x8x1xf32> to vector<8x8x32xf32>
    %106 = arith.mulf %105, %0 : vector<8x8x32xf32>
    %cst_31 = arith.constant dense<0.000000e+00> : vector<8x32xf32>
    %107 = vector.multi_reduction <add>, %106, %cst_31 [1] : vector<8x8x32xf32> to vector<8x32xf32>
    %108 = tpu.reciprocal %103 {approx = true} : vector<8x1xf32> -> vector<8x1xf32>
    %109 = vector.broadcast %108 : vector<8x1xf32> to vector<8x32xf32>
    %110 = arith.mulf %107, %109 : vector<8x32xf32>
    %111 = vector.broadcast %5 : vector<1x32xf32> to vector<8x32xf32>
    %112 = arith.mulf %110, %111 : vector<8x32xf32>
    %cst_32 = arith.constant dense<0.000000e+00> : vector<8xf32>
    %113 = vector.multi_reduction <add>, %112, %cst_32 [1] : vector<8x32xf32> to vector<8xf32>
    %114 = vector.shape_cast %113 : vector<8xf32> to vector<8x1xf32>
    %115 = vector.extract_strided_slice %27 {offsets = [0, 1], sizes = [8, 1], strides = [1, 1]} : vector<8x8xf32> to vector<8x1xf32>
    %116 = arith.addf %114, %115 : vector<8x1xf32>
    %117 = vector.broadcast %116 : vector<8x1xf32> to vector<8x128xf32>
    %118 = vector.broadcast %7 : vector<1x128xf32> to vector<8x128xf32>
    %119 = arith.mulf %117, %118 : vector<8x128xf32>
    %cst_33 = arith.constant dense<0.000000e+00> : vector<8x128xf32>
    %120 = tpu.matmul %85, %15, %cst_33 {dimension_numbers = #tpu.dot_dimension_numbers<[1], [0], [0], [1], [0, 0, 1, 1], [], []>} : vector<8x32xf32>, vector<32x128xf32>, vector<8x128xf32> -> vector<8x128xf32>
    %121 = arith.addf %119, %120 : vector<8x128xf32>
    %122 = vector.broadcast %8 : vector<1x128xf32> to vector<8x128xf32>
    %123 = arith.addf %121, %122 : vector<8x128xf32>
    %124 = arith.negf %123 : vector<8x128xf32>
    %125 = math.exp %124 : vector<8x128xf32>
    %cst_34 = arith.constant 1.000000e+00 : f32
    %126 = vector.broadcast %cst_34 : f32 to vector<8x128xf32>
    %127 = arith.addf %126, %125 : vector<8x128xf32>
    %128 = arith.divf %126, %127 : vector<8x128xf32>
    %129 = vector.extract_strided_slice %128 {offsets = [0, 0], sizes = [8, 32], strides = [1, 1]} : vector<8x128xf32> to vector<8x32xf32>
    %130 = vector.extract_strided_slice %128 {offsets = [0, 32], sizes = [8, 32], strides = [1, 1]} : vector<8x128xf32> to vector<8x32xf32>
    %131 = vector.extract_strided_slice %128 {offsets = [0, 64], sizes = [8, 32], strides = [1, 1]} : vector<8x128xf32> to vector<8x32xf32>
    %132 = vector.extract_strided_slice %123 {offsets = [0, 96], sizes = [8, 32], strides = [1, 1]} : vector<8x128xf32> to vector<8x32xf32>
    %133 = math.tanh %132 : vector<8x32xf32>
    %134 = arith.mulf %130, %83 : vector<8x32xf32>
    %135 = arith.mulf %129, %133 : vector<8x32xf32>
    %136 = arith.addf %134, %135 : vector<8x32xf32>
    %137 = math.tanh %136 : vector<8x32xf32>
    %138 = arith.mulf %131, %137 : vector<8x32xf32>
    %cst_35 = arith.constant dense<0.000000e+00> : vector<8x32xf32>
    %139 = tpu.matmul %138, %12, %cst_35 {dimension_numbers = #tpu.dot_dimension_numbers<[1], [0], [0], [1], [0, 0, 1, 1], [], []>} : vector<8x32xf32>, vector<32x32xf32>, vector<8x32xf32> -> vector<8x32xf32>
    %cst_36 = arith.constant dense<0.000000e+00> : vector<8x32xf32>
    %140 = tpu.matmul %136, %13, %cst_36 {dimension_numbers = #tpu.dot_dimension_numbers<[1], [0], [0], [1], [0, 0, 1, 1], [], []>} : vector<8x32xf32>, vector<32x32xf32>, vector<8x32xf32> -> vector<8x32xf32>
    %141 = arith.addf %139, %140 : vector<8x32xf32>
    %142 = vector.broadcast %6 : vector<1x32xf32> to vector<8x32xf32>
    %143 = arith.addf %141, %142 : vector<8x32xf32>
    %144 = vector.shape_cast %143 : vector<8x32xf32> to vector<8x1x32xf32>
    %145 = vector.broadcast %144 : vector<8x1x32xf32> to vector<8x8x32xf32>
    %146 = arith.addf %145, %30 : vector<8x8x32xf32>
    %147 = math.tanh %146 : vector<8x8x32xf32>
    %148 = vector.shape_cast %4 : vector<1x32xf32> to vector<1x1x32xf32>
    %149 = vector.broadcast %148 : vector<1x1x32xf32> to vector<8x8x32xf32>
    %150 = arith.mulf %147, %149 : vector<8x8x32xf32>
    %cst_37 = arith.constant dense<0.000000e+00> : vector<8x8xf32>
    %151 = vector.multi_reduction <add>, %150, %cst_37 [2] : vector<8x8x32xf32> to vector<8x8xf32>
    %152 = vector.broadcast %21 : f32 to vector<8x8xf32>
    %153 = arith.subf %151, %152 : vector<8x8xf32>
    %154 = math.exp %153 : vector<8x8xf32>
    %cst_38 = arith.constant dense<0.000000e+00> : vector<8xf32>
    %155 = vector.multi_reduction <add>, %154, %cst_38 [1] : vector<8x8xf32> to vector<8xf32>
    %156 = vector.shape_cast %155 : vector<8xf32> to vector<8x1xf32>
    %157 = vector.shape_cast %154 : vector<8x8xf32> to vector<8x8x1xf32>
    %158 = vector.broadcast %157 : vector<8x8x1xf32> to vector<8x8x32xf32>
    %159 = arith.mulf %158, %0 : vector<8x8x32xf32>
    %cst_39 = arith.constant dense<0.000000e+00> : vector<8x32xf32>
    %160 = vector.multi_reduction <add>, %159, %cst_39 [1] : vector<8x8x32xf32> to vector<8x32xf32>
    %161 = tpu.reciprocal %156 {approx = true} : vector<8x1xf32> -> vector<8x1xf32>
    %162 = vector.broadcast %161 : vector<8x1xf32> to vector<8x32xf32>
    %163 = arith.mulf %160, %162 : vector<8x32xf32>
    %164 = vector.broadcast %5 : vector<1x32xf32> to vector<8x32xf32>
    %165 = arith.mulf %163, %164 : vector<8x32xf32>
    %cst_40 = arith.constant dense<0.000000e+00> : vector<8xf32>
    %166 = vector.multi_reduction <add>, %165, %cst_40 [1] : vector<8x32xf32> to vector<8xf32>
    %167 = vector.shape_cast %166 : vector<8xf32> to vector<8x1xf32>
    %168 = vector.extract_strided_slice %27 {offsets = [0, 2], sizes = [8, 1], strides = [1, 1]} : vector<8x8xf32> to vector<8x1xf32>
    %169 = arith.addf %167, %168 : vector<8x1xf32>
    %170 = vector.broadcast %169 : vector<8x1xf32> to vector<8x128xf32>
    %171 = vector.broadcast %7 : vector<1x128xf32> to vector<8x128xf32>
    %172 = arith.mulf %170, %171 : vector<8x128xf32>
    %cst_41 = arith.constant dense<0.000000e+00> : vector<8x128xf32>
    %173 = tpu.matmul %138, %15, %cst_41 {dimension_numbers = #tpu.dot_dimension_numbers<[1], [0], [0], [1], [0, 0, 1, 1], [], []>} : vector<8x32xf32>, vector<32x128xf32>, vector<8x128xf32> -> vector<8x128xf32>
    %174 = arith.addf %172, %173 : vector<8x128xf32>
    %175 = vector.broadcast %8 : vector<1x128xf32> to vector<8x128xf32>
    %176 = arith.addf %174, %175 : vector<8x128xf32>
    %177 = arith.negf %176 : vector<8x128xf32>
    %178 = math.exp %177 : vector<8x128xf32>
    %cst_42 = arith.constant 1.000000e+00 : f32
    %179 = vector.broadcast %cst_42 : f32 to vector<8x128xf32>
    %180 = arith.addf %179, %178 : vector<8x128xf32>
    %181 = arith.divf %179, %180 : vector<8x128xf32>
    %182 = vector.extract_strided_slice %181 {offsets = [0, 0], sizes = [8, 32], strides = [1, 1]} : vector<8x128xf32> to vector<8x32xf32>
    %183 = vector.extract_strided_slice %181 {offsets = [0, 32], sizes = [8, 32], strides = [1, 1]} : vector<8x128xf32> to vector<8x32xf32>
    %184 = vector.extract_strided_slice %181 {offsets = [0, 64], sizes = [8, 32], strides = [1, 1]} : vector<8x128xf32> to vector<8x32xf32>
    %185 = vector.extract_strided_slice %176 {offsets = [0, 96], sizes = [8, 32], strides = [1, 1]} : vector<8x128xf32> to vector<8x32xf32>
    %186 = math.tanh %185 : vector<8x32xf32>
    %187 = arith.mulf %183, %136 : vector<8x32xf32>
    %188 = arith.mulf %182, %186 : vector<8x32xf32>
    %189 = arith.addf %187, %188 : vector<8x32xf32>
    %190 = math.tanh %189 : vector<8x32xf32>
    %191 = arith.mulf %184, %190 : vector<8x32xf32>
    %cst_43 = arith.constant dense<0.000000e+00> : vector<8x32xf32>
    %192 = tpu.matmul %191, %12, %cst_43 {dimension_numbers = #tpu.dot_dimension_numbers<[1], [0], [0], [1], [0, 0, 1, 1], [], []>} : vector<8x32xf32>, vector<32x32xf32>, vector<8x32xf32> -> vector<8x32xf32>
    %cst_44 = arith.constant dense<0.000000e+00> : vector<8x32xf32>
    %193 = tpu.matmul %189, %13, %cst_44 {dimension_numbers = #tpu.dot_dimension_numbers<[1], [0], [0], [1], [0, 0, 1, 1], [], []>} : vector<8x32xf32>, vector<32x32xf32>, vector<8x32xf32> -> vector<8x32xf32>
    %194 = arith.addf %192, %193 : vector<8x32xf32>
    %195 = vector.broadcast %6 : vector<1x32xf32> to vector<8x32xf32>
    %196 = arith.addf %194, %195 : vector<8x32xf32>
    %197 = vector.shape_cast %196 : vector<8x32xf32> to vector<8x1x32xf32>
    %198 = vector.broadcast %197 : vector<8x1x32xf32> to vector<8x8x32xf32>
    %199 = arith.addf %198, %30 : vector<8x8x32xf32>
    %200 = math.tanh %199 : vector<8x8x32xf32>
    %201 = vector.shape_cast %4 : vector<1x32xf32> to vector<1x1x32xf32>
    %202 = vector.broadcast %201 : vector<1x1x32xf32> to vector<8x8x32xf32>
    %203 = arith.mulf %200, %202 : vector<8x8x32xf32>
    %cst_45 = arith.constant dense<0.000000e+00> : vector<8x8xf32>
    %204 = vector.multi_reduction <add>, %203, %cst_45 [2] : vector<8x8x32xf32> to vector<8x8xf32>
    %205 = vector.broadcast %21 : f32 to vector<8x8xf32>
    %206 = arith.subf %204, %205 : vector<8x8xf32>
    %207 = math.exp %206 : vector<8x8xf32>
    %cst_46 = arith.constant dense<0.000000e+00> : vector<8xf32>
    %208 = vector.multi_reduction <add>, %207, %cst_46 [1] : vector<8x8xf32> to vector<8xf32>
    %209 = vector.shape_cast %208 : vector<8xf32> to vector<8x1xf32>
    %210 = vector.shape_cast %207 : vector<8x8xf32> to vector<8x8x1xf32>
    %211 = vector.broadcast %210 : vector<8x8x1xf32> to vector<8x8x32xf32>
    %212 = arith.mulf %211, %0 : vector<8x8x32xf32>
    %cst_47 = arith.constant dense<0.000000e+00> : vector<8x32xf32>
    %213 = vector.multi_reduction <add>, %212, %cst_47 [1] : vector<8x8x32xf32> to vector<8x32xf32>
    %214 = tpu.reciprocal %209 {approx = true} : vector<8x1xf32> -> vector<8x1xf32>
    %215 = vector.broadcast %214 : vector<8x1xf32> to vector<8x32xf32>
    %216 = arith.mulf %213, %215 : vector<8x32xf32>
    %217 = vector.broadcast %5 : vector<1x32xf32> to vector<8x32xf32>
    %218 = arith.mulf %216, %217 : vector<8x32xf32>
    %cst_48 = arith.constant dense<0.000000e+00> : vector<8xf32>
    %219 = vector.multi_reduction <add>, %218, %cst_48 [1] : vector<8x32xf32> to vector<8xf32>
    %220 = vector.shape_cast %219 : vector<8xf32> to vector<8x1xf32>
    %221 = vector.extract_strided_slice %27 {offsets = [0, 3], sizes = [8, 1], strides = [1, 1]} : vector<8x8xf32> to vector<8x1xf32>
    %222 = arith.addf %220, %221 : vector<8x1xf32>
    %223 = vector.broadcast %222 : vector<8x1xf32> to vector<8x128xf32>
    %224 = vector.broadcast %7 : vector<1x128xf32> to vector<8x128xf32>
    %225 = arith.mulf %223, %224 : vector<8x128xf32>
    %cst_49 = arith.constant dense<0.000000e+00> : vector<8x128xf32>
    %226 = tpu.matmul %191, %15, %cst_49 {dimension_numbers = #tpu.dot_dimension_numbers<[1], [0], [0], [1], [0, 0, 1, 1], [], []>} : vector<8x32xf32>, vector<32x128xf32>, vector<8x128xf32> -> vector<8x128xf32>
    %227 = arith.addf %225, %226 : vector<8x128xf32>
    %228 = vector.broadcast %8 : vector<1x128xf32> to vector<8x128xf32>
    %229 = arith.addf %227, %228 : vector<8x128xf32>
    %230 = arith.negf %229 : vector<8x128xf32>
    %231 = math.exp %230 : vector<8x128xf32>
    %cst_50 = arith.constant 1.000000e+00 : f32
    %232 = vector.broadcast %cst_50 : f32 to vector<8x128xf32>
    %233 = arith.addf %232, %231 : vector<8x128xf32>
    %234 = arith.divf %232, %233 : vector<8x128xf32>
    %235 = vector.extract_strided_slice %234 {offsets = [0, 0], sizes = [8, 32], strides = [1, 1]} : vector<8x128xf32> to vector<8x32xf32>
    %236 = vector.extract_strided_slice %234 {offsets = [0, 32], sizes = [8, 32], strides = [1, 1]} : vector<8x128xf32> to vector<8x32xf32>
    %237 = vector.extract_strided_slice %234 {offsets = [0, 64], sizes = [8, 32], strides = [1, 1]} : vector<8x128xf32> to vector<8x32xf32>
    %238 = vector.extract_strided_slice %229 {offsets = [0, 96], sizes = [8, 32], strides = [1, 1]} : vector<8x128xf32> to vector<8x32xf32>
    %239 = math.tanh %238 : vector<8x32xf32>
    %240 = arith.mulf %236, %189 : vector<8x32xf32>
    %241 = arith.mulf %235, %239 : vector<8x32xf32>
    %242 = arith.addf %240, %241 : vector<8x32xf32>
    %243 = math.tanh %242 : vector<8x32xf32>
    %244 = arith.mulf %237, %243 : vector<8x32xf32>
    %cst_51 = arith.constant dense<0.000000e+00> : vector<8x32xf32>
    %245 = tpu.matmul %244, %12, %cst_51 {dimension_numbers = #tpu.dot_dimension_numbers<[1], [0], [0], [1], [0, 0, 1, 1], [], []>} : vector<8x32xf32>, vector<32x32xf32>, vector<8x32xf32> -> vector<8x32xf32>
    %cst_52 = arith.constant dense<0.000000e+00> : vector<8x32xf32>
    %246 = tpu.matmul %242, %13, %cst_52 {dimension_numbers = #tpu.dot_dimension_numbers<[1], [0], [0], [1], [0, 0, 1, 1], [], []>} : vector<8x32xf32>, vector<32x32xf32>, vector<8x32xf32> -> vector<8x32xf32>
    %247 = arith.addf %245, %246 : vector<8x32xf32>
    %248 = vector.broadcast %6 : vector<1x32xf32> to vector<8x32xf32>
    %249 = arith.addf %247, %248 : vector<8x32xf32>
    %250 = vector.shape_cast %249 : vector<8x32xf32> to vector<8x1x32xf32>
    %251 = vector.broadcast %250 : vector<8x1x32xf32> to vector<8x8x32xf32>
    %252 = arith.addf %251, %30 : vector<8x8x32xf32>
    %253 = math.tanh %252 : vector<8x8x32xf32>
    %254 = vector.shape_cast %4 : vector<1x32xf32> to vector<1x1x32xf32>
    %255 = vector.broadcast %254 : vector<1x1x32xf32> to vector<8x8x32xf32>
    %256 = arith.mulf %253, %255 : vector<8x8x32xf32>
    %cst_53 = arith.constant dense<0.000000e+00> : vector<8x8xf32>
    %257 = vector.multi_reduction <add>, %256, %cst_53 [2] : vector<8x8x32xf32> to vector<8x8xf32>
    %258 = vector.broadcast %21 : f32 to vector<8x8xf32>
    %259 = arith.subf %257, %258 : vector<8x8xf32>
    %260 = math.exp %259 : vector<8x8xf32>
    %cst_54 = arith.constant dense<0.000000e+00> : vector<8xf32>
    %261 = vector.multi_reduction <add>, %260, %cst_54 [1] : vector<8x8xf32> to vector<8xf32>
    %262 = vector.shape_cast %261 : vector<8xf32> to vector<8x1xf32>
    %263 = vector.shape_cast %260 : vector<8x8xf32> to vector<8x8x1xf32>
    %264 = vector.broadcast %263 : vector<8x8x1xf32> to vector<8x8x32xf32>
    %265 = arith.mulf %264, %0 : vector<8x8x32xf32>
    %cst_55 = arith.constant dense<0.000000e+00> : vector<8x32xf32>
    %266 = vector.multi_reduction <add>, %265, %cst_55 [1] : vector<8x8x32xf32> to vector<8x32xf32>
    %267 = tpu.reciprocal %262 {approx = true} : vector<8x1xf32> -> vector<8x1xf32>
    %268 = vector.broadcast %267 : vector<8x1xf32> to vector<8x32xf32>
    %269 = arith.mulf %266, %268 : vector<8x32xf32>
    %270 = vector.broadcast %5 : vector<1x32xf32> to vector<8x32xf32>
    %271 = arith.mulf %269, %270 : vector<8x32xf32>
    %cst_56 = arith.constant dense<0.000000e+00> : vector<8xf32>
    %272 = vector.multi_reduction <add>, %271, %cst_56 [1] : vector<8x32xf32> to vector<8xf32>
    %273 = vector.shape_cast %272 : vector<8xf32> to vector<8x1xf32>
    %274 = vector.extract_strided_slice %27 {offsets = [0, 4], sizes = [8, 1], strides = [1, 1]} : vector<8x8xf32> to vector<8x1xf32>
    %275 = arith.addf %273, %274 : vector<8x1xf32>
    %276 = vector.broadcast %275 : vector<8x1xf32> to vector<8x128xf32>
    %277 = vector.broadcast %7 : vector<1x128xf32> to vector<8x128xf32>
    %278 = arith.mulf %276, %277 : vector<8x128xf32>
    %cst_57 = arith.constant dense<0.000000e+00> : vector<8x128xf32>
    %279 = tpu.matmul %244, %15, %cst_57 {dimension_numbers = #tpu.dot_dimension_numbers<[1], [0], [0], [1], [0, 0, 1, 1], [], []>} : vector<8x32xf32>, vector<32x128xf32>, vector<8x128xf32> -> vector<8x128xf32>
    %280 = arith.addf %278, %279 : vector<8x128xf32>
    %281 = vector.broadcast %8 : vector<1x128xf32> to vector<8x128xf32>
    %282 = arith.addf %280, %281 : vector<8x128xf32>
    %283 = arith.negf %282 : vector<8x128xf32>
    %284 = math.exp %283 : vector<8x128xf32>
    %cst_58 = arith.constant 1.000000e+00 : f32
    %285 = vector.broadcast %cst_58 : f32 to vector<8x128xf32>
    %286 = arith.addf %285, %284 : vector<8x128xf32>
    %287 = arith.divf %285, %286 : vector<8x128xf32>
    %288 = vector.extract_strided_slice %287 {offsets = [0, 0], sizes = [8, 32], strides = [1, 1]} : vector<8x128xf32> to vector<8x32xf32>
    %289 = vector.extract_strided_slice %287 {offsets = [0, 32], sizes = [8, 32], strides = [1, 1]} : vector<8x128xf32> to vector<8x32xf32>
    %290 = vector.extract_strided_slice %287 {offsets = [0, 64], sizes = [8, 32], strides = [1, 1]} : vector<8x128xf32> to vector<8x32xf32>
    %291 = vector.extract_strided_slice %282 {offsets = [0, 96], sizes = [8, 32], strides = [1, 1]} : vector<8x128xf32> to vector<8x32xf32>
    %292 = math.tanh %291 : vector<8x32xf32>
    %293 = arith.mulf %289, %242 : vector<8x32xf32>
    %294 = arith.mulf %288, %292 : vector<8x32xf32>
    %295 = arith.addf %293, %294 : vector<8x32xf32>
    %296 = math.tanh %295 : vector<8x32xf32>
    %297 = arith.mulf %290, %296 : vector<8x32xf32>
    %cst_59 = arith.constant dense<0.000000e+00> : vector<8x32xf32>
    %298 = tpu.matmul %297, %12, %cst_59 {dimension_numbers = #tpu.dot_dimension_numbers<[1], [0], [0], [1], [0, 0, 1, 1], [], []>} : vector<8x32xf32>, vector<32x32xf32>, vector<8x32xf32> -> vector<8x32xf32>
    %cst_60 = arith.constant dense<0.000000e+00> : vector<8x32xf32>
    %299 = tpu.matmul %295, %13, %cst_60 {dimension_numbers = #tpu.dot_dimension_numbers<[1], [0], [0], [1], [0, 0, 1, 1], [], []>} : vector<8x32xf32>, vector<32x32xf32>, vector<8x32xf32> -> vector<8x32xf32>
    %300 = arith.addf %298, %299 : vector<8x32xf32>
    %301 = vector.broadcast %6 : vector<1x32xf32> to vector<8x32xf32>
    %302 = arith.addf %300, %301 : vector<8x32xf32>
    %303 = vector.shape_cast %302 : vector<8x32xf32> to vector<8x1x32xf32>
    %304 = vector.broadcast %303 : vector<8x1x32xf32> to vector<8x8x32xf32>
    %305 = arith.addf %304, %30 : vector<8x8x32xf32>
    %306 = math.tanh %305 : vector<8x8x32xf32>
    %307 = vector.shape_cast %4 : vector<1x32xf32> to vector<1x1x32xf32>
    %308 = vector.broadcast %307 : vector<1x1x32xf32> to vector<8x8x32xf32>
    %309 = arith.mulf %306, %308 : vector<8x8x32xf32>
    %cst_61 = arith.constant dense<0.000000e+00> : vector<8x8xf32>
    %310 = vector.multi_reduction <add>, %309, %cst_61 [2] : vector<8x8x32xf32> to vector<8x8xf32>
    %311 = vector.broadcast %21 : f32 to vector<8x8xf32>
    %312 = arith.subf %310, %311 : vector<8x8xf32>
    %313 = math.exp %312 : vector<8x8xf32>
    %cst_62 = arith.constant dense<0.000000e+00> : vector<8xf32>
    %314 = vector.multi_reduction <add>, %313, %cst_62 [1] : vector<8x8xf32> to vector<8xf32>
    %315 = vector.shape_cast %314 : vector<8xf32> to vector<8x1xf32>
    %316 = vector.shape_cast %313 : vector<8x8xf32> to vector<8x8x1xf32>
    %317 = vector.broadcast %316 : vector<8x8x1xf32> to vector<8x8x32xf32>
    %318 = arith.mulf %317, %0 : vector<8x8x32xf32>
    %cst_63 = arith.constant dense<0.000000e+00> : vector<8x32xf32>
    %319 = vector.multi_reduction <add>, %318, %cst_63 [1] : vector<8x8x32xf32> to vector<8x32xf32>
    %320 = tpu.reciprocal %315 {approx = true} : vector<8x1xf32> -> vector<8x1xf32>
    %321 = vector.broadcast %320 : vector<8x1xf32> to vector<8x32xf32>
    %322 = arith.mulf %319, %321 : vector<8x32xf32>
    %323 = vector.broadcast %5 : vector<1x32xf32> to vector<8x32xf32>
    %324 = arith.mulf %322, %323 : vector<8x32xf32>
    %cst_64 = arith.constant dense<0.000000e+00> : vector<8xf32>
    %325 = vector.multi_reduction <add>, %324, %cst_64 [1] : vector<8x32xf32> to vector<8xf32>
    %326 = vector.shape_cast %325 : vector<8xf32> to vector<8x1xf32>
    %327 = vector.extract_strided_slice %27 {offsets = [0, 5], sizes = [8, 1], strides = [1, 1]} : vector<8x8xf32> to vector<8x1xf32>
    %328 = arith.addf %326, %327 : vector<8x1xf32>
    %329 = vector.broadcast %328 : vector<8x1xf32> to vector<8x128xf32>
    %330 = vector.broadcast %7 : vector<1x128xf32> to vector<8x128xf32>
    %331 = arith.mulf %329, %330 : vector<8x128xf32>
    %cst_65 = arith.constant dense<0.000000e+00> : vector<8x128xf32>
    %332 = tpu.matmul %297, %15, %cst_65 {dimension_numbers = #tpu.dot_dimension_numbers<[1], [0], [0], [1], [0, 0, 1, 1], [], []>} : vector<8x32xf32>, vector<32x128xf32>, vector<8x128xf32> -> vector<8x128xf32>
    %333 = arith.addf %331, %332 : vector<8x128xf32>
    %334 = vector.broadcast %8 : vector<1x128xf32> to vector<8x128xf32>
    %335 = arith.addf %333, %334 : vector<8x128xf32>
    %336 = arith.negf %335 : vector<8x128xf32>
    %337 = math.exp %336 : vector<8x128xf32>
    %cst_66 = arith.constant 1.000000e+00 : f32
    %338 = vector.broadcast %cst_66 : f32 to vector<8x128xf32>
    %339 = arith.addf %338, %337 : vector<8x128xf32>
    %340 = arith.divf %338, %339 : vector<8x128xf32>
    %341 = vector.extract_strided_slice %340 {offsets = [0, 0], sizes = [8, 32], strides = [1, 1]} : vector<8x128xf32> to vector<8x32xf32>
    %342 = vector.extract_strided_slice %340 {offsets = [0, 32], sizes = [8, 32], strides = [1, 1]} : vector<8x128xf32> to vector<8x32xf32>
    %343 = vector.extract_strided_slice %340 {offsets = [0, 64], sizes = [8, 32], strides = [1, 1]} : vector<8x128xf32> to vector<8x32xf32>
    %344 = vector.extract_strided_slice %335 {offsets = [0, 96], sizes = [8, 32], strides = [1, 1]} : vector<8x128xf32> to vector<8x32xf32>
    %345 = math.tanh %344 : vector<8x32xf32>
    %346 = arith.mulf %342, %295 : vector<8x32xf32>
    %347 = arith.mulf %341, %345 : vector<8x32xf32>
    %348 = arith.addf %346, %347 : vector<8x32xf32>
    %349 = math.tanh %348 : vector<8x32xf32>
    %350 = arith.mulf %343, %349 : vector<8x32xf32>
    %cst_67 = arith.constant dense<0.000000e+00> : vector<8x32xf32>
    %351 = tpu.matmul %350, %12, %cst_67 {dimension_numbers = #tpu.dot_dimension_numbers<[1], [0], [0], [1], [0, 0, 1, 1], [], []>} : vector<8x32xf32>, vector<32x32xf32>, vector<8x32xf32> -> vector<8x32xf32>
    %cst_68 = arith.constant dense<0.000000e+00> : vector<8x32xf32>
    %352 = tpu.matmul %348, %13, %cst_68 {dimension_numbers = #tpu.dot_dimension_numbers<[1], [0], [0], [1], [0, 0, 1, 1], [], []>} : vector<8x32xf32>, vector<32x32xf32>, vector<8x32xf32> -> vector<8x32xf32>
    %353 = arith.addf %351, %352 : vector<8x32xf32>
    %354 = vector.broadcast %6 : vector<1x32xf32> to vector<8x32xf32>
    %355 = arith.addf %353, %354 : vector<8x32xf32>
    %356 = vector.shape_cast %355 : vector<8x32xf32> to vector<8x1x32xf32>
    %357 = vector.broadcast %356 : vector<8x1x32xf32> to vector<8x8x32xf32>
    %358 = arith.addf %357, %30 : vector<8x8x32xf32>
    %359 = math.tanh %358 : vector<8x8x32xf32>
    %360 = vector.shape_cast %4 : vector<1x32xf32> to vector<1x1x32xf32>
    %361 = vector.broadcast %360 : vector<1x1x32xf32> to vector<8x8x32xf32>
    %362 = arith.mulf %359, %361 : vector<8x8x32xf32>
    %cst_69 = arith.constant dense<0.000000e+00> : vector<8x8xf32>
    %363 = vector.multi_reduction <add>, %362, %cst_69 [2] : vector<8x8x32xf32> to vector<8x8xf32>
    %364 = vector.broadcast %21 : f32 to vector<8x8xf32>
    %365 = arith.subf %363, %364 : vector<8x8xf32>
    %366 = math.exp %365 : vector<8x8xf32>
    %cst_70 = arith.constant dense<0.000000e+00> : vector<8xf32>
    %367 = vector.multi_reduction <add>, %366, %cst_70 [1] : vector<8x8xf32> to vector<8xf32>
    %368 = vector.shape_cast %367 : vector<8xf32> to vector<8x1xf32>
    %369 = vector.shape_cast %366 : vector<8x8xf32> to vector<8x8x1xf32>
    %370 = vector.broadcast %369 : vector<8x8x1xf32> to vector<8x8x32xf32>
    %371 = arith.mulf %370, %0 : vector<8x8x32xf32>
    %cst_71 = arith.constant dense<0.000000e+00> : vector<8x32xf32>
    %372 = vector.multi_reduction <add>, %371, %cst_71 [1] : vector<8x8x32xf32> to vector<8x32xf32>
    %373 = tpu.reciprocal %368 {approx = true} : vector<8x1xf32> -> vector<8x1xf32>
    %374 = vector.broadcast %373 : vector<8x1xf32> to vector<8x32xf32>
    %375 = arith.mulf %372, %374 : vector<8x32xf32>
    %376 = vector.broadcast %5 : vector<1x32xf32> to vector<8x32xf32>
    %377 = arith.mulf %375, %376 : vector<8x32xf32>
    %cst_72 = arith.constant dense<0.000000e+00> : vector<8xf32>
    %378 = vector.multi_reduction <add>, %377, %cst_72 [1] : vector<8x32xf32> to vector<8xf32>
    %379 = vector.shape_cast %378 : vector<8xf32> to vector<8x1xf32>
    %380 = vector.extract_strided_slice %27 {offsets = [0, 6], sizes = [8, 1], strides = [1, 1]} : vector<8x8xf32> to vector<8x1xf32>
    %381 = arith.addf %379, %380 : vector<8x1xf32>
    %382 = vector.broadcast %381 : vector<8x1xf32> to vector<8x128xf32>
    %383 = vector.broadcast %7 : vector<1x128xf32> to vector<8x128xf32>
    %384 = arith.mulf %382, %383 : vector<8x128xf32>
    %cst_73 = arith.constant dense<0.000000e+00> : vector<8x128xf32>
    %385 = tpu.matmul %350, %15, %cst_73 {dimension_numbers = #tpu.dot_dimension_numbers<[1], [0], [0], [1], [0, 0, 1, 1], [], []>} : vector<8x32xf32>, vector<32x128xf32>, vector<8x128xf32> -> vector<8x128xf32>
    %386 = arith.addf %384, %385 : vector<8x128xf32>
    %387 = vector.broadcast %8 : vector<1x128xf32> to vector<8x128xf32>
    %388 = arith.addf %386, %387 : vector<8x128xf32>
    %389 = arith.negf %388 : vector<8x128xf32>
    %390 = math.exp %389 : vector<8x128xf32>
    %cst_74 = arith.constant 1.000000e+00 : f32
    %391 = vector.broadcast %cst_74 : f32 to vector<8x128xf32>
    %392 = arith.addf %391, %390 : vector<8x128xf32>
    %393 = arith.divf %391, %392 : vector<8x128xf32>
    %394 = vector.extract_strided_slice %393 {offsets = [0, 0], sizes = [8, 32], strides = [1, 1]} : vector<8x128xf32> to vector<8x32xf32>
    %395 = vector.extract_strided_slice %393 {offsets = [0, 32], sizes = [8, 32], strides = [1, 1]} : vector<8x128xf32> to vector<8x32xf32>
    %396 = vector.extract_strided_slice %393 {offsets = [0, 64], sizes = [8, 32], strides = [1, 1]} : vector<8x128xf32> to vector<8x32xf32>
    %397 = vector.extract_strided_slice %388 {offsets = [0, 96], sizes = [8, 32], strides = [1, 1]} : vector<8x128xf32> to vector<8x32xf32>
    %398 = math.tanh %397 : vector<8x32xf32>
    %399 = arith.mulf %395, %348 : vector<8x32xf32>
    %400 = arith.mulf %394, %398 : vector<8x32xf32>
    %401 = arith.addf %399, %400 : vector<8x32xf32>
    %402 = math.tanh %401 : vector<8x32xf32>
    %403 = arith.mulf %396, %402 : vector<8x32xf32>
    %cst_75 = arith.constant dense<0.000000e+00> : vector<8x32xf32>
    %404 = tpu.matmul %403, %12, %cst_75 {dimension_numbers = #tpu.dot_dimension_numbers<[1], [0], [0], [1], [0, 0, 1, 1], [], []>} : vector<8x32xf32>, vector<32x32xf32>, vector<8x32xf32> -> vector<8x32xf32>
    %cst_76 = arith.constant dense<0.000000e+00> : vector<8x32xf32>
    %405 = tpu.matmul %401, %13, %cst_76 {dimension_numbers = #tpu.dot_dimension_numbers<[1], [0], [0], [1], [0, 0, 1, 1], [], []>} : vector<8x32xf32>, vector<32x32xf32>, vector<8x32xf32> -> vector<8x32xf32>
    %406 = arith.addf %404, %405 : vector<8x32xf32>
    %407 = vector.broadcast %6 : vector<1x32xf32> to vector<8x32xf32>
    %408 = arith.addf %406, %407 : vector<8x32xf32>
    %409 = vector.shape_cast %408 : vector<8x32xf32> to vector<8x1x32xf32>
    %410 = vector.broadcast %409 : vector<8x1x32xf32> to vector<8x8x32xf32>
    %411 = arith.addf %410, %30 : vector<8x8x32xf32>
    %412 = math.tanh %411 : vector<8x8x32xf32>
    %413 = vector.shape_cast %4 : vector<1x32xf32> to vector<1x1x32xf32>
    %414 = vector.broadcast %413 : vector<1x1x32xf32> to vector<8x8x32xf32>
    %415 = arith.mulf %412, %414 : vector<8x8x32xf32>
    %cst_77 = arith.constant dense<0.000000e+00> : vector<8x8xf32>
    %416 = vector.multi_reduction <add>, %415, %cst_77 [2] : vector<8x8x32xf32> to vector<8x8xf32>
    %417 = vector.broadcast %21 : f32 to vector<8x8xf32>
    %418 = arith.subf %416, %417 : vector<8x8xf32>
    %419 = math.exp %418 : vector<8x8xf32>
    %cst_78 = arith.constant dense<0.000000e+00> : vector<8xf32>
    %420 = vector.multi_reduction <add>, %419, %cst_78 [1] : vector<8x8xf32> to vector<8xf32>
    %421 = vector.shape_cast %420 : vector<8xf32> to vector<8x1xf32>
    %422 = vector.shape_cast %419 : vector<8x8xf32> to vector<8x8x1xf32>
    %423 = vector.broadcast %422 : vector<8x8x1xf32> to vector<8x8x32xf32>
    %424 = arith.mulf %423, %0 : vector<8x8x32xf32>
    %cst_79 = arith.constant dense<0.000000e+00> : vector<8x32xf32>
    %425 = vector.multi_reduction <add>, %424, %cst_79 [1] : vector<8x8x32xf32> to vector<8x32xf32>
    %426 = tpu.reciprocal %421 {approx = true} : vector<8x1xf32> -> vector<8x1xf32>
    %427 = vector.broadcast %426 : vector<8x1xf32> to vector<8x32xf32>
    %428 = arith.mulf %425, %427 : vector<8x32xf32>
    %429 = vector.broadcast %5 : vector<1x32xf32> to vector<8x32xf32>
    %430 = arith.mulf %428, %429 : vector<8x32xf32>
    %cst_80 = arith.constant dense<0.000000e+00> : vector<8xf32>
    %431 = vector.multi_reduction <add>, %430, %cst_80 [1] : vector<8x32xf32> to vector<8xf32>
    %432 = vector.shape_cast %431 : vector<8xf32> to vector<8x1xf32>
    %433 = vector.extract_strided_slice %27 {offsets = [0, 7], sizes = [8, 1], strides = [1, 1]} : vector<8x8xf32> to vector<8x1xf32>
    %434 = arith.addf %432, %433 : vector<8x1xf32>
    %435 = vector.broadcast %434 : vector<8x1xf32> to vector<8x128xf32>
    %436 = vector.broadcast %7 : vector<1x128xf32> to vector<8x128xf32>
    %437 = arith.mulf %435, %436 : vector<8x128xf32>
    %cst_81 = arith.constant dense<0.000000e+00> : vector<8x128xf32>
    %438 = tpu.matmul %403, %15, %cst_81 {dimension_numbers = #tpu.dot_dimension_numbers<[1], [0], [0], [1], [0, 0, 1, 1], [], []>} : vector<8x32xf32>, vector<32x128xf32>, vector<8x128xf32> -> vector<8x128xf32>
    %439 = arith.addf %437, %438 : vector<8x128xf32>
    %440 = vector.broadcast %8 : vector<1x128xf32> to vector<8x128xf32>
    %441 = arith.addf %439, %440 : vector<8x128xf32>
    %442 = arith.negf %441 : vector<8x128xf32>
    %443 = math.exp %442 : vector<8x128xf32>
    %cst_82 = arith.constant 1.000000e+00 : f32
    %444 = vector.broadcast %cst_82 : f32 to vector<8x128xf32>
    %445 = arith.addf %444, %443 : vector<8x128xf32>
    %446 = arith.divf %444, %445 : vector<8x128xf32>
    %447 = vector.extract_strided_slice %446 {offsets = [0, 0], sizes = [8, 32], strides = [1, 1]} : vector<8x128xf32> to vector<8x32xf32>
    %448 = vector.extract_strided_slice %446 {offsets = [0, 32], sizes = [8, 32], strides = [1, 1]} : vector<8x128xf32> to vector<8x32xf32>
    %449 = vector.extract_strided_slice %446 {offsets = [0, 64], sizes = [8, 32], strides = [1, 1]} : vector<8x128xf32> to vector<8x32xf32>
    %450 = vector.extract_strided_slice %441 {offsets = [0, 96], sizes = [8, 32], strides = [1, 1]} : vector<8x128xf32> to vector<8x32xf32>
    %451 = math.tanh %450 : vector<8x32xf32>
    %452 = arith.mulf %448, %401 : vector<8x32xf32>
    %453 = arith.mulf %447, %451 : vector<8x32xf32>
    %454 = arith.addf %452, %453 : vector<8x32xf32>
    %455 = math.tanh %454 : vector<8x32xf32>
    %456 = arith.mulf %449, %455 : vector<8x32xf32>
    %cst_83 = arith.constant dense<0.000000e+00> : vector<8x32xf32>
    %457 = tpu.matmul %456, %17, %cst_83 {dimension_numbers = #tpu.dot_dimension_numbers<[1], [0], [0], [1], [0, 0, 1, 1], [], []>} : vector<8x32xf32>, vector<32x32xf32>, vector<8x32xf32> -> vector<8x32xf32>
    %cst_84 = arith.constant dense<0.000000e+00> : vector<8x32xf32>
    %458 = tpu.matmul %428, %18, %cst_84 {dimension_numbers = #tpu.dot_dimension_numbers<[1], [0], [0], [1], [0, 0, 1, 1], [], []>} : vector<8x32xf32>, vector<32x32xf32>, vector<8x32xf32> -> vector<8x32xf32>
    %459 = arith.addf %457, %458 : vector<8x32xf32>
    %460 = vector.broadcast %9 : vector<1x32xf32> to vector<8x32xf32>
    %461 = arith.addf %459, %460 : vector<8x32xf32>
    %462 = vector.broadcast %10 : vector<1x32xf32> to vector<8x32xf32>
    %463 = arith.mulf %461, %462 : vector<8x32xf32>
    %cst_85 = arith.constant dense<0.000000e+00> : vector<8xf32>
    %464 = vector.multi_reduction <add>, %463, %cst_85 [1] : vector<8x32xf32> to vector<8xf32>
    %465 = vector.shape_cast %464 : vector<8xf32> to vector<8x1xf32>
    %466 = vector.broadcast %20 : f32 to vector<8x1xf32>
    %467 = arith.addf %465, %466 : vector<8x1xf32>
    %c0_86 = arith.constant 0 : index
    %c0_87 = arith.constant 0 : index
    %468 = vector.load %arg8[%c0_86, %c0_87] : memref<8x1xf32, #tpu.memory_space<vmem>>, vector<8x1xf32>
    tpu.vector_store %arg8[%c0_86, %c0_87], %467 {strides = array<i32>} : memref<8x1xf32, #tpu.memory_space<vmem>>, vector<8x1xf32>,
    return
  }
}

</mosaic_0001>

<bundles_post_ra>
// kernel: tpu_custom_call.1
= control target key start
LH: loop header
LB: loop body
LE: loop exit
PB: predicated region body
PF: predicated region fallthrough
CT: control target
= control target key end

     0   :  { %13 = vsyncpa [#allocation3], 0  ;;  %s8145_s0 = inlined_call_operand.vmem [shape: f32[8,8,32], index: 0, kind: input, shape index: {}]   ;;  %s8146_s1 = inlined_call_operand.vmem [shape: f32[8,8,16], index: 1, kind: input, shape index: {}]   ;;  %s8147_s2 = inlined_call_operand.hbm [shape: f32[8,128], index: 2, kind: input, shape index: {}]   ;;  %s8148_s3 = inlined_call_operand.vmem [shape: f32[64,32], index: 3, kind: input, shape index: {}]   ;;  %s8149_s4 = inlined_call_operand.vmem [shape: f32[32,32], index: 4, kind: input, shape index: {}]   ;;  %s8150_s5 = inlined_call_operand.hbm [shape: f32[32,128], index: 5, kind: input, shape index: {}]   ;;  %s8151_s6 = inlined_call_operand.vmem [shape: f32[64,32], index: 6, kind: input, shape index: {}]   ;;  %s8152_s7 = inlined_call_operand.vmem [shape: f32[4], index: 7, kind: input, shape index: {}]   ;;  %s8153_s8 = inlined_call_operand.vmem [shape: f32[8,1], index: 8, kind: output, shape index: {}]  }
   0x1   :  { %14 = vsyncpa [#allocation6], 0 }
   0x2   :  { %15 = vsyncpa [#allocation4], 0  ;;  %s6451_s27 = smov [#allocation2]   ;;  %s6452_s29 = smov [#allocation5]  }
   0x3   :  { %s26_s28 = sshll.u32 %s6451_s27, 4  ;;  %s39_s30 = sshll.u32 %s6452_s29, 4  ;;  %s27_s28 = int_to_ptr.vmem [resolvable:$true] %s26_s28  ;;  %s6509_s30 = int_to_ptr.vmem [resolvable:$true] %s39_s30 }
   0x4   :  { %s6389_s11 = scalar_lea.hbm %s8147_s2, 128 }
   0x5   :  { %p6390_p0 = scmp.ne.s32.totalorder %s8147_s2, %s6389_s11  ;;  %p6393_p1 = scmp.lt.u32.totalorder %s6389_s11, %s8147_s2 }
   0x7   :  { %p6395_p2 = pnand %p6393_p1, %p6390_p0 }
   0x9   :  { %6398 = shalt.err (!%p6395_p2)
}
   0xa   :  { %s6399_s16 = scalar_lea.vmem %s27_s28, 128  ;;  %p6404_p4 = scmp.lt.s32.totalorder %s27_s28, %s27_s28 }
   0xb   :  { %p6400_p3 = scmp.ne.s32.totalorder %s27_s28, %s6399_s16  ;;  %p6405_p5 = scmp.lt.s32.totalorder %s6399_s16, %s6399_s16 }
   0xd   :  { %p6406_p6 = por %p6405_p5, %p6404_p4 }
   0xf   :  { %p6407_p7 = pnand %p6406_p6, %p6400_p3 }
  0x11   :  { %6410 = shalt.err (!%p6407_p7)
}
  0x12   :  { %29 = dma.hbm_to_vmem [thread:$0]  %s8147_s2, 128, %s27_s28, [#allocation3]  }
  0x13   :  { %s6411_s21 = scalar_lea.hbm %s8150_s5, 512 }
  0x14   :  { %p6412_p8 = scmp.ne.s32.totalorder %s8150_s5, %s6411_s21  ;;  %p6415_p9 = scmp.lt.u32.totalorder %s6411_s21, %s8150_s5 }
  0x16   :  { %p6417_p10 = pnand %p6415_p9, %p6412_p8 }
  0x18   :  { %6420 = shalt.err (!%p6417_p10)
}
  0x19   :  { %s6421_s26 = scalar_lea.vmem %s6509_s30, 512  ;;  %p6426_p12 = scmp.lt.s32.totalorder %s6509_s30, %s6509_s30 }
  0x1a   :  { %p6422_p11 = scmp.ne.s32.totalorder %s6509_s30, %s6421_s26  ;;  %p6427_p13 = scmp.lt.s32.totalorder %s6421_s26, %s6421_s26 }
  0x1c   :  { %p6428_p0 = por %p6427_p13, %p6426_p12 }
  0x1e   :  { %p6429_p1 = pnand %p6428_p0, %p6422_p11 }
  0x20   :  { %6432 = shalt.err (!%p6429_p1)
}
  0x21   :  { %s6453_s2 = smov 128   ;;  %s6454_s27 = smov 8  }
  0x22   :  { %45 = dma.hbm_to_vmem [thread:$0]  %s8150_s5, 512, %s6509_s30, [#allocation6], %s6453_s2, %s6453_s2, %s6454_s27  }
  0x23   :  { %s54_s11 = sshll.u32 %s8152_s7, 4  ;;  %s55_s11 = int_to_ptr.vmem [resolvable:$true] %s54_s11 }
  0x24   :  { %s6433_s12 = scalar_lea.vmem %s55_s11, 16  ;;  %p6438_p3 = scmp.lt.s32.totalorder %s55_s11, %s55_s11 }
  0x25   :  { %p6434_p2 = scmp.ne.s32.totalorder %s55_s11, %s6433_s12  ;;  %p6439_p4 = scmp.lt.s32.totalorder %s6433_s12, %s6433_s12 }
  0x27   :  { %p6440_p5 = por %p6439_p4, %p6438_p3 }
  0x29   :  { %p6441_p6 = pnand %p6440_p5, %p6434_p2 }
  0x2b   :  { %6444 = shalt.err (!%p6441_p6)
}
  0x2c   :  { %s6455_s13 = smov [#allocation7]  }
  0x2d   :  { %57 = dma.vmem_to_smem %s55_s11, 16, %s6455_s13, [#allocation4]  }
  0x2e   :  { %6445 = dma.done.wait [#allocation3], 128  }
  0x2f   :  { %6446 = vsyncadd [#allocation3], 4294967168 }
  0x30   :  { %6447 = dma.done.wait [#allocation6], 512  }
  0x31   :  { %6448 = vsyncadd [#allocation6], 4294966784 }
  0x32   :  { %6449 = dma.done.wait [#allocation4], 16  }
  0x33   :  { %6450 = vsyncadd [#allocation4], 4294967280 }
  0x34   :  { %67 = sfence }
  0x35   :  { %v89_v0 = vld [vmem:[%s8148_s3 + $0x20] sm:$0xff]  ;;  %v90_v1 = vld [vmem:[%s8148_s3 + $0x28] sm:$0xff]  ;;  %v91_v2 = vld [vmem:[%s8148_s3 + $0x30] sm:$0xff]  ;;  %v8154_v3 = vmov 0.0|0.0   ;;  %vm6457_vm0 = vmmov 0   ;;  %v8156_v6 = vmov 0.0   ;;  %v112_v28 = vlaneseq }
  0x36   :  { %5850 = vmatprep.subr.bf16.mxu1 %v8154_v3  ;;  %v6553_v4 = vpack.c.bf16 %v90_v1, %v89_v0  ;;  %v92_v5 = vld [vmem:[%s8148_s3 + $0x38] sm:$0xff]  ;;  %5564 = vmatprep.mubr.msk.f32.mxu1 %vm6457_vm0, %v8156_v6  ;;  %v93_v7 = vld [vmem:[%s8149_s4] sm:$0xff]  ;;  %v94_v8 = vld [vmem:[%s8149_s4 + $0x8] sm:$0xff]  ;;  %vm158_vm1 = vcmask 261120   ;;  %v6459_v32 = vmov 1966171168  }
  0x37   :  { %v5842_v9 = vpack.c.bf16 %v94_v8, %v93_v7  ;;  %v95_v10 = vld [vmem:[%s8149_s4 + $0x10] sm:$0xff]  ;;  %v6570_v11 = vpack.c.bf16 %v92_v5, %v91_v2  ;;  %v96_v12 = vld [vmem:[%s8149_s4 + $0x18] sm:$0xff]  ;;  %v85_v13 = vld [vmem:[%s8148_s3] sm:$0xff]  ;;  %v6668_v29 = vshrl.u32 %v112_v28, 7  ;;  %v439_v33 = vunpack.c.l.s4 %v6459_v32  ;;  %s5354_s24 = sld [smem:[#allocation7 + $0x2]]  ;;  %s6462_s15 = smov 96  }
  0x38   :  { %5852 = vmatpush3.bf16.msra.mxu1 %v6553_v4  ;;  %v86_v14 = vld [vmem:[%s8148_s3 + $0x8] sm:$0xff]  ;;  %v5846_v15 = vpack.c.bf16 %v96_v12, %v95_v10  ;;  %v6585_v16 = vld [vmem:[%s8145_s0] sm:$0xff]  ;;  %v87_v18 = vld [vmem:[%s8148_s3 + $0x10] sm:$0xff]  ;;  %vm645_vm2 = vcmask 1041409   ;;  %vm647_vm3 = vcmask 1042434   ;;  %vm649_vm4 = vcmask 1043459  }
  0x39   :  { %5853 = vmatprep.subr.bf16.mxu1 %v8154_v3  ;;  %5843 = vmatprep.subr.bf16.mxu0 %v5842_v9  ;;  %v6590_v17 = vpack.c.bf16 %v86_v14, %v85_v13  ;;  %v88_v19 = vld [vmem:[%s8148_s3 + $0x18] sm:$0xff]  ;;  %v6602_v20 = vld [vmem:[%s8145_s0 + $0x8] sm:$0xff]  ;;  %v6608_v21 = vld [vmem:[%s8145_s0 + $0x10] sm:$0xff]  ;;  %8180 = vst [vmem:[#allocation11_spill] sm:$0xff] %v6668_v29  ;;  %v433_v35 = vsub.s32 3, %v6668_v29  ;;  %v440_v38 = vunpack.c.0.s8 %v439_v33  ;;  %v6694_v51 = vsub.s32 0, %v6668_v29 }
  0x3a   :  { %5845 = vmatpush3.bf16.msra.mxu0 %v5842_v9  ;;  %5544 = vmatprep.mubr.msk.f32.mxu0 %vm158_vm1, %v6585_v16  ;;  %v6612_v22 = vpack.c.bf16 %v88_v19, %v87_v18  ;;  %v6624_v23 = vld [vmem:[%s8145_s0 + $0x18] sm:$0xff]  ;;  %v6629_v24 = vld [vmem:[%s8145_s0 + $0x20] sm:$0xff]  ;;  %v6640_v25 = vld [vmem:[%s8145_s0 + $0x28] sm:$0xff]  ;;  %v544_v32 = vsub.s32 1, %v6668_v29  ;;  %vm651_vm5 = vcmask 1044484   ;;  %vm653_vm6 = vcmask 1045509  }
  0x3b   :  { %5847 = vmatprep.subr.bf16.mxu0 %v5846_v15  ;;  %v6646_v26 = vld [vmem:[%s8145_s0 + $0x30] sm:$0xff]  ;;  %v6659_v27 = vld [vmem:[%s8145_s0 + $0x38] sm:$0xff]  ;;  %v6675_v37 = vld [vmem:[#allocation2] sm:$0xff]  ;;  %v6685_v44 = vsub.s32 %v440_v38, %v6668_v29  ;;  %vm655_vm7 = vcmask 1046534   ;;  %vm657_vm8 = vcmask 1047559   ;;  %vm660_vm9 = vcmask 64512  }
  0x3c   :  { %5855 = vmatpush3.bf16.msra.mxu1 %v6570_v11  ;;  %v6680_v40 = vrot.slane %v6675_v37, %v433_v35  ;;  %v6723_v35 = vrot.slane %v6675_v37, %v544_v32  ;;  %vm124_vm10 = vcmask 130048   ;;  %s6461_s3 = smov 32   ;;  %s6463_s16 = smov 64   ;;  %vm5344_vm11 = vcmask 7168  }
  0x3d   :  { %5856 = vmatprep.subr.bf16.mxu1 %v8154_v3 }
  0x3e   :  { %5849 = vmatpush3.bf16.msra.mxu0 %v5846_v15 }
  0x3f   :  { %5565 = vmatmul.mubr.f32.vlgmr.msra.gmra.mrb[0].mxu1 %v8156_v6  ;;  %5862 = vmatprep.subr.bf16.mxu0 %v8154_v3 }
  0x40   :  { %5858 = vmatpush3.bf16.msra.mxu1 %v6590_v17  ;;  %5575 = vmatprep.mubr.msk.f32.mxu1 %vm6457_vm0, %v8156_v6 }
  0x41   :  { %5859 = vmatprep.subr.bf16.mxu1 %v8154_v3  ;;  %5545 = vmatmul.mubr.msk.f32.vlgmr.msra.gmra.mrb[0].mxu0 %vm158_vm1, %v6602_v20 }
  0x42   :  { %5547 = vmatprep.mubr.msk.f32.mxu0 %vm158_vm1, %v6608_v21 }
  0x44   :  { %5861 = vmatpush3.bf16.msra.mxu1 %v6612_v22 }
  0x45   :  { %5548 = vmatmul.mubr.msk.f32.gmra.mrb[2].mxu0 %vm158_vm1, %v6624_v23  ;;  %5868 = vmatprep.subr.bf16.mxu1 %v8154_v3 }
  0x46   :  { %5550 = vmatprep.mubr.msk.f32.mxu0 %vm158_vm1, %v6629_v24 }
  0x47   :  { %5576 = vmatmul.mubr.f32.vlgmr.msra.gmra.mrb[2].mxu1 %v8156_v6 }
  0x48   :  { %5870 = vmatpush3.bf16.msra.mxu1 %v6553_v4  ;;  %5597 = vmatprep.mubr.msk.f32.mxu1 %vm6457_vm0, %v8156_v6 }
  0x49   :  { %5551 = vmatmul.mubr.msk.f32.gmra.mrb[4].mxu0 %vm158_vm1, %v6640_v25  ;;  %5871 = vmatprep.subr.bf16.mxu1 %v8154_v3 }
  0x4a   :  { %5553 = vmatprep.mubr.msk.f32.mxu0 %vm158_vm1, %v6646_v26 }
  0x4c   :  { %5873 = vmatpush3.bf16.msra.mxu1 %v6570_v11 }
  0x4d   :  { %5554 = vmatmul.mubr.msk.f32.gmra.mrb[6].mxu0 %vm158_vm1, %v6659_v27  ;;  %5880 = vmatprep.subr.bf16.mxu1 %v8154_v3 }
  0x4e   :  { %5586 = vmatprep.mubr.msk.f32.mxu0 %vm6457_vm0, %v8156_v6 }
 0x112   :  { %v357_v30 = vpop.f32.mrb[0].mxu1 }
 0x113   :  { %v5566_v31 = vpop.f32.mrb[1].mxu1 }
 0x114   :  { %v6670_v34 = vpop.f32.mrb[0].mxu0 }
 0x115   :  { %v6673_v36 = vpop.f32.mrb[1].mxu0 }
 0x118   :  { %v6677_v39 = vpop.f32.mrb[2].mxu0 }
 0x119   :  { %v6682_v41 = vpop.f32.mrb[3].mxu0 }
 0x11a   :  { %v427_v42 = vpop.f32.mrb[2].mxu1 }
 0x11b   :  { %v428_v43 = vadd.f32 %v427_v42, %v357_v30  ;;  %v5577_v45 = vpop.f32.mrb[3].mxu1 }
 0x11c   :  { %v6687_v46 = vpop.f32.mrb[4].mxu0 }
 0x11d   :  { %v435_v47 = vadd.f32 %v6680_v40, %v428_v43  ;;  %v6690_v48 = vpop.f32.mrb[5].mxu0 }
 0x11f   :  { %v437_v49 = vcombine.high %v435_v47, %v435_v47  ;;  %v444_v50 = vrot.slane %v435_v47, %v6685_v44 }
 0x120   :  { %v6696_v52 = vpop.f32.mrb[6].mxu0 }
 0x121   :  { %v451_v53 = vrot.slane %v437_v49, %v6685_v44  ;;  %v452_v54 = vcombine.high %v444_v50, %v444_v50  ;;  %v460_v55 = vrot.slane %v444_v50, %v6685_v44  ;;  %v6700_v56 = vpop.f32.mrb[7].mxu0 }
 0x123   :  { %v453_v57 = vcombine.high %v451_v53, %v451_v53  ;;  %v467_v58 = vrot.slane %v451_v53, %v6685_v44  ;;  %v474_v59 = vrot.slane %v452_v54, %v6685_v44  ;;  %v482_v60 = vcombine.high %v460_v55, %v460_v55 }
 0x124   :  { %v489_v61 = vrot.slane %v460_v55, %v6694_v51 }
 0x125   :  { %v481_v62 = vrot.slane %v453_v57, %v6685_v44  ;;  %v483_v63 = vcombine.high %v467_v58, %v467_v58  ;;  %v484_v0 = vcombine.high %v474_v59, %v474_v59  ;;  %v493_v1 = vrot.slane %v474_v59, %v6694_v51 }
 0x126   :  { %v497_v2 = vrot.slane %v482_v60, %v6694_v51  ;;  %v505_v5 = vrot.slane %v467_v58, %v6694_v51  ;;  %v526_v7 = vadd.f32 %v489_v61, %v6673_v36 }
 0x127   :  { %v485_v8 = vcombine.high %v481_v62, %v481_v62  ;;  %v501_v9 = vrot.slane %v484_v0, %v6694_v51  ;;  %v509_v10 = vrot.slane %v481_v62, %v6694_v51  ;;  %v513_v12 = vrot.slane %v483_v63, %v6694_v51 }
 0x128   :  { %6020 = vtanh.f32 %v526_v7  ;;  %v528_v13 = vadd.f32 %v497_v2, %v6682_v41  ;;  %v527_v14 = vadd.f32 %v6670_v34, %v493_v1  ;;  %v530_v15 = vadd.f32 %v505_v5, %v6690_v48 }
 0x129   :  { %v517_v18 = vrot.slane %v485_v8, %v6694_v51  ;;  %v529_v19 = vadd.f32 %v6677_v39, %v501_v9  ;;  %v531_v30 = vadd.f32 %v6687_v46, %v509_v10  ;;  %v532_v31 = vadd.f32 %v513_v12, %v6700_v56 }
 0x12a   :  { %6022 = vtanh.f32 %v528_v13  ;;  %v6741_v10 = vstv %s5354_s24 }
 0x12b   :  { %6024 = vtanh.f32 %v527_v14  ;;  %v533_v33 = vadd.f32 %v6696_v52, %v517_v18 }
 0x12c   :  { %6026 = vtanh.f32 %v529_v19 }
 0x12d   :  { %6028 = vtanh.f32 %v530_v15 }
 0x12e   :  { %6030 = vtanh.f32 %v531_v30 }
 0x12f   :  { %6032 = vtanh.f32 %v532_v31 }
 0x130   :  { %6034 = vtanh.f32 %v533_v33 }
 0x132   :  { %v6021_v38 = vpop.eup %6020 }
 0x133   :  { %v546_v42 = vmul.f32 %v6021_v38, %v6723_v35 }
 0x134   :  { %v6023_v43 = vpop.eup %6022 }
 0x135   :  { %v6025_v45 = vpop.eup %6024  ;;  %v554_v47 = vsel %vm158_vm1, %v546_v42, 0.0  ;;  %v548_v49 = vmul.f32 %v6023_v43, %v6723_v35 }
 0x136   :  { %v6027_v50 = vpop.eup %6026  ;;  %555 = vadd.xlane.f32.xlu0 %v554_v47  ;;  %v547_v53 = vmul.f32 %v6025_v45, %v6723_v35 }
 0x137   :  { %v6029_v54 = vpop.eup %6028  ;;  %v560_v55 = vsel %vm158_vm1, %v548_v49, 0.0  ;;  %v549_v57 = vmul.f32 %v6027_v50, %v6723_v35 }
 0x138   :  { %v6031_v58 = vpop.eup %6030  ;;  %561 = vadd.xlane.f32.xlu1 %v560_v55  ;;  %v557_v59 = vsel %vm158_vm1, %v547_v53, 0.0  ;;  %v550_v60 = vmul.f32 %v6029_v54, %v6723_v35  ;;  %v612_v53 = vand.u32 127, %v112_v28 }
 0x139   :  { %v6033_v61 = vpop.eup %6032  ;;  %v563_v62 = vsel %vm158_vm1, %v549_v57, 0.0  ;;  %v551_v63 = vmul.f32 %v6031_v58, %v6723_v35 }
 0x13a   :  { %558 = vadd.xlane.f32.xlu0 %v557_v59  ;;  %v6035_v0 = vpop.eup %6034  ;;  %v566_v1 = vsel %vm158_vm1, %v550_v60, 0.0  ;;  %v552_v2 = vmul.f32 %v6033_v61, %v6723_v35  ;;  %v6753_v61 = vsub.s32 %v612_v53, %v6668_v29 }
 0x13b   :  { %v569_v5 = vsel %vm158_vm1, %v551_v63, 0.0  ;;  %v553_v7 = vmul.f32 %v6035_v0, %v6723_v35 }
 0x13c   :  { %564 = vadd.xlane.f32.xlu1 %v563_v62  ;;  %v572_v8 = vsel %vm158_vm1, %v552_v2, 0.0 }
 0x13d   :  { %v575_v9 = vsel %vm158_vm1, %v553_v7, 0.0 }
 0x13e   :  { %567 = vadd.xlane.f32.xlu0 %v566_v1 }
 0x140   :  { %570 = vadd.xlane.f32.xlu1 %v569_v5 }
 0x142   :  { %573 = vadd.xlane.f32.xlu0 %v572_v8 }
 0x144   :  { %576 = vadd.xlane.f32.xlu1 %v575_v9 }
 0x1c3   :  { %v556_v12 = vpop.xlane.xlu0 %555 }
 0x1c4   :  { %v579_v13 = vsub.f32 %v556_v12, %v6741_v10 }
 0x1c5   :  { %v562_v14 = vpop.xlane.xlu1 %561 }
 0x1c6   :  { %v587_v15 = vmul.f32 1.442695, %v579_v13  ;;  %v581_v18 = vsub.f32 %v562_v14, %v6741_v10 }
 0x1c7   :  { %v559_v19 = vpop.xlane.xlu0 %558 }
 0x1c8   :  { %v591_v30 = vmul.f32 1.442695, %v581_v18  ;;  %v580_v31 = vsub.f32 %v559_v19, %v6741_v10  ;;  %6036 = vpow2.f32 %v587_v15 }
 0x1c9   :  { %v565_v32 = vpop.xlane.xlu1 %564 }
 0x1ca   :  { %v589_v33 = vmul.f32 1.442695, %v580_v31  ;;  %v582_v38 = vsub.f32 %v565_v32, %v6741_v10  ;;  %6038 = vpow2.f32 %v591_v30 }
 0x1cb   :  { %v568_v42 = vpop.xlane.xlu0 %567 }
 0x1cc   :  { %6040 = vpow2.f32 %v589_v33  ;;  %v593_v43 = vmul.f32 1.442695, %v582_v38  ;;  %v583_v45 = vsub.f32 %v568_v42, %v6741_v10 }
 0x1cd   :  { %v571_v47 = vpop.xlane.xlu1 %570 }
 0x1ce   :  { %6042 = vpow2.f32 %v593_v43  ;;  %v595_v49 = vmul.f32 1.442695, %v583_v45  ;;  %v584_v50 = vsub.f32 %v571_v47, %v6741_v10 }
 0x1cf   :  { %v574_v54 = vpop.xlane.xlu0 %573 }
 0x1d0   :  { %6044 = vpow2.f32 %v595_v49  ;;  %v597_v55 = vmul.f32 1.442695, %v584_v50  ;;  %v585_v57 = vsub.f32 %v574_v54, %v6741_v10  ;;  %v115_v49 = vrot.slane %v6675_v37, %v6694_v51  ;;  %v77_v50 = vld [vmem:[%s8146_s1 + $0x8] sm:$0xff]  ;;  %v78_v54 = vld [vmem:[%s8146_s1 + $0x10] sm:$0xff] }
 0x1d1   :  { %v577_v58 = vpop.xlane.xlu1 %576 }
 0x1d2   :  { %6046 = vpow2.f32 %v597_v55  ;;  %v599_v59 = vmul.f32 1.442695, %v585_v57  ;;  %v586_v60 = vsub.f32 %v577_v58, %v6741_v10  ;;  %v6755_v62 = vpop.eup %6036  ;;  %v117_v53 = vmul.f32 %v115_v49, %v77_v50  ;;  %v76_v57 = vld [vmem:[%s8146_s1] sm:$0xff]  ;;  %v79_v58 = vld [vmem:[%s8146_s1 + $0x18] sm:$0xff]  ;;  %v98_v50 = vld [vmem:[#allocation5 + $0x8] sm:$0xff] }
 0x1d3   :  { %v616_v1 = vrot.slane %v6755_v62, %v6753_v61  ;;  %v118_v55 = vmul.f32 %v115_v49, %v78_v54 }
 0x1d4   :  { %6048 = vpow2.f32 %v599_v59  ;;  %v601_v63 = vmul.f32 1.442695, %v586_v60  ;;  %v6757_v0 = vpop.eup %6038  ;;  %v80_v59 = vld [vmem:[%s8146_s1 + $0x20] sm:$0xff]  ;;  %v128_v60 = vsel %vm124_vm10, %v117_v53, 0.0  ;;  %v99_v53 = vld [vmem:[#allocation5 + $0x10] sm:$0xff] }
 0x1d5   :  { %v624_v7 = vrot.slane %v6757_v0, %v6753_v61  ;;  %129 = vadd.xlane.f32.xlu1 %v128_v60 }
 0x1d6   :  { %v6759_v28 = vpop.eup %6040  ;;  %6050 = vpow2.f32 %v601_v63  ;;  %v116_v63 = vmul.f32 %v115_v49, %v76_v57 }
 0x1d7   :  { %v620_v2 = vrot.slane %v6759_v28, %v6753_v61 }
 0x1d8   :  { %v6765_v5 = vpop.eup %6042 }
 0x1d9   :  { %v628_v8 = vrot.slane %v6765_v5, %v6753_v61  ;;  %v646_v9 = vsel %vm645_vm2, %v620_v2, %v616_v1  ;;  %v119_v1 = vmul.f32 %v115_v49, %v79_v58  ;;  %v81_v2 = vld [vmem:[%s8146_s1 + $0x28] sm:$0xff]  ;;  %v666_v58 = vmul.f32 %v6757_v0, %v6608_v21 }
 0x1da   :  { %v6772_v12 = vpop.eup %6044  ;;  %v648_v13 = vsel %vm647_vm3, %v624_v7, %v646_v9  ;;  %v131_v7 = vsel %vm124_vm10, %v118_v55, 0.0  ;;  %v120_v9 = vmul.f32 %v115_v49, %v80_v59  ;;  %v100_v55 = vld [vmem:[#allocation5 + $0x18] sm:$0xff]  ;;  %v665_v59 = vmul.f32 %v6759_v28, %v6602_v20 }
 0x1db   :  { %v632_v15 = vrot.slane %v6772_v12, %v6753_v61  ;;  %v650_v18 = vsel %vm649_vm4, %v628_v8, %v648_v13  ;;  %v125_v8 = vsel %vm124_vm10, %v116_v63, 0.0  ;;  %v134_v13 = vsel %vm124_vm10, %v119_v1, 0.0 }
 0x1dc   :  { %v6775_v14 = vpop.eup %6046  ;;  %126 = vadd.xlane.f32.xlu1 %v125_v8  ;;  %v6832_v57 = vpack.c.bf16 %v100_v55, %v99_v53  ;;  %v667_v60 = vmul.f32 %v6765_v5, %v6624_v23  ;;  %v668_v63 = vmul.f32 %v6772_v12, %v6629_v24  ;;  %v679_v20 = vsel %vm158_vm1, %v665_v59, 0.0 }
 0x1dd   :  { %v636_v30 = vrot.slane %v6775_v14, %v6753_v61  ;;  %v652_v33 = vsel %vm651_vm5, %v632_v15, %v650_v18  ;;  %v121_v15 = vmul.f32 %v115_v49, %v81_v2  ;;  %v82_v18 = vld [vmem:[%s8146_s1 + $0x30] sm:$0xff]  ;;  %v669_v1 = vmul.f32 %v6775_v14, %v6640_v25 }
 0x1de   :  { %v6780_v19 = vpop.eup %6048  ;;  %v693_v23 = vsel %vm158_vm1, %v667_v60, 0.0  ;;  %v700_v0 = vsel %vm158_vm1, %v668_v63, 0.0  ;;  %v680_v12 = vrot.slane %v679_v20, 4 }
 0x1df   :  { %v640_v32 = vrot.slane %v6780_v19, %v6753_v61  ;;  %v654_v42 = vsel %vm653_vm6, %v636_v30, %v652_v33  ;;  %v83_v30 = vld [vmem:[%s8146_s1 + $0x38] sm:$0xff]  ;;  %v122_v33 = vmul.f32 %v115_v49, %v82_v18  ;;  %v670_v2 = vmul.f32 %v6780_v19, %v6646_v26  ;;  %s109_s1 = sld [smem:[#allocation7]] }
 0x1e0   :  { %v6784_v31 = vpop.eup %6050  ;;  %v707_v24 = vsel %vm158_vm1, %v669_v1, 0.0  ;;  %v701_v14 = vrot.slane %v700_v0, 4 }
 0x1e1   :  { %v644_v38 = vrot.slane %v6784_v31, %v6753_v61  ;;  %v656_v43 = vsel %vm655_vm7, %v640_v32, %v654_v42  ;;  %v137_v32 = vsel %vm124_vm10, %v120_v9, 0.0  ;;  %v123_v42 = vmul.f32 %v115_v49, %v83_v30 }
 0x1e2   :  { %138 = vadd.xlane.f32.xlu1 %v137_v32  ;;  %v664_v49 = vmul.f32 %v6755_v62, %v6585_v16  ;;  %v671_v16 = vmul.f32 %v6784_v31, %v6659_v27  ;;  %v686_v62 = vsel %vm158_vm1, %v666_v58, 0.0  ;;  %v714_v25 = vsel %vm158_vm1, %v670_v2, 0.0 }
 0x1e3   :  { %v658_v45 = vsel %vm657_vm8, %v644_v38, %v656_v43  ;;  %v140_v38 = vsel %vm124_vm10, %v121_v15, 0.0  ;;  %v143_v43 = vsel %vm124_vm10, %v122_v33, 0.0  ;;  %v687_v5 = vrot.slane %v686_v62, 4 }
 0x1e4   :  { %v661_v47 = vsel %vm660_vm9, %v658_v45, 0.0  ;;  %v146_v45 = vsel %vm124_vm10, %v123_v42, 0.0  ;;  %v672_v21 = vsel %vm158_vm1, %v664_v49, 0.0  ;;  %v721_v28 = vsel %vm158_vm1, %v671_v16, 0.0 }
 0x1e5   :  { %662 = vadd.xlane.f32.xlu0 %v661_v47  ;;  %v97_v47 = vld [vmem:[#allocation5] sm:$0xff]  ;;  %v673_v26 = vrot.slane %v672_v21, 4  ;;  %v694_v27 = vrot.slane %v693_v23, 4  ;;  %v708_v19 = vrot.slane %v707_v24, 4  ;;  %v715_v31 = vrot.slane %v714_v25, 4 }
 0x1e6   :  { %144 = vadd.xlane.f32.xlu1 %v143_v43  ;;  %v6829_v54 = vpack.c.bf16 %v98_v50, %v97_v47  ;;  %v688_v9 = vadd.f32 %v687_v5, %v686_v62  ;;  %v702_v18 = vadd.f32 %v701_v14, %v700_v0  ;;  %v755_v62 = vsub.s32 2, %v6668_v29 }
 0x1e7   :  { %v674_v8 = vadd.f32 %v673_v26, %v672_v21  ;;  %v695_v15 = vadd.f32 %v694_v27, %v693_v23  ;;  %v709_v30 = vadd.f32 %v708_v19, %v707_v24  ;;  %v716_v32 = vadd.f32 %v715_v31, %v714_v25 }
 0x1e8   :  { %5864 = vmatpush3.bf16.msra.mxu0 %v6829_v54  ;;  %v689_v42 = vrot.slane %v688_v9, 2  ;;  %v703_v47 = vrot.slane %v702_v18, 2 }
 0x1e9   :  { %132 = vadd.xlane.f32.xlu0 %v131_v7  ;;  %5865 = vmatprep.subr.bf16.mxu0 %v8154_v3  ;;  %v722_v7 = vrot.slane %v721_v28, 4  ;;  %v710_v50 = vrot.slane %v709_v30, 2  ;;  %v717_v53 = vrot.slane %v716_v32, 2 }
 0x1ea   :  { %v690_v59 = vadd.f32 %v689_v42, %v688_v9  ;;  %v704_v1 = vadd.f32 %v703_v47, %v702_v18 }
 0x1eb   :  { %v723_v33 = vadd.f32 %v722_v7, %v721_v28  ;;  %v711_v2 = vadd.f32 %v710_v50, %v709_v30  ;;  %v718_v16 = vadd.f32 %v717_v53, %v716_v32 }
 0x1ec   :  { %5867 = vmatpush3.bf16.msra.mxu0 %v6832_v57  ;;  %v691_v23 = vrot.slane %v690_v59, 1  ;;  %v705_v25 = vrot.slane %v704_v1, 1 }
 0x1ed   :  { %135 = vadd.xlane.f32.xlu0 %v134_v13  ;;  %5874 = vmatprep.subr.bf16.mxu0 %v8154_v3  ;;  %v681_v13 = vadd.f32 %v680_v12, %v679_v20  ;;  %v724_v55 = vrot.slane %v723_v33, 2  ;;  %v712_v28 = vrot.slane %v711_v2, 1  ;;  %v719_v26 = vrot.slane %v718_v16, 1 }
 0x1ee   :  { %v6870_v12 = vrot.slane %v6675_v37, %v755_v62  ;;  %v692_v14 = vadd.f32 %v691_v23, %v690_v59 }
 0x1ef   :  { %5587 = vmatmul.mubr.f32.vlgmr.msra.gmra.mrb[8].mxu0 %v8156_v6  ;;  %v682_v43 = vrot.slane %v681_v13, 2  ;;  %v725_v21 = vadd.f32 %v724_v55, %v723_v33  ;;  %v713_v9 = vadd.f32 %v712_v28, %v711_v2 }
 0x1f0   :  { %5876 = vmatpush3.bf16.msra.mxu0 %v6590_v17  ;;  %5608 = vmatprep.mubr.msk.f32.mxu0 %vm6457_vm0, %v8156_v6 }
 0x1f1   :  { %141 = vadd.xlane.f32.xlu0 %v140_v38  ;;  %5877 = vmatprep.subr.bf16.mxu0 %v8154_v3  ;;  %v675_v38 = vrot.slane %v674_v8, 2  ;;  %v683_v60 = vadd.f32 %v682_v43, %v681_v13  ;;  %v726_v5 = vrot.slane %v725_v21, 1  ;;  %v720_v13 = vadd.f32 %v719_v26, %v718_v16 }
 0x1f3   :  { %v676_v58 = vadd.f32 %v675_v38, %v674_v8  ;;  %v684_v0 = vrot.slane %v683_v60, 1  ;;  %v706_v8 = vadd.f32 %v705_v25, %v704_v1 }
 0x1f4   :  { %5879 = vmatpush3.bf16.msra.mxu0 %v6612_v22 }
 0x1f5   :  { %147 = vadd.xlane.f32.xlu0 %v146_v45  ;;  %5886 = vmatprep.subr.bf16.mxu0 %v8154_v3  ;;  %v696_v45 = vrot.slane %v695_v15, 2  ;;  %v677_v20 = vrot.slane %v676_v58, 1  ;;  %v685_v19 = vadd.f32 %v684_v0, %v683_v60 }
 0x1f7   :  { %v697_v63 = vadd.f32 %v696_v45, %v695_v15  ;;  %v678_v27 = vadd.f32 %v677_v20, %v676_v58  ;;  %v727_v15 = vadd.f32 %v726_v5, %v725_v21 }
 0x1f9   :  { %v698_v24 = vrot.slane %v697_v63, 1 }
 0x1fb   :  { %v699_v31 = vadd.f32 %v698_v24, %v697_v63 }
 0x262   :  { %v130_v2 = vpop.xlane.xlu1 %129 }
 0x269   :  { %v127_v5 = vpop.xlane.xlu1 %126 }
 0x272   :  { %v663_v49 = vpop.xlane.xlu0 %662 }
 0x273   :  { %6052 = vrcp.f32 %v663_v49 }
 0x276   :  { %v133_v21 = vpop.xlane.xlu0 %132 }
 0x27d   :  { %v6053_v7 = vpop.eup %6052 }
 0x27e   :  { %v730_v18 = vrot.slane %v6053_v7, 1  ;;  %v731_v30 = vrot.slane %v6053_v7, 2  ;;  %v732_v32 = vrot.slane %v6053_v7, 3  ;;  %v733_v33 = vrot.slane %v6053_v7, 4 }
 0x27f   :  { %v734_v38 = vrot.slane %v6053_v7, 5  ;;  %v735_v42 = vrot.slane %v6053_v7, 6  ;;  %v736_v43 = vrot.slane %v6053_v7, 7  ;;  %v745_v45 = vmul.f32 %v6053_v7, %v678_v27 }
 0x280   :  { %v746_v47 = vmul.f32 %v730_v18, %v685_v19  ;;  %v747_v50 = vmul.f32 %v731_v30, %v692_v14  ;;  %v748_v53 = vmul.f32 %v732_v32, %v699_v31  ;;  %v749_v55 = vmul.f32 %v733_v33, %v706_v8  ;;  %v136_v31 = vpop.xlane.xlu0 %135  ;;  %v139_v32 = vpop.xlane.xlu1 %138 }
 0x281   :  { %v750_v49 = vmul.f32 %v734_v38, %v713_v9  ;;  %v751_v58 = vmul.f32 %v735_v42, %v720_v13  ;;  %v752_v59 = vmul.f32 %v736_v43, %v727_v15  ;;  %v757_v62 = vmul.f32 %v6870_v12, %v745_v45 }
 0x282   :  { %v758_v60 = vmul.f32 %v6870_v12, %v746_v47  ;;  %v759_v63 = vmul.f32 %v6870_v12, %v747_v50  ;;  %v760_v1 = vmul.f32 %v6870_v12, %v748_v53  ;;  %v761_v16 = vmul.f32 %v6870_v12, %v749_v55 }
 0x283   :  { %v762_v20 = vmul.f32 %v6870_v12, %v750_v49  ;;  %v763_v24 = vmul.f32 %v6870_v12, %v751_v58  ;;  %v764_v25 = vmul.f32 %v6870_v12, %v752_v59  ;;  %v149_v19 = vstv %s109_s1 }
 0x284   :  { %v773_v23 = vrot.slane %v758_v60, 7  ;;  %v775_v0 = vrot.slane %v759_v63, 6  ;;  %v777_v26 = vrot.slane %v760_v1, 5  ;;  %v779_v14 = vrot.slane %v761_v16, 4  ;;  %v142_v42 = vpop.xlane.xlu0 %141  ;;  %v145_v49 = vpop.xlane.xlu1 %144 }
 0x285   :  { %v781_v8 = vrot.slane %v762_v20, 3  ;;  %v783_v13 = vrot.slane %v763_v24, 2  ;;  %v785_v18 = vrot.slane %v764_v25, 1  ;;  %v6885_v30 = vadd.f32 %v149_v19, %v127_v5 }
 0x286   :  { %v774_v28 = vsel %vm645_vm2, %v773_v23, %v757_v62  ;;  %v6888_v38 = vadd.f32 %v149_v19, %v133_v21  ;;  %v6891_v45 = vadd.f32 %v149_v19, %v136_v31  ;;  %v6894_v50 = vadd.f32 %v149_v19, %v139_v32 }
 0x287   :  { %v776_v27 = vsel %vm647_vm3, %v775_v0, %v774_v28  ;;  %v6896_v53 = vadd.f32 %v149_v19, %v130_v2  ;;  %v6898_v55 = vadd.f32 %v149_v19, %v142_v42  ;;  %v1412_v58 = vrot.slane %v6885_v30, 1 }
 0x288   :  { %v778_v7 = vsel %vm649_vm4, %v777_v26, %v776_v27  ;;  %v6901_v59 = vadd.f32 %v149_v19, %v145_v49  ;;  %v148_v60 = vpop.xlane.xlu0 %147  ;;  %v1414_v63 = vrot.slane %v6888_v38, 7  ;;  %v1416_v21 = vrot.slane %v6891_v45, 6 }
 0x289   :  { %v780_v9 = vsel %vm651_vm5, %v779_v14, %v778_v7  ;;  %v6904_v1 = vadd.f32 %v149_v19, %v148_v60  ;;  %v1413_v16 = vsel %vm645_vm2, %v6896_v53, %v1412_v58  ;;  %v1418_v62 = vrot.slane %v6894_v50, 5 }
 0x28a   :  { %v782_v15 = vsel %vm653_vm6, %v781_v8, %v780_v9  ;;  %v1415_v2 = vsel %vm647_vm3, %v1414_v63, %v1413_v16  ;;  %v1420_v23 = vrot.slane %v6898_v55, 4  ;;  %v1422_v24 = vrot.slane %v6901_v59, 3 }
 0x28b   :  { %v784_v33 = vsel %vm655_vm7, %v783_v13, %v782_v15  ;;  %v1417_v20 = vsel %vm649_vm4, %v1416_v21, %v1415_v2  ;;  %v2017_v25 = vrot.slane %v6885_v30, 2  ;;  %v1424_v26 = vrot.slane %v6904_v1, 2 }
 0x28c   :  { %v786_v43 = vsel %vm657_vm8, %v785_v18, %v784_v33  ;;  %v1419_v0 = vsel %vm651_vm5, %v1418_v62, %v1417_v20  ;;  %v2018_v27 = vrot.slane %v6896_v53, 1  ;;  %v2021_v14 = vrot.slane %v6891_v45, 7 }
 0x28d   :  { %v788_v47 = vsel %vm158_vm1, %v786_v43, 0.0  ;;  %v1421_v28 = vsel %vm653_vm6, %v1420_v23, %v1419_v0  ;;  %v2023_v31 = vrot.slane %v6894_v50, 6  ;;  %v2025_v8 = vrot.slane %v6898_v55, 5 }
 0x28e   :  { %789 = vadd.xlane.f32.xlu1 %v788_v47  ;;  %v1423_v5 = vsel %vm655_vm7, %v1422_v24, %v1421_v28  ;;  %v2019_v7 = vsel %vm645_vm2, %v2018_v27, %v2017_v25  ;;  %v2027_v13 = vrot.slane %v6901_v59, 4  ;;  %v2029_v18 = vrot.slane %v6904_v1, 3 }
 0x28f   :  { %v6922_v19 = vsel %vm657_vm8, %v1424_v26, %v1423_v5  ;;  %v2020_v9 = vsel %vm647_vm3, %v6888_v38, %v2019_v7  ;;  %v2622_v32 = vrot.slane %v6885_v30, 3  ;;  %v2623_v33 = vrot.slane %v6896_v53, 2 }
 0x290   :  { %v2022_v15 = vsel %vm649_vm4, %v2021_v14, %v2020_v9  ;;  %v2625_v43 = vrot.slane %v6888_v38, 1  ;;  %v2628_v63 = vrot.slane %v6894_v50, 7  ;;  %v6460_v16 = vmov 0  }
 0x291   :  { %v2024_v42 = vsel %vm651_vm5, %v2023_v31, %v2022_v15  ;;  %v2624_v49 = vsel %vm645_vm2, %v2623_v33, %v2622_v32  ;;  %6019 = vset.pattern.permute.xlu0 %v6460_v16  ;;  %v2630_v62 = vrot.slane %v6898_v55, 6  ;;  %v2632_v23 = vrot.slane %v6901_v59, 5 }
 0x292   :  { %v2026_v47 = vsel %vm653_vm6, %v2025_v8, %v2024_v42  ;;  %v2626_v60 = vsel %vm647_vm3, %v2625_v43, %v2624_v49  ;;  %v3227_v0 = vrot.slane %v6885_v30, 4  ;;  %v2634_v25 = vrot.slane %v6904_v1, 4 }
 0x293   :  { %v2028_v58 = vsel %vm655_vm7, %v2027_v13, %v2026_v47  ;;  %v2627_v2 = vsel %vm649_vm4, %v6891_v45, %v2626_v60  ;;  %v3228_v28 = vrot.slane %v6896_v53, 3  ;;  %v3230_v26 = vrot.slane %v6888_v38, 2 }
 0x294   :  { %v6942_v21 = vsel %vm657_vm8, %v2029_v18, %v2028_v58  ;;  %v2629_v20 = vsel %vm651_vm5, %v2628_v63, %v2627_v2  ;;  %v3232_v27 = vrot.slane %v6891_v45, 1  ;;  %v3235_v8 = vrot.slane %v6898_v55, 7 }
 0x295   :  { %8181 = vst [vmem:[#allocation12_spill] sm:$0xff] %v6942_v21  ;;  %v2631_v24 = vsel %vm653_vm6, %v2630_v62, %v2629_v20  ;;  %v3229_v31 = vsel %vm645_vm2, %v3228_v28, %v3227_v0  ;;  %v3237_v13 = vrot.slane %v6901_v59, 6  ;;  %v3239_v18 = vrot.slane %v6904_v1, 5 }
 0x296   :  { %v2633_v5 = vsel %vm655_vm7, %v2632_v23, %v2631_v24  ;;  %v3231_v7 = vsel %vm647_vm3, %v3230_v26, %v3229_v31  ;;  %v3832_v32 = vrot.slane %v6885_v30, 5  ;;  %v3833_v33 = vrot.slane %v6896_v53, 4 }
 0x297   :  { %v6957_v14 = vsel %vm657_vm8, %v2634_v25, %v2633_v5  ;;  %v3233_v9 = vsel %vm649_vm4, %v3232_v27, %v3231_v7  ;;  %v3835_v43 = vrot.slane %v6888_v38, 3  ;;  %v3837_v58 = vrot.slane %v6891_v45, 2 }
 0x298   :  { %8182 = vst [vmem:[#allocation13_spill] sm:$0xff] %v6957_v14  ;;  %v3234_v15 = vsel %vm651_vm5, %v6894_v50, %v3233_v9  ;;  %v3834_v49 = vsel %vm645_vm2, %v3833_v33, %v3832_v32  ;;  %v3839_v16 = vrot.slane %v6894_v50, 1  ;;  %v3842_v20 = vrot.slane %v6901_v59, 7 }
 0x299   :  { %v3236_v42 = vsel %vm653_vm6, %v3235_v8, %v3234_v15  ;;  %v3836_v63 = vsel %vm647_vm3, %v3835_v43, %v3834_v49  ;;  %v3844_v0 = vrot.slane %v6904_v1, 6  ;;  %v4437_v24 = vrot.slane %v6885_v30, 6 }
 0x29a   :  { %v3238_v47 = vsel %vm655_vm7, %v3237_v13, %v3236_v42  ;;  %v3838_v2 = vsel %vm649_vm4, %v3837_v58, %v3836_v63  ;;  %v4438_v25 = vrot.slane %v6896_v53, 5  ;;  %v4440_v26 = vrot.slane %v6888_v38, 4 }
 0x29b   :  { %v6975_v60 = vsel %vm657_vm8, %v3239_v18, %v3238_v47  ;;  %v3840_v62 = vsel %vm651_vm5, %v3839_v16, %v3838_v2  ;;  %v4442_v31 = vrot.slane %v6891_v45, 3  ;;  %v4444_v8 = vrot.slane %v6894_v50, 2 }
 0x29c   :  { %8183 = vst [vmem:[#allocation14_spill] sm:$0xff] %v6975_v60  ;;  %v3841_v23 = vsel %vm653_vm6, %v6898_v55, %v3840_v62  ;;  %v4439_v27 = vsel %vm645_vm2, %v4438_v25, %v4437_v24  ;;  %v4446_v13 = vrot.slane %v6898_v55, 1  ;;  %v4449_v32 = vrot.slane %v6904_v1, 7 }
 0x29d   :  { %v3843_v28 = vsel %vm655_vm7, %v3842_v20, %v3841_v23  ;;  %v4441_v7 = vsel %vm647_vm3, %v4440_v26, %v4439_v27  ;;  %v5042_v43 = vrot.slane %v6885_v30, 7  ;;  %v5043_v47 = vrot.slane %v6896_v53, 6 }
 0x29e   :  { %v6990_v5 = vsel %vm657_vm8, %v3844_v0, %v3843_v28  ;;  %v4443_v9 = vsel %vm649_vm4, %v4442_v31, %v4441_v7  ;;  %v5045_v49 = vrot.slane %v6888_v38, 5  ;;  %v5047_v63 = vrot.slane %v6891_v45, 4 }
 0x29f   :  { %8184 = vst [vmem:[#allocation15_spill] sm:$0xff] %v6990_v5  ;;  %v4445_v15 = vsel %vm651_vm5, %v4444_v8, %v4443_v9  ;;  %v5044_v58 = vsel %vm645_vm2, %v5043_v47, %v5042_v43  ;;  %v5049_v2 = vrot.slane %v6894_v50, 3  ;;  %v5051_v20 = vrot.slane %v6898_v55, 2 }
 0x2a0   :  { %v4447_v18 = vsel %vm653_vm6, %v4446_v13, %v4445_v15  ;;  %v5046_v16 = vsel %vm647_vm3, %v5045_v49, %v5044_v58  ;;  %v5053_v0 = vrot.slane %v6901_v59, 1  ;;  %v799_v26 = vrot.slane %v6896_v53, 7 }
 0x2a1   :  { %v4448_v33 = vsel %vm655_vm7, %v6901_v59, %v4447_v18  ;;  %v5048_v62 = vsel %vm649_vm4, %v5047_v63, %v5046_v16  ;;  %v801_v27 = vrot.slane %v6888_v38, 6  ;;  %v803_v7 = vrot.slane %v6891_v45, 5 }
 0x2a2   :  { %v7004_v42 = vsel %vm657_vm8, %v4449_v32, %v4448_v33  ;;  %v5050_v23 = vsel %vm651_vm5, %v5049_v2, %v5048_v62  ;;  %v800_v31 = vsel %vm645_vm2, %v799_v26, %v6885_v30  ;;  %v805_v9 = vrot.slane %v6894_v50, 4 }
 0x2a3   :  { %8185 = vst [vmem:[#allocation16_spill] sm:$0xff] %v7004_v42  ;;  %v5052_v24 = vsel %vm653_vm6, %v5051_v20, %v5050_v23  ;;  %v802_v8 = vsel %vm647_vm3, %v801_v27, %v800_v31  ;;  %v807_v15 = vrot.slane %v6898_v55, 3  ;;  %v809_v32 = vrot.slane %v6901_v59, 2 }
 0x2a4   :  { %v5054_v25 = vsel %vm655_vm7, %v5053_v0, %v5052_v24  ;;  %v804_v13 = vsel %vm649_vm4, %v803_v7, %v802_v8  ;;  %v811_v38 = vrot.slane %v6904_v1, 1  ;;  %v822_v49 = vsub.s32 4, %v6668_v29 }
 0x2a5   :  { %v7021_v28 = vsel %vm657_vm8, %v6904_v1, %v5054_v25  ;;  %v806_v18 = vsel %vm651_vm5, %v805_v9, %v804_v13  ;;  %v898_v59 = vsub.s32 5, %v6668_v29 }
 0x2a6   :  { %8186 = vst [vmem:[#allocation17_spill] sm:$0xff] %v7021_v28  ;;  %v808_v53 = vsel %vm653_vm6, %v807_v15, %v806_v18  ;;  %v7040_v55 = vrot.slane %v6675_v37, %v822_v49 }
 0x2a7   :  { %v810_v30 = vsel %vm655_vm7, %v809_v32, %v808_v53  ;;  %v7045_v1 = vrot.slane %v6675_v37, %v898_v59 }
 0x2a8   :  { %v812_v45 = vsel %vm657_vm8, %v811_v38, %v810_v30 }
 0x2c2   :  { %v891_v50 = vpop.f32.mrb[8].mxu0 }
 0x2c3   :  { %v5588_v47 = vpop.f32.mrb[9].mxu0 }
 0x31b   :  { %v790_v33 = vpop.xlane.xlu1 %789 }
 0x31c   :  { %v814_v43 = vadd.f32 %v812_v45, %v790_v33 }
 0x31e   :  { %817 = vperm.xlu0 %6019, %v814_v43  }
 0x39d   :  { %v818_v58 = vpop.permute.xlu0 %817 }
 0x39e   :  { %v824_v63 = vmul.f32 %v7040_v55, %v818_v58 }
 0x3a0   :  { %v895_v16 = vadd.f32 %v891_v50, %v824_v63 }
 0x3a2   :  { %v900_v2 = vadd.f32 %v7045_v1, %v895_v16 }
 0x3a4   :  { %6054 = vtanh.f32 %v900_v2  ;;  %v5363_v20 = vmul.f32 -1.442695, %v900_v2 }
 0x3a6   :  { %6056 = vpow2.f32 %v5363_v20 }
 0x3ae   :  { %v6055_v62 = vpop.eup %6054 }
 0x3af   :  { %910 = vrot.lane.b32.xlu1 %v6055_v62, %s6461_s3 }
 0x3b0   :  { %v6057_v23 = vpop.eup %6056 }
 0x3b1   :  { %v904_v0 = vadd.f32 1.0, %v6057_v23 }
 0x3b3   :  { %6058 = vrcp.f32 %v904_v0 }
 0x3bd   :  { %v6059_v24 = vpop.eup %6058 }
 0x3be   :  { %v908_v37 = vmul.f32 0.0, %v6059_v24 }
 0x421   :  { %v911_v25 = vpop.permute.xlu1 %910 }
 0x422   :  { %v913_v26 = vmul.f32 %v6059_v24, %v911_v25 }
 0x424   :  { %915 = vrot.lane.b32.xlu1 %v913_v26, %s6461_s3 }
 0x496   :  { %v916_v27 = vpop.permute.xlu1 %915 }
 0x497   :  { %v7050_v31 = vadd.f32 %v916_v27, %v908_v37 }
 0x499   :  { %6060 = vtanh.f32 %v7050_v31 }
 0x4a3   :  { %v6061_v7 = vpop.eup %6060 }
 0x4a4   :  { %921 = vrot.lane.b32.xlu1 %v6061_v7, %s6461_s3 }
 0x4a8   :  { %926 = vrot.lane.b32.xlu1 %v7050_v31, %s6462_s15 }
 0x516   :  { %v922_v8 = vpop.permute.xlu1 %921 }
 0x517   :  { %v924_v9 = vmul.f32 %v6059_v24, %v922_v8 }
 0x519   :  { %1001 = vrot.lane.b32.xlu1 %v924_v9, %s6463_s16 }
 0x51a   :  { %v927_v13 = vpop.permute.xlu1 %926 }
 0x51b   :  { %5598 = vmatmul.mubr.msk.f32.vlgmr.msra.gmra.mrb[4].mxu1 %vm158_vm1, %v927_v13 }
 0x51c   :  { %5882 = vmatpush3.bf16.msra.mxu1 %v6829_v54  ;;  %5619 = vmatprep.mubr.msk.f32.mxu1 %vm6457_vm0, %v8156_v6 }
 0x51d   :  { %5883 = vmatprep.subr.bf16.mxu1 %v8154_v3 }
 0x520   :  { %5885 = vmatpush3.bf16.msra.mxu1 %v6832_v57 }
 0x521   :  { %5892 = vmatprep.subr.bf16.mxu1 %v8154_v3 }
 0x58b   :  { %v1002_v15 = vpop.permute.xlu1 %1001 }
 0x58c   :  { %5609 = vmatmul.mubr.msk.f32.vlgmr.msra.gmra.mrb[10].mxu0 %vm158_vm1, %v1002_v15  ;;  %5620 = vmatmul.mubr.msk.f32.vlgmr.msra.gmra.mrb[6].mxu1 %vm158_vm1, %v1002_v15 }
 0x58d   :  { %5888 = vmatpush3.bf16.msra.mxu0 %v6553_v4  ;;  %5630 = vmatprep.mubr.msk.f32.mxu0 %vm6457_vm0, %v8156_v6 }
 0x58e   :  { %5889 = vmatprep.subr.bf16.mxu0 %v8154_v3  ;;  %5894 = vmatpush3.bf16.msra.mxu1 %v6590_v17 }
 0x58f   :  { %5895 = vmatprep.subr.bf16.mxu1 %v8154_v3  ;;  %5641 = vmatprep.mubr.msk.f32.mxu1 %vm6457_vm0, %v8156_v6 }
 0x591   :  { %5891 = vmatpush3.bf16.msra.mxu0 %v6570_v11 }
 0x592   :  { %5898 = vmatprep.subr.bf16.mxu0 %v8154_v3  ;;  %5897 = vmatpush3.bf16.msra.mxu1 %v6612_v22 }
 0x593   :  { %5904 = vmatprep.subr.bf16.mxu1 %v8154_v3 }
 0x5ee   :  { %v996_v18 = vpop.f32.mrb[4].mxu1 }
 0x5ef   :  { %v5599_v32 = vpop.f32.mrb[5].mxu1 }
 0x65f   :  { %v1071_v53 = vpop.f32.mrb[10].mxu0  ;;  %v7078_v38 = vpop.f32.mrb[6].mxu1 }
 0x660   :  { %v1072_v30 = vadd.f32 %v1071_v53, %v996_v18  ;;  %v5610_v33 = vpop.f32.mrb[11].mxu0  ;;  %v5621_v45 = vpop.f32.mrb[7].mxu1 }
 0x662   :  { %v1075_v43 = vadd.f32 %v1072_v30, %v6680_v40 }
 0x664   :  { %v1077_v50 = vcombine.high %v1075_v43, %v1075_v43  ;;  %v1084_v47 = vrot.slane %v1075_v43, %v6685_v44 }
 0x666   :  { %v1091_v49 = vrot.slane %v1077_v50, %v6685_v44  ;;  %v1092_v59 = vcombine.high %v1084_v47, %v1084_v47  ;;  %v1100_v58 = vrot.slane %v1084_v47, %v6685_v44 }
 0x668   :  { %v1093_v63 = vcombine.high %v1091_v49, %v1091_v49  ;;  %v1107_v16 = vrot.slane %v1091_v49, %v6685_v44  ;;  %v1114_v2 = vrot.slane %v1092_v59, %v6685_v44  ;;  %v1122_v62 = vcombine.high %v1100_v58, %v1100_v58 }
 0x669   :  { %v1129_v20 = vrot.slane %v1100_v58, %v6694_v51 }
 0x66a   :  { %v1121_v23 = vrot.slane %v1093_v63, %v6685_v44  ;;  %v1123_v0 = vcombine.high %v1107_v16, %v1107_v16  ;;  %v1124_v24 = vcombine.high %v1114_v2, %v1114_v2  ;;  %v1133_v25 = vrot.slane %v1114_v2, %v6694_v51 }
 0x66b   :  { %v1137_v26 = vrot.slane %v1122_v62, %v6694_v51  ;;  %v1145_v37 = vrot.slane %v1107_v16, %v6694_v51  ;;  %v1166_v27 = vadd.f32 %v1129_v20, %v6673_v36 }
 0x66c   :  { %v1125_v7 = vcombine.high %v1121_v23, %v1121_v23  ;;  %v1141_v8 = vrot.slane %v1124_v24, %v6694_v51  ;;  %v1149_v9 = vrot.slane %v1121_v23, %v6694_v51  ;;  %v1153_v13 = vrot.slane %v1123_v0, %v6694_v51 }
 0x66d   :  { %v1167_v15 = vadd.f32 %v6670_v34, %v1133_v25  ;;  %v1168_v18 = vadd.f32 %v1137_v26, %v6682_v41  ;;  %v1170_v32 = vadd.f32 %v1145_v37, %v6690_v48  ;;  %6062 = vtanh.f32 %v1166_v27 }
 0x66e   :  { %v1157_v53 = vrot.slane %v1125_v7, %v6694_v51  ;;  %v1169_v30 = vadd.f32 %v6677_v39, %v1141_v8  ;;  %v1172_v33 = vadd.f32 %v1153_v13, %v6700_v56  ;;  %v1171_v45 = vadd.f32 %v6687_v46, %v1149_v9 }
 0x66f   :  { %6064 = vtanh.f32 %v1167_v15 }
 0x670   :  { %6066 = vtanh.f32 %v1168_v18  ;;  %v1173_v43 = vadd.f32 %v6696_v52, %v1157_v53 }
 0x671   :  { %6068 = vtanh.f32 %v1170_v32 }
 0x672   :  { %6070 = vtanh.f32 %v1169_v30 }
 0x673   :  { %6072 = vtanh.f32 %v1172_v33 }
 0x674   :  { %6074 = vtanh.f32 %v1171_v45 }
 0x675   :  { %6076 = vtanh.f32 %v1173_v43 }
 0x677   :  { %v6063_v50 = vpop.eup %6062 }
 0x678   :  { %v1182_v47 = vmul.f32 %v6063_v50, %v6723_v35 }
 0x679   :  { %v6065_v49 = vpop.eup %6064 }
 0x67a   :  { %v6067_v59 = vpop.eup %6066  ;;  %v1190_v58 = vsel %vm158_vm1, %v1182_v47, 0.0  ;;  %v1183_v63 = vmul.f32 %v6065_v49, %v6723_v35 }
 0x67b   :  { %v6069_v16 = vpop.eup %6068  ;;  %1191 = vadd.xlane.f32.xlu1 %v1190_v58  ;;  %v1184_v2 = vmul.f32 %v6067_v59, %v6723_v35 }
 0x67c   :  { %v6071_v62 = vpop.eup %6070  ;;  %v1193_v20 = vsel %vm158_vm1, %v1183_v63, 0.0  ;;  %v1186_v23 = vmul.f32 %v6069_v16, %v6723_v35 }
 0x67d   :  { %v6073_v0 = vpop.eup %6072  ;;  %1194 = vadd.xlane.f32.xlu0 %v1193_v20  ;;  %v1196_v24 = vsel %vm158_vm1, %v1184_v2, 0.0  ;;  %v1185_v25 = vmul.f32 %v6071_v62, %v6723_v35 }
 0x67e   :  { %v6075_v26 = vpop.eup %6074  ;;  %v1202_v37 = vsel %vm158_vm1, %v1186_v23, 0.0  ;;  %v1188_v27 = vmul.f32 %v6073_v0, %v6723_v35 }
 0x67f   :  { %1197 = vadd.xlane.f32.xlu1 %v1196_v24  ;;  %v1199_v7 = vsel %vm158_vm1, %v1185_v25, 0.0  ;;  %v1187_v8 = vmul.f32 %v6075_v26, %v6723_v35  ;;  %v6077_v9 = vpop.eup %6076 }
 0x680   :  { %v1208_v13 = vsel %vm158_vm1, %v1188_v27, 0.0  ;;  %v1189_v18 = vmul.f32 %v6077_v9, %v6723_v35 }
 0x681   :  { %1203 = vadd.xlane.f32.xlu0 %v1202_v37  ;;  %v1205_v15 = vsel %vm158_vm1, %v1187_v8, 0.0 }
 0x682   :  { %v1211_v32 = vsel %vm158_vm1, %v1189_v18, 0.0 }
 0x683   :  { %1200 = vadd.xlane.f32.xlu1 %v1199_v7 }
 0x685   :  { %1209 = vadd.xlane.f32.xlu0 %v1208_v13 }
 0x687   :  { %1206 = vadd.xlane.f32.xlu1 %v1205_v15 }
 0x68b   :  { %1212 = vadd.xlane.f32.xlu1 %v1211_v32 }
 0x708   :  { %v1192_v53 = vpop.xlane.xlu1 %1191 }
 0x709   :  { %v1214_v30 = vsub.f32 %v1192_v53, %v6741_v10 }
 0x70a   :  { %v1195_v33 = vpop.xlane.xlu0 %1194 }
 0x70b   :  { %v1215_v45 = vsub.f32 %v1195_v33, %v6741_v10  ;;  %v1222_v50 = vmul.f32 1.442695, %v1214_v30 }
 0x70c   :  { %v1198_v43 = vpop.xlane.xlu1 %1197 }
 0x70d   :  { %v1224_v47 = vmul.f32 1.442695, %v1215_v45  ;;  %v1216_v49 = vsub.f32 %v1198_v43, %v6741_v10 }
 0x70e   :  { %v1204_v59 = vpop.xlane.xlu0 %1203 }
 0x70f   :  { %6078 = vpow2.f32 %v1224_v47  ;;  %v1226_v58 = vmul.f32 1.442695, %v1216_v49  ;;  %v1218_v63 = vsub.f32 %v1204_v59, %v6741_v10 }
 0x710   :  { %v1201_v16 = vpop.xlane.xlu1 %1200  ;;  %6080 = vpow2.f32 %v1222_v50 }
 0x711   :  { %v1217_v2 = vsub.f32 %v1201_v16, %v6741_v10  ;;  %6082 = vpow2.f32 %v1226_v58  ;;  %v1230_v0 = vmul.f32 1.442695, %v1218_v63 }
 0x712   :  { %v1210_v62 = vpop.xlane.xlu0 %1209 }
 0x713   :  { %v1228_v20 = vmul.f32 1.442695, %v1217_v2  ;;  %v1220_v23 = vsub.f32 %v1210_v62, %v6741_v10 }
 0x714   :  { %v1207_v24 = vpop.xlane.xlu1 %1206 }
 0x715   :  { %6084 = vpow2.f32 %v1228_v20  ;;  %v1219_v25 = vsub.f32 %v1207_v24, %v6741_v10  ;;  %v1234_v26 = vmul.f32 1.442695, %v1220_v23 }
 0x716   :  { %6086 = vpow2.f32 %v1230_v0 }
 0x717   :  { %v1232_v37 = vmul.f32 1.442695, %v1219_v25 }
 0x718   :  { %v1213_v27 = vpop.xlane.xlu1 %1212 }
 0x719   :  { %v6079_v7 = vpop.eup %6078  ;;  %6088 = vpow2.f32 %v1232_v37  ;;  %v1221_v8 = vsub.f32 %v1213_v27, %v6741_v10  ;;  %v7152_v27 = vld [vmem:[%s8145_s0 + $0x8] sm:$0xff] }
 0x71a   :  { %6090 = vpow2.f32 %v1234_v26  ;;  %v6081_v9 = vpop.eup %6080  ;;  %v1253_v18 = vrot.slane %v6079_v7, %v6753_v61  ;;  %v7146_v26 = vld [vmem:[%s8145_s0] sm:$0xff] }
 0x71b   :  { %v1236_v13 = vmul.f32 1.442695, %v1221_v8  ;;  %v6083_v15 = vpop.eup %6082  ;;  %v1249_v32 = vrot.slane %v6081_v9, %v6753_v61  ;;  %v1289_v37 = vmul.f32 %v7146_v26, %v6081_v9  ;;  %v1290_v8 = vmul.f32 %v7152_v27, %v6079_v7 }
 0x71c   :  { %v1257_v30 = vrot.slane %v6083_v15, %v6753_v61 }
 0x71d   :  { %6092 = vpow2.f32 %v1236_v13  ;;  %v1278_v45 = vsel %vm645_vm2, %v1253_v18, %v1249_v32  ;;  %v7158_v13 = vld [vmem:[%s8145_s0 + $0x10] sm:$0xff]  ;;  %v7164_v32 = vld [vmem:[%s8145_s0 + $0x20] sm:$0xff] }
 0x71e   :  { %v1279_v47 = vsel %vm647_vm3, %v1257_v30, %v1278_v45  ;;  %8187 = vst [vmem:[#allocation18_spill] sm:$0xff] %v7158_v13  ;;  %v1291_v18 = vmul.f32 %v7158_v13, %v6083_v15  ;;  %8188 = vst [vmem:[#allocation19_spill] sm:$0xff] %v7164_v32  ;;  %v7170_v30 = vld [vmem:[%s8145_s0 + $0x18] sm:$0xff]  ;;  %v7182_v45 = vld [vmem:[%s8145_s0 + $0x28] sm:$0xff] }
 0x71f   :  { %v6085_v53 = vpop.eup %6084  ;;  %8189 = vst [vmem:[#allocation20_spill] sm:$0xff] %v7170_v30  ;;  %8191 = vst [vmem:[#allocation22_spill] sm:$0xff] %v7182_v45 }
 0x720   :  { %v1261_v33 = vrot.slane %v6085_v53, %v6753_v61  ;;  %v6087_v43 = vpop.eup %6086  ;;  %v1292_v7 = vmul.f32 %v7170_v30, %v6085_v53 }
 0x721   :  { %v1265_v63 = vrot.slane %v6087_v43, %v6753_v61  ;;  %v1293_v9 = vmul.f32 %v7164_v32, %v6087_v43 }
 0x722   :  { %v1280_v58 = vsel %vm649_vm4, %v1261_v33, %v1279_v47  ;;  %v7176_v33 = vld [vmem:[%s8145_s0 + $0x30] sm:$0xff]  ;;  %v7188_v47 = vld [vmem:[%s8145_s0 + $0x38] sm:$0xff] }
 0x723   :  { %v6089_v50 = vpop.eup %6088  ;;  %v1281_v62 = vsel %vm651_vm5, %v1265_v63, %v1280_v58  ;;  %8190 = vst [vmem:[#allocation21_spill] sm:$0xff] %v7176_v33  ;;  %8192 = vst [vmem:[#allocation23_spill] sm:$0xff] %v7188_v47  ;;  %v1304_v58 = vsel %vm158_vm1, %v1290_v8, 0.0  ;;  %v1325_v63 = vsel %vm158_vm1, %v1293_v9, 0.0 }
 0x724   :  { %v6091_v49 = vpop.eup %6090  ;;  %v1269_v59 = vrot.slane %v6089_v50, %v6753_v61  ;;  %v1294_v43 = vmul.f32 %v7182_v45, %v6089_v50 }
 0x725   :  { %v1273_v2 = vrot.slane %v6091_v49, %v6753_v61  ;;  %v1295_v15 = vmul.f32 %v7176_v33, %v6091_v49  ;;  %v1311_v49 = vsel %vm158_vm1, %v1291_v18, 0.0 }
 0x726   :  { %v1282_v23 = vsel %vm653_vm6, %v1269_v59, %v1281_v62  ;;  %v1297_v59 = vsel %vm158_vm1, %v1289_v37, 0.0  ;;  %v1332_v50 = vsel %vm158_vm1, %v1294_v43, 0.0 }
 0x727   :  { %v6093_v16 = vpop.eup %6092  ;;  %v1283_v0 = vsel %vm655_vm7, %v1273_v2, %v1282_v23  ;;  %v1318_v2 = vsel %vm158_vm1, %v1292_v7, 0.0  ;;  %v1339_v62 = vsel %vm158_vm1, %v1295_v15, 0.0  ;;  %v1298_v23 = vrot.slane %v1297_v59, 4 }
 0x728   :  { %v1277_v20 = vrot.slane %v6093_v16, %v6753_v61  ;;  %v1296_v53 = vmul.f32 %v7188_v47, %v6093_v16  ;;  %v1326_v16 = vrot.slane %v1325_v63, 4  ;;  %v1340_v37 = vrot.slane %v1339_v62, 4 }
 0x729   :  { %v1333_v3 = vrot.slane %v1332_v50, 4  ;;  %v1299_v6 = vadd.f32 %v1298_v23, %v1297_v59 }
 0x72a   :  { %v1284_v24 = vsel %vm657_vm8, %v1277_v20, %v1283_v0  ;;  %v1346_v20 = vsel %vm158_vm1, %v1296_v53, 0.0  ;;  %v1305_v0 = vrot.slane %v1304_v58, 4  ;;  %v1327_v9 = vadd.f32 %v1326_v16, %v1325_v63 }
 0x72b   :  { %v1286_v25 = vsel %vm660_vm9, %v1284_v24, 0.0  ;;  %v1312_v24 = vrot.slane %v1311_v49, 4  ;;  %v1347_v8 = vrot.slane %v1346_v20, 4  ;;  %v1334_v7 = vadd.f32 %v1333_v3, %v1332_v50 }
 0x72c   :  { %1287 = vadd.xlane.f32.xlu0 %v1286_v25  ;;  %v1319_v25 = vrot.slane %v1318_v2, 4  ;;  %v1306_v18 = vadd.f32 %v1305_v0, %v1304_v58  ;;  %v1341_v42 = vadd.f32 %v1340_v37, %v1339_v62  ;;  %v1300_v5 = vrot.slane %v1299_v6, 2 }
 0x72d   :  { %v1313_v29 = vadd.f32 %v1312_v24, %v1311_v49  ;;  %v1348_v15 = vadd.f32 %v1347_v8, %v1346_v20  ;;  %v1328_v53 = vrot.slane %v1327_v9, 2  ;;  %v1335_v21 = vrot.slane %v1334_v7, 2 }
 0x72e   :  { %v1320_v28 = vadd.f32 %v1319_v25, %v1318_v2  ;;  %v1307_v43 = vrot.slane %v1306_v18, 2  ;;  %v1342_v33 = vrot.slane %v1341_v42, 2  ;;  %v1301_v45 = vadd.f32 %v1300_v5, %v1299_v6 }
 0x72f   :  { %v1314_v60 = vrot.slane %v1313_v29, 2  ;;  %v1349_v47 = vrot.slane %v1348_v15, 2  ;;  %v1329_v58 = vadd.f32 %v1328_v53, %v1327_v9  ;;  %v1336_v63 = vadd.f32 %v1335_v21, %v1334_v7 }
 0x730   :  { %v1321_v14 = vrot.slane %v1320_v28, 2  ;;  %v1308_v13 = vadd.f32 %v1307_v43, %v1306_v18  ;;  %v1343_v2 = vadd.f32 %v1342_v33, %v1341_v42  ;;  %v1302_v62 = vrot.slane %v1301_v45, 1 }
 0x731   :  { %v1315_v59 = vadd.f32 %v1314_v60, %v1313_v29  ;;  %v1350_v3 = vadd.f32 %v1349_v47, %v1348_v15  ;;  %v1330_v23 = vrot.slane %v1329_v58, 1  ;;  %v1337_v24 = vrot.slane %v1336_v63, 1 }
 0x732   :  { %v1322_v49 = vadd.f32 %v1321_v14, %v1320_v28  ;;  %v1309_v50 = vrot.slane %v1308_v13, 1  ;;  %v1344_v16 = vrot.slane %v1343_v2, 1  ;;  %v1303_v37 = vadd.f32 %v1302_v62, %v1301_v45 }
 0x733   :  { %v1316_v20 = vrot.slane %v1315_v59, 1  ;;  %v1351_v25 = vrot.slane %v1350_v3, 1  ;;  %v1338_v29 = vadd.f32 %v1337_v24, %v1336_v63 }
 0x734   :  { %v1323_v0 = vrot.slane %v1322_v49, 1  ;;  %v1310_v8 = vadd.f32 %v1309_v50, %v1308_v13  ;;  %v1345_v60 = vadd.f32 %v1344_v16, %v1343_v2 }
 0x735   :  { %v1317_v30 = vadd.f32 %v1316_v20, %v1315_v59  ;;  %v1352_v14 = vadd.f32 %v1351_v25, %v1350_v3 }
 0x736   :  { %v1324_v5 = vadd.f32 %v1323_v0, %v1322_v49 }
 0x7b9   :  { %v1288_v32 = vpop.xlane.xlu0 %1287 }
 0x7ba   :  { %6094 = vrcp.f32 %v1288_v32  ;;  %v1331_v32 = vadd.f32 %v1330_v23, %v1329_v58 }
 0x7c4   :  { %v6095_v6 = vpop.eup %6094 }
 0x7c5   :  { %v1355_v21 = vrot.slane %v6095_v6, 1  ;;  %v1356_v42 = vrot.slane %v6095_v6, 2  ;;  %v1357_v28 = vrot.slane %v6095_v6, 3  ;;  %v1358_v33 = vrot.slane %v6095_v6, 4 }
 0x7c6   :  { %v1359_v47 = vrot.slane %v6095_v6, 5  ;;  %v1360_v18 = vrot.slane %v6095_v6, 6  ;;  %v1361_v9 = vrot.slane %v6095_v6, 7  ;;  %v1370_v7 = vmul.f32 %v6095_v6, %v1303_v37 }
 0x7c7   :  { %v1371_v15 = vmul.f32 %v1355_v21, %v1310_v8  ;;  %v1372_v43 = vmul.f32 %v1356_v42, %v1317_v30  ;;  %v1373_v53 = vmul.f32 %v1357_v28, %v1324_v5  ;;  %v1374_v45 = vmul.f32 %v1358_v33, %v1331_v32 }
 0x7c8   :  { %v1375_v13 = vmul.f32 %v1359_v47, %v1338_v29  ;;  %v1376_v59 = vmul.f32 %v1360_v18, %v1345_v60  ;;  %v1377_v58 = vmul.f32 %v1361_v9, %v1352_v14  ;;  %v1378_v62 = vmul.f32 %v1370_v7, %v6870_v12 }
 0x7c9   :  { %v1379_v49 = vmul.f32 %v1371_v15, %v6870_v12  ;;  %v1380_v63 = vmul.f32 %v1372_v43, %v6870_v12  ;;  %v1381_v2 = vmul.f32 %v1373_v53, %v6870_v12  ;;  %v1382_v3 = vmul.f32 %v1374_v45, %v6870_v12 }
 0x7ca   :  { %v1383_v50 = vmul.f32 %v1375_v13, %v6870_v12  ;;  %v1384_v30 = vmul.f32 %v1376_v59, %v6870_v12  ;;  %v1385_v0 = vmul.f32 %v1377_v58, %v6870_v12 }
 0x7cb   :  { %v1394_v20 = vrot.slane %v1379_v49, 7  ;;  %v1396_v23 = vrot.slane %v1380_v63, 6  ;;  %v1398_v16 = vrot.slane %v1381_v2, 5  ;;  %v1400_v37 = vrot.slane %v1382_v3, 4 }
 0x7cc   :  { %v1402_v32 = vrot.slane %v1383_v50, 3  ;;  %v1404_v5 = vrot.slane %v1384_v30, 2  ;;  %v1406_v60 = vrot.slane %v1385_v0, 1  ;;  %v8193_v3 = vmov 0.0  }
 0x7cd   :  { %v1395_v24 = vsel %vm645_vm2, %v1394_v20, %v1378_v62 }
 0x7ce   :  { %v1397_v25 = vsel %vm647_vm3, %v1396_v23, %v1395_v24 }
 0x7cf   :  { %v1399_v8 = vsel %vm649_vm4, %v1398_v16, %v1397_v25 }
 0x7d0   :  { %v1401_v6 = vsel %vm651_vm5, %v1400_v37, %v1399_v8 }
 0x7d1   :  { %v1403_v29 = vsel %vm653_vm6, %v1402_v32, %v1401_v6 }
 0x7d2   :  { %v1405_v14 = vsel %vm655_vm7, %v1404_v5, %v1403_v29 }
 0x7d3   :  { %v1407_v21 = vsel %vm657_vm8, %v1406_v60, %v1405_v14 }
 0x7d4   :  { %v1409_v42 = vsel %vm158_vm1, %v1407_v21, 0.0 }
 0x7d5   :  { %1410 = vadd.xlane.f32.xlu1 %v1409_v42 }
 0x862   :  { %v1411_v28 = vpop.xlane.xlu1 %1410 }
 0x863   :  { %v1427_v33 = vadd.f32 %v6922_v19, %v1411_v28 }
 0x865   :  { %1430 = vperm.xlu0 %6019, %v1427_v33  }
 0x8e4   :  { %v1431_v47 = vpop.permute.xlu0 %1430 }
 0x8e5   :  { %v1433_v18 = vmul.f32 %v1431_v47, %v7040_v55 }
 0x8e7   :  { %v1504_v9 = vadd.f32 %v7078_v38, %v1433_v18 }
 0x8e9   :  { %v1505_v7 = vadd.f32 %v1504_v9, %v7045_v1 }
 0x8eb   :  { %6096 = vtanh.f32 %v1505_v7  ;;  %v5367_v43 = vmul.f32 -1.442695, %v1505_v7 }
 0x8ed   :  { %6098 = vpow2.f32 %v5367_v43 }
 0x8f5   :  { %v6097_v15 = vpop.eup %6096 }
 0x8f6   :  { %1515 = vrot.lane.b32.xlu1 %v6097_v15, %s6461_s3 }
 0x8f7   :  { %v6099_v53 = vpop.eup %6098 }
 0x8f8   :  { %v1509_v45 = vadd.f32 1.0, %v6099_v53 }
 0x8fa   :  { %6100 = vrcp.f32 %v1509_v45 }
 0x904   :  { %v6101_v13 = vpop.eup %6100 }
 0x905   :  { %v1513_v58 = vmul.f32 %v6101_v13, %v7050_v31  ;;  %v8194_v31 = vmov 0.0|0.0  }
 0x968   :  { %v1516_v59 = vpop.permute.xlu1 %1515 }
 0x969   :  { %v1518_v19 = vmul.f32 %v6101_v13, %v1516_v59 }
 0x96b   :  { %1520 = vrot.lane.b32.xlu1 %v1518_v19, %s6461_s3 }
 0x9dd   :  { %v1521_v49 = vpop.permute.xlu1 %1520 }
 0x9de   :  { %v7222_v38 = vadd.f32 %v1521_v49, %v1513_v58 }
 0x9e0   :  { %6102 = vtanh.f32 %v7222_v38  ;;  %1531 = vrot.lane.b32.xlu1 %v7222_v38, %s6462_s15 }
 0x9ea   :  { %v6103_v63 = vpop.eup %6102 }
 0x9eb   :  { %1526 = vrot.lane.b32.xlu0 %v6103_v63, %s6461_s3 }
 0xa52   :  { %v1532_v2 = vpop.permute.xlu1 %1531 }
 0xa53   :  { %5631 = vmatmul.mubr.msk.f32.vlgmr.msra.gmra.mrb[12].mxu0 %vm158_vm1, %v1532_v2 }
 0xa54   :  { %5900 = vmatpush3.bf16.msra.mxu0 %v6829_v54  ;;  %5652 = vmatprep.mubr.msk.f32.mxu0 %vm6457_vm0, %v8193_v3 }
 0xa55   :  { %5901 = vmatprep.subr.bf16.mxu0 %v8194_v31 }
 0xa58   :  { %5903 = vmatpush3.bf16.msra.mxu0 %v6832_v57 }
 0xa59   :  { %5910 = vmatprep.subr.bf16.mxu0 %v8194_v31 }
 0xa5d   :  { %v1527_v62 = vpop.permute.xlu0 %1526 }
 0xa5e   :  { %v1529_v50 = vmul.f32 %v6101_v13, %v1527_v62 }
 0xa60   :  { %1606 = vrot.lane.b32.xlu0 %v1529_v50, %s6463_s16 }
 0xad2   :  { %v1607_v20 = vpop.permute.xlu0 %1606 }
 0xad3   :  { %5642 = vmatmul.mubr.msk.f32.vlgmr.msra.gmra.mrb[8].mxu1 %vm158_vm1, %v1607_v20  ;;  %5653 = vmatmul.mubr.msk.f32.vlgmr.msra.gmra.mrb[14].mxu0 %vm158_vm1, %v1607_v20 }
 0xad4   :  { %5906 = vmatpush3.bf16.msra.mxu1 %v6553_v4  ;;  %5663 = vmatprep.mubr.msk.f32.mxu1 %vm6457_vm0, %v8193_v3 }
 0xad5   :  { %5907 = vmatprep.subr.bf16.mxu1 %v8194_v31  ;;  %5912 = vmatpush3.bf16.msra.mxu0 %v6590_v17 }
 0xad6   :  { %5913 = vmatprep.subr.bf16.mxu0 %v8194_v31  ;;  %5674 = vmatprep.mubr.msk.f32.mxu0 %vm6457_vm0, %v8193_v3 }
 0xad8   :  { %5909 = vmatpush3.bf16.msra.mxu1 %v6570_v11 }
 0xad9   :  { %5916 = vmatprep.subr.bf16.mxu1 %v8194_v31  ;;  %5915 = vmatpush3.bf16.msra.mxu0 %v6612_v22 }
 0xada   :  { %5922 = vmatprep.subr.bf16.mxu0 %v8194_v31 }
 0xb26   :  { %v1601_v23 = vpop.f32.mrb[12].mxu0 }
 0xb27   :  { %v5632_v30 = vpop.f32.mrb[13].mxu0 }
 0xba6   :  { %v1676_v0 = vpop.f32.mrb[8].mxu1  ;;  %v7250_v24 = vpop.f32.mrb[14].mxu0 }
 0xba7   :  { %v1677_v16 = vadd.f32 %v1676_v0, %v1601_v23  ;;  %v5643_v25 = vpop.f32.mrb[9].mxu1  ;;  %v5654_v37 = vpop.f32.mrb[15].mxu0 }
 0xba9   :  { %v1680_v8 = vadd.f32 %v1677_v16, %v6680_v40 }
 0xbab   :  { %v1682_v32 = vcombine.high %v1680_v8, %v1680_v8  ;;  %v1689_v6 = vrot.slane %v1680_v8, %v6685_v44 }
 0xbad   :  { %v1696_v5 = vrot.slane %v1682_v32, %v6685_v44  ;;  %v1697_v29 = vcombine.high %v1689_v6, %v1689_v6  ;;  %v1705_v60 = vrot.slane %v1689_v6, %v6685_v44 }
 0xbaf   :  { %v1698_v14 = vcombine.high %v1696_v5, %v1696_v5  ;;  %v1712_v21 = vrot.slane %v1696_v5, %v6685_v44  ;;  %v1719_v42 = vrot.slane %v1697_v29, %v6685_v44  ;;  %v1727_v28 = vcombine.high %v1705_v60, %v1705_v60 }
 0xbb0   :  { %v1734_v33 = vrot.slane %v1705_v60, %v6694_v51 }
 0xbb1   :  { %v1726_v47 = vrot.slane %v1698_v14, %v6685_v44  ;;  %v1728_v18 = vcombine.high %v1712_v21, %v1712_v21  ;;  %v1729_v9 = vcombine.high %v1719_v42, %v1719_v42  ;;  %v1738_v7 = vrot.slane %v1719_v42, %v6694_v51 }
 0xbb2   :  { %v1742_v15 = vrot.slane %v1727_v28, %v6694_v51  ;;  %v1750_v43 = vrot.slane %v1712_v21, %v6694_v51  ;;  %v1771_v53 = vadd.f32 %v1734_v33, %v6673_v36 }
 0xbb3   :  { %v1730_v45 = vcombine.high %v1726_v47, %v1726_v47  ;;  %v1746_v13 = vrot.slane %v1729_v9, %v6694_v51  ;;  %v1754_v59 = vrot.slane %v1726_v47, %v6694_v51  ;;  %v1758_v19 = vrot.slane %v1728_v18, %v6694_v51 }
 0xbb4   :  { %v1772_v58 = vadd.f32 %v6670_v34, %v1738_v7  ;;  %v1773_v49 = vadd.f32 %v1742_v15, %v6682_v41  ;;  %v1775_v63 = vadd.f32 %v1750_v43, %v6690_v48  ;;  %6104 = vtanh.f32 %v1771_v53 }
 0xbb5   :  { %v1762_v2 = vrot.slane %v1730_v45, %v6694_v51  ;;  %v1774_v62 = vadd.f32 %v6677_v39, %v1746_v13  ;;  %v1776_v50 = vadd.f32 %v6687_v46, %v1754_v59  ;;  %v1777_v20 = vadd.f32 %v1758_v19, %v6700_v56 }
 0xbb6   :  { %6106 = vtanh.f32 %v1772_v58 }
 0xbb7   :  { %6108 = vtanh.f32 %v1773_v49  ;;  %v1778_v23 = vadd.f32 %v6696_v52, %v1762_v2 }
 0xbb8   :  { %6110 = vtanh.f32 %v1775_v63 }
 0xbb9   :  { %6112 = vtanh.f32 %v1774_v62 }
 0xbba   :  { %6114 = vtanh.f32 %v1776_v50 }
 0xbbb   :  { %6116 = vtanh.f32 %v1778_v23 }
 0xbbc   :  { %6118 = vtanh.f32 %v1777_v20 }
 0xbbe   :  { %v6105_v30 = vpop.eup %6104 }
 0xbbf   :  { %v1787_v0 = vmul.f32 %v6105_v30, %v6723_v35 }
 0xbc0   :  { %v6107_v16 = vpop.eup %6106 }
 0xbc1   :  { %v6109_v25 = vpop.eup %6108  ;;  %v1795_v37 = vsel %vm158_vm1, %v1787_v0, 0.0  ;;  %v1788_v8 = vmul.f32 %v6107_v16, %v6723_v35 }
 0xbc2   :  { %v6111_v32 = vpop.eup %6110  ;;  %1796 = vadd.xlane.f32.xlu1 %v1795_v37  ;;  %v1789_v29 = vmul.f32 %v6109_v25, %v6723_v35 }
 0xbc3   :  { %v6113_v6 = vpop.eup %6112  ;;  %v1798_v5 = vsel %vm158_vm1, %v1788_v8, 0.0  ;;  %v1791_v47 = vmul.f32 %v6111_v32, %v6723_v35 }
 0xbc4   :  { %v6115_v60 = vpop.eup %6114  ;;  %1799 = vadd.xlane.f32.xlu0 %v1798_v5  ;;  %v1790_v14 = vmul.f32 %v6113_v6, %v6723_v35  ;;  %v1801_v33 = vsel %vm158_vm1, %v1789_v29, 0.0 }
 0xbc5   :  { %v1792_v42 = vmul.f32 %v6115_v60, %v6723_v35  ;;  %v6117_v28 = vpop.eup %6116  ;;  %v1807_v15 = vsel %vm158_vm1, %v1791_v47, 0.0 }
 0xbc6   :  { %v1804_v21 = vsel %vm158_vm1, %v1790_v14, 0.0  ;;  %v6119_v18 = vpop.eup %6118  ;;  %v1794_v7 = vmul.f32 %v6117_v28, %v6723_v35 }
 0xbc7   :  { %1805 = vadd.xlane.f32.xlu1 %v1804_v21  ;;  %v1810_v9 = vsel %vm158_vm1, %v1792_v42, 0.0  ;;  %v1793_v43 = vmul.f32 %v6119_v18, %v6723_v35 }
 0xbc8   :  { %1802 = vadd.xlane.f32.xlu0 %v1801_v33  ;;  %v1816_v53 = vsel %vm158_vm1, %v1794_v7, 0.0 }
 0xbc9   :  { %v1813_v45 = vsel %vm158_vm1, %v1793_v43, 0.0 }
 0xbcb   :  { %1811 = vadd.xlane.f32.xlu1 %v1810_v9 }
 0xbcc   :  { %1808 = vadd.xlane.f32.xlu0 %v1807_v15 }
 0xbcf   :  { %1817 = vadd.xlane.f32.xlu1 %v1816_v53 }
 0xbd0   :  { %1814 = vadd.xlane.f32.xlu0 %v1813_v45 }
 0xc4f   :  { %v1797_v13 = vpop.xlane.xlu1 %1796 }
 0xc50   :  { %v1819_v49 = vsub.f32 %v1797_v13, %v6741_v10 }
 0xc51   :  { %v1800_v59 = vpop.xlane.xlu0 %1799 }
 0xc52   :  { %v1820_v19 = vsub.f32 %v1800_v59, %v6741_v10  ;;  %v1827_v23 = vmul.f32 1.442695, %v1819_v49 }
 0xc54   :  { %v1806_v58 = vpop.xlane.xlu1 %1805  ;;  %v1829_v62 = vmul.f32 1.442695, %v1820_v19 }
 0xc55   :  { %v1803_v63 = vpop.xlane.xlu0 %1802  ;;  %v1822_v30 = vsub.f32 %v1806_v58, %v6741_v10 }
 0xc56   :  { %v1821_v2 = vsub.f32 %v1803_v63, %v6741_v10  ;;  %6120 = vpow2.f32 %v1829_v62 }
 0xc57   :  { %v1833_v32 = vmul.f32 1.442695, %v1822_v30 }
 0xc58   :  { %v1831_v50 = vmul.f32 1.442695, %v1821_v2  ;;  %v1812_v20 = vpop.xlane.xlu1 %1811 }
 0xc59   :  { %v1809_v0 = vpop.xlane.xlu0 %1808  ;;  %v1824_v25 = vsub.f32 %v1812_v20, %v6741_v10 }
 0xc5a   :  { %v1823_v16 = vsub.f32 %v1809_v0, %v6741_v10  ;;  %6122 = vpow2.f32 %v1831_v50 }
 0xc5b   :  { %6124 = vpow2.f32 %v1827_v23  ;;  %v1837_v60 = vmul.f32 1.442695, %v1824_v25 }
 0xc5c   :  { %v1835_v37 = vmul.f32 1.442695, %v1823_v16  ;;  %v1818_v8 = vpop.xlane.xlu1 %1817 }
 0xc5d   :  { %v1826_v6 = vsub.f32 %v1818_v8, %v6741_v10  ;;  %v1815_v5 = vpop.xlane.xlu0 %1814 }
 0xc5e   :  { %v1825_v29 = vsub.f32 %v1815_v5, %v6741_v10  ;;  %6126 = vpow2.f32 %v1835_v37  ;;  %v8195_v37 = vld [vmem:[#allocation20_spill] sm:$0xff]  ;;  %v8197_v5 = vld [vmem:[#allocation22_spill] sm:$0xff] }
 0xc5f   :  { %6128 = vpow2.f32 %v1833_v32  ;;  %v1841_v21 = vmul.f32 1.442695, %v1826_v6  ;;  %v8196_v32 = vld [vmem:[#allocation18_spill] sm:$0xff] }
 0xc60   :  { %v1839_v14 = vmul.f32 1.442695, %v1825_v29  ;;  %v6121_v42 = vpop.eup %6120 }
 0xc61   :  { %v1858_v47 = vrot.slane %v6121_v42, %v6753_v61  ;;  %v1895_v25 = vmul.f32 %v7152_v27, %v6121_v42 }
 0xc62   :  { %6130 = vpow2.f32 %v1839_v14 }
 0xc63   :  { %6132 = vpow2.f32 %v1837_v60  ;;  %v8198_v60 = vld [vmem:[#allocation19_spill] sm:$0xff] }
 0xc64   :  { %6134 = vpow2.f32 %v1841_v21  ;;  %v6123_v28 = vpop.eup %6122  ;;  %v8199_v21 = vld [vmem:[#allocation23_spill] sm:$0xff] }
 0xc65   :  { %v6125_v33 = vpop.eup %6124  ;;  %v1862_v18 = vrot.slane %v6123_v28, %v6753_v61  ;;  %v1896_v6 = vmul.f32 %v8196_v32, %v6123_v28 }
 0xc66   :  { %v1854_v7 = vrot.slane %v6125_v33, %v6753_v61  ;;  %v1894_v16 = vmul.f32 %v7146_v26, %v6125_v33 }
 0xc67   :  { %v1916_v27 = vsel %vm158_vm1, %v1896_v6, 0.0 }
 0xc68   :  { %v6127_v9 = vpop.eup %6126  ;;  %v1883_v53 = vsel %vm645_vm2, %v1858_v47, %v1854_v7 }
 0xc69   :  { %v6129_v15 = vpop.eup %6128  ;;  %v1870_v13 = vrot.slane %v6127_v9, %v6753_v61  ;;  %v1884_v59 = vsel %vm647_vm3, %v1862_v18, %v1883_v53  ;;  %v1898_v14 = vmul.f32 %v8198_v60, %v6127_v9  ;;  %v8200_v18 = vld [vmem:[#allocation21_spill] sm:$0xff]  ;;  %v1902_v53 = vsel %vm158_vm1, %v1894_v16, 0.0 }
 0xc6a   :  { %v1866_v19 = vrot.slane %v6129_v15, %v6753_v61  ;;  %v1897_v8 = vmul.f32 %v8195_v37, %v6129_v15  ;;  %v1903_v15 = vrot.slane %v1902_v53, 4 }
 0xc6b   :  { %v1930_v28 = vsel %vm158_vm1, %v1898_v14, 0.0 }
 0xc6c   :  { %v6131_v43 = vpop.eup %6130  ;;  %v1885_v2 = vsel %vm649_vm4, %v1866_v19, %v1884_v59  ;;  %v1923_v26 = vsel %vm158_vm1, %v1897_v8, 0.0 }
 0xc6d   :  { %v6133_v45 = vpop.eup %6132  ;;  %v1878_v49 = vrot.slane %v6131_v43, %v6753_v61  ;;  %v1886_v62 = vsel %vm651_vm5, %v1870_v13, %v1885_v2  ;;  %v1900_v7 = vmul.f32 %v8200_v18, %v6131_v43  ;;  %v1909_v13 = vsel %vm158_vm1, %v1895_v25, 0.0 }
 0xc6e   :  { %v6135_v58 = vpop.eup %6134  ;;  %v1874_v63 = vrot.slane %v6133_v45, %v6753_v61  ;;  %v1899_v29 = vmul.f32 %v8197_v5, %v6133_v45  ;;  %v1910_v45 = vrot.slane %v1909_v13, 4  ;;  %v1924_v59 = vrot.slane %v1923_v26, 4 }
 0xc6f   :  { %v1882_v50 = vrot.slane %v6135_v58, %v6753_v61  ;;  %v1901_v47 = vmul.f32 %v8199_v21, %v6135_v58  ;;  %v1944_v9 = vsel %vm158_vm1, %v1900_v7, 0.0  ;;  %v1917_v43 = vrot.slane %v1916_v27, 4 }
 0xc70   :  { %v1887_v20 = vsel %vm653_vm6, %v1874_v63, %v1886_v62  ;;  %v1937_v42 = vsel %vm158_vm1, %v1899_v29, 0.0  ;;  %v1931_v58 = vrot.slane %v1930_v28, 4  ;;  %v1945_v63 = vrot.slane %v1944_v9, 4 }
 0xc71   :  { %v1888_v23 = vsel %vm655_vm7, %v1878_v49, %v1887_v20  ;;  %v1951_v33 = vsel %vm158_vm1, %v1901_v47, 0.0  ;;  %v1938_v19 = vrot.slane %v1937_v42, 4  ;;  %v1904_v2 = vadd.f32 %v1903_v15, %v1902_v53 }
 0xc72   :  { %v1889_v30 = vsel %vm657_vm8, %v1882_v50, %v1888_v23  ;;  %v1952_v49 = vrot.slane %v1951_v33, 4  ;;  %v1911_v62 = vadd.f32 %v1910_v45, %v1909_v13  ;;  %v1925_v50 = vadd.f32 %v1924_v59, %v1923_v26 }
 0xc73   :  { %v1891_v0 = vsel %vm660_vm9, %v1889_v30, 0.0  ;;  %v1918_v20 = vadd.f32 %v1917_v43, %v1916_v27  ;;  %v1939_v23 = vadd.f32 %v1938_v19, %v1937_v42  ;;  %v1932_v30 = vadd.f32 %v1931_v58, %v1930_v28 }
 0xc74   :  { %1892 = vadd.xlane.f32.xlu0 %v1891_v0  ;;  %v1946_v0 = vadd.f32 %v1945_v63, %v1944_v9  ;;  %v1953_v16 = vadd.f32 %v1952_v49, %v1951_v33  ;;  %v1905_v25 = vrot.slane %v1904_v2, 2  ;;  %v1912_v37 = vrot.slane %v1911_v62, 2 }
 0xc75   :  { %v1926_v8 = vrot.slane %v1925_v50, 2  ;;  %v1919_v32 = vrot.slane %v1918_v20, 2  ;;  %v1940_v6 = vrot.slane %v1939_v23, 2  ;;  %v1933_v5 = vrot.slane %v1932_v30, 2 }
 0xc76   :  { %v1947_v29 = vrot.slane %v1946_v0, 2  ;;  %v1954_v60 = vrot.slane %v1953_v16, 2  ;;  %v1906_v21 = vadd.f32 %v1905_v25, %v1904_v2  ;;  %v1913_v47 = vadd.f32 %v1912_v37, %v1911_v62 }
 0xc77   :  { %v1927_v18 = vadd.f32 %v1926_v8, %v1925_v50  ;;  %v1920_v7 = vadd.f32 %v1919_v32, %v1918_v20  ;;  %v1934_v53 = vadd.f32 %v1933_v5, %v1932_v30  ;;  %v1941_v13 = vadd.f32 %v1940_v6, %v1939_v23 }
 0xc78   :  { %v1948_v26 = vadd.f32 %v1947_v29, %v1946_v0  ;;  %v1955_v27 = vadd.f32 %v1954_v60, %v1953_v16  ;;  %v1907_v42 = vrot.slane %v1906_v21, 1  ;;  %v1914_v28 = vrot.slane %v1913_v47, 1 }
 0xc79   :  { %v1928_v33 = vrot.slane %v1927_v18, 1  ;;  %v1921_v9 = vrot.slane %v1920_v7, 1  ;;  %v1935_v15 = vrot.slane %v1934_v53, 1  ;;  %v1942_v45 = vrot.slane %v1941_v13, 1 }
 0xc7a   :  { %v1949_v59 = vrot.slane %v1948_v26, 1  ;;  %v1956_v43 = vrot.slane %v1955_v27, 1  ;;  %v1908_v19 = vadd.f32 %v1907_v42, %v1906_v21  ;;  %v1915_v58 = vadd.f32 %v1914_v28, %v1913_v47 }
 0xc7b   :  { %v1922_v49 = vadd.f32 %v1921_v9, %v1920_v7  ;;  %v1929_v63 = vadd.f32 %v1928_v33, %v1927_v18  ;;  %v1936_v62 = vadd.f32 %v1935_v15, %v1934_v53  ;;  %v1943_v50 = vadd.f32 %v1942_v45, %v1941_v13 }
 0xc7c   :  { %v1950_v20 = vadd.f32 %v1949_v59, %v1948_v26  ;;  %v1957_v30 = vadd.f32 %v1956_v43, %v1955_v27 }
 0xd01   :  { %v1893_v14 = vpop.xlane.xlu0 %1892 }
 0xd02   :  { %6136 = vrcp.f32 %v1893_v14 }
 0xd0c   :  { %v6137_v2 = vpop.eup %6136 }
 0xd0d   :  { %v1960_v23 = vrot.slane %v6137_v2, 1  ;;  %v1961_v0 = vrot.slane %v6137_v2, 2  ;;  %v1962_v16 = vrot.slane %v6137_v2, 3  ;;  %v1963_v25 = vrot.slane %v6137_v2, 4 }
 0xd0e   :  { %v1964_v37 = vrot.slane %v6137_v2, 5  ;;  %v1965_v8 = vrot.slane %v6137_v2, 6  ;;  %v1966_v32 = vrot.slane %v6137_v2, 7  ;;  %v1975_v6 = vmul.f32 %v6137_v2, %v1908_v19 }
 0xd0f   :  { %v1976_v5 = vmul.f32 %v1960_v23, %v1915_v58  ;;  %v1977_v29 = vmul.f32 %v1961_v0, %v1922_v49  ;;  %v1978_v60 = vmul.f32 %v1962_v16, %v1929_v63  ;;  %v1979_v14 = vmul.f32 %v1963_v25, %v1936_v62  ;;  %v8201_v16 = vld [vmem:[#allocation12_spill] sm:$0xff] }
 0xd10   :  { %v1980_v21 = vmul.f32 %v1964_v37, %v1943_v50  ;;  %v1981_v47 = vmul.f32 %v1965_v8, %v1950_v20  ;;  %v1982_v18 = vmul.f32 %v1966_v32, %v1957_v30  ;;  %v1983_v27 = vmul.f32 %v1975_v6, %v6870_v12 }
 0xd11   :  { %v1984_v7 = vmul.f32 %v1976_v5, %v6870_v12  ;;  %v1985_v53 = vmul.f32 %v1977_v29, %v6870_v12  ;;  %v1986_v13 = vmul.f32 %v1978_v60, %v6870_v12  ;;  %v1987_v26 = vmul.f32 %v1979_v14, %v6870_v12 }
 0xd12   :  { %v1988_v42 = vmul.f32 %v1980_v21, %v6870_v12  ;;  %v1989_v9 = vmul.f32 %v1981_v47, %v6870_v12  ;;  %v1990_v15 = vmul.f32 %v1982_v18, %v6870_v12 }
 0xd13   :  { %v1999_v28 = vrot.slane %v1984_v7, 7  ;;  %v2001_v33 = vrot.slane %v1985_v53, 6  ;;  %v2003_v59 = vrot.slane %v1986_v13, 5  ;;  %v2005_v19 = vrot.slane %v1987_v26, 4 }
 0xd14   :  { %v2007_v49 = vrot.slane %v1988_v42, 3  ;;  %v2009_v2 = vrot.slane %v1989_v9, 2  ;;  %v2011_v50 = vrot.slane %v1990_v15, 1 }
 0xd15   :  { %v2000_v45 = vsel %vm645_vm2, %v1999_v28, %v1983_v27 }
 0xd16   :  { %v2002_v43 = vsel %vm647_vm3, %v2001_v33, %v2000_v45 }
 0xd17   :  { %v2004_v58 = vsel %vm649_vm4, %v2003_v59, %v2002_v43 }
 0xd18   :  { %v2006_v63 = vsel %vm651_vm5, %v2005_v19, %v2004_v58 }
 0xd19   :  { %v2008_v62 = vsel %vm653_vm6, %v2007_v49, %v2006_v63 }
 0xd1a   :  { %v2010_v20 = vsel %vm655_vm7, %v2009_v2, %v2008_v62 }
 0xd1b   :  { %v2012_v30 = vsel %vm657_vm8, %v2011_v50, %v2010_v20 }
 0xd1c   :  { %v2014_v23 = vsel %vm158_vm1, %v2012_v30, 0.0 }
 0xd1d   :  { %2015 = vadd.xlane.f32.xlu1 %v2014_v23 }
 0xdaa   :  { %v2016_v0 = vpop.xlane.xlu1 %2015 }
 0xdab   :  { %v2032_v25 = vadd.f32 %v8201_v16, %v2016_v0 }
 0xdad   :  { %2035 = vperm.xlu0 %6019, %v2032_v25  }
 0xe2c   :  { %v2036_v37 = vpop.permute.xlu0 %2035 }
 0xe2d   :  { %v2038_v8 = vmul.f32 %v2036_v37, %v7040_v55 }
 0xe2f   :  { %v2109_v32 = vadd.f32 %v7250_v24, %v2038_v8 }
 0xe31   :  { %v2110_v6 = vadd.f32 %v2109_v32, %v7045_v1 }
 0xe33   :  { %6138 = vtanh.f32 %v2110_v6  ;;  %v5371_v29 = vmul.f32 -1.442695, %v2110_v6 }
 0xe35   :  { %6140 = vpow2.f32 %v5371_v29 }
 0xe3d   :  { %v6139_v5 = vpop.eup %6138 }
 0xe3e   :  { %2120 = vrot.lane.b32.xlu1 %v6139_v5, %s6461_s3 }
 0xe3f   :  { %v6141_v60 = vpop.eup %6140 }
 0xe40   :  { %v2114_v14 = vadd.f32 1.0, %v6141_v60 }
 0xe42   :  { %6142 = vrcp.f32 %v2114_v14 }
 0xe4c   :  { %v6143_v21 = vpop.eup %6142 }
 0xe4d   :  { %v2118_v7 = vmul.f32 %v6143_v21, %v7222_v38 }
 0xeb0   :  { %v2121_v47 = vpop.permute.xlu1 %2120 }
 0xeb1   :  { %v2123_v18 = vmul.f32 %v6143_v21, %v2121_v47 }
 0xeb3   :  { %2125 = vrot.lane.b32.xlu1 %v2123_v18, %s6461_s3 }
 0xf25   :  { %v2126_v53 = vpop.permute.xlu1 %2125 }
 0xf26   :  { %v7354_v24 = vadd.f32 %v2126_v53, %v2118_v7 }
 0xf28   :  { %6144 = vtanh.f32 %v7354_v24  ;;  %2136 = vrot.lane.b32.xlu1 %v7354_v24, %s6462_s15 }
 0xf32   :  { %v6145_v13 = vpop.eup %6144 }
 0xf33   :  { %2131 = vrot.lane.b32.xlu0 %v6145_v13, %s6461_s3 }
 0xf9a   :  { %v2137_v26 = vpop.permute.xlu1 %2136 }
 0xf9b   :  { %5664 = vmatmul.mubr.msk.f32.vlgmr.msra.gmra.mrb[10].mxu1 %vm158_vm1, %v2137_v26 }
 0xf9c   :  { %5918 = vmatpush3.bf16.msra.mxu1 %v6829_v54  ;;  %5685 = vmatprep.mubr.msk.f32.mxu1 %vm6457_vm0, %v8193_v3 }
 0xf9d   :  { %5919 = vmatprep.subr.bf16.mxu1 %v8194_v31 }
 0xfa0   :  { %5921 = vmatpush3.bf16.msra.mxu1 %v6832_v57 }
 0xfa1   :  { %5928 = vmatprep.subr.bf16.mxu1 %v8194_v31 }
 0xfa5   :  { %v2132_v38 = vpop.permute.xlu0 %2131 }
 0xfa6   :  { %v2134_v27 = vmul.f32 %v6143_v21, %v2132_v38 }
 0xfa8   :  { %2211 = vrot.lane.b32.xlu0 %v2134_v27, %s6463_s16 }
0x101a   :  { %v2212_v42 = vpop.permute.xlu0 %2211 }
0x101b   :  { %5675 = vmatmul.mubr.msk.f32.vlgmr.msra.gmra.mrb[16].mxu0 %vm158_vm1, %v2212_v42  ;;  %5686 = vmatmul.mubr.msk.f32.vlgmr.msra.gmra.mrb[12].mxu1 %vm158_vm1, %v2212_v42 }
0x101c   :  { %5924 = vmatpush3.bf16.msra.mxu0 %v6553_v4  ;;  %5696 = vmatprep.mubr.msk.f32.mxu0 %vm6457_vm0, %v8193_v3 }
0x101d   :  { %5925 = vmatprep.subr.bf16.mxu0 %v8194_v31  ;;  %5930 = vmatpush3.bf16.msra.mxu1 %v6590_v17 }
0x101e   :  { %5931 = vmatprep.subr.bf16.mxu1 %v8194_v31  ;;  %5707 = vmatprep.mubr.msk.f32.mxu1 %vm6457_vm0, %v8193_v3 }
0x1020   :  { %5927 = vmatpush3.bf16.msra.mxu0 %v6570_v11 }
0x1021   :  { %5934 = vmatprep.subr.bf16.mxu0 %v8194_v31  ;;  %5933 = vmatpush3.bf16.msra.mxu1 %v6612_v22 }
0x1022   :  { %5940 = vmatprep.subr.bf16.mxu1 %v8194_v31 }
0x106e   :  { %v2206_v28 = vpop.f32.mrb[10].mxu1 }
0x106f   :  { %v5665_v33 = vpop.f32.mrb[11].mxu1 }
0x10ee   :  { %v2281_v9 = vpop.f32.mrb[16].mxu0  ;;  %v7382_v15 = vpop.f32.mrb[12].mxu1 }
0x10ef   :  { %v2282_v45 = vadd.f32 %v2281_v9, %v2206_v28  ;;  %v5676_v59 = vpop.f32.mrb[17].mxu0  ;;  %v5687_v43 = vpop.f32.mrb[13].mxu1 }
0x10f1   :  { %v2285_v19 = vadd.f32 %v2282_v45, %v6680_v40 }
0x10f3   :  { %v2287_v58 = vcombine.high %v2285_v19, %v2285_v19  ;;  %v2294_v49 = vrot.slane %v2285_v19, %v6685_v44 }
0x10f5   :  { %v2301_v63 = vrot.slane %v2287_v58, %v6685_v44  ;;  %v2302_v2 = vcombine.high %v2294_v49, %v2294_v49  ;;  %v2310_v62 = vrot.slane %v2294_v49, %v6685_v44 }
0x10f7   :  { %v2303_v50 = vcombine.high %v2301_v63, %v2301_v63  ;;  %v2317_v20 = vrot.slane %v2301_v63, %v6685_v44  ;;  %v2324_v30 = vrot.slane %v2302_v2, %v6685_v44  ;;  %v2332_v23 = vcombine.high %v2310_v62, %v2310_v62 }
0x10f8   :  { %v2339_v0 = vrot.slane %v2310_v62, %v6694_v51 }
0x10f9   :  { %v2331_v16 = vrot.slane %v2303_v50, %v6685_v44  ;;  %v2333_v25 = vcombine.high %v2317_v20, %v2317_v20  ;;  %v2334_v37 = vcombine.high %v2324_v30, %v2324_v30  ;;  %v2343_v8 = vrot.slane %v2324_v30, %v6694_v51 }
0x10fa   :  { %v2347_v32 = vrot.slane %v2332_v23, %v6694_v51  ;;  %v2355_v6 = vrot.slane %v2317_v20, %v6694_v51  ;;  %v2376_v5 = vadd.f32 %v2339_v0, %v6673_v36 }
0x10fb   :  { %v2335_v29 = vcombine.high %v2331_v16, %v2331_v16  ;;  %v2351_v60 = vrot.slane %v2334_v37, %v6694_v51  ;;  %v2359_v14 = vrot.slane %v2331_v16, %v6694_v51  ;;  %v2363_v21 = vrot.slane %v2333_v25, %v6694_v51 }
0x10fc   :  { %v2377_v47 = vadd.f32 %v6670_v34, %v2343_v8  ;;  %v2378_v18 = vadd.f32 %v2347_v32, %v6682_v41  ;;  %v2380_v7 = vadd.f32 %v2355_v6, %v6690_v48  ;;  %6146 = vtanh.f32 %v2376_v5 }
0x10fd   :  { %v2367_v53 = vrot.slane %v2335_v29, %v6694_v51  ;;  %v2379_v13 = vadd.f32 %v6677_v39, %v2351_v60  ;;  %v2381_v26 = vadd.f32 %v6687_v46, %v2359_v14  ;;  %v2382_v38 = vadd.f32 %v2363_v21, %v6700_v56 }
0x10fe   :  { %6148 = vtanh.f32 %v2377_v47 }
0x10ff   :  { %6150 = vtanh.f32 %v2378_v18  ;;  %v2383_v27 = vadd.f32 %v6696_v52, %v2367_v53 }
0x1100   :  { %6152 = vtanh.f32 %v2380_v7 }
0x1101   :  { %6154 = vtanh.f32 %v2379_v13 }
0x1102   :  { %6156 = vtanh.f32 %v2381_v26 }
0x1103   :  { %6158 = vtanh.f32 %v2383_v27 }
0x1104   :  { %6160 = vtanh.f32 %v2382_v38 }
0x1106   :  { %v6147_v42 = vpop.eup %6146 }
0x1107   :  { %v2392_v28 = vmul.f32 %v6147_v42, %v6723_v35 }
0x1108   :  { %v6149_v33 = vpop.eup %6148 }
0x1109   :  { %v6151_v9 = vpop.eup %6150  ;;  %v2400_v45 = vsel %vm158_vm1, %v2392_v28, 0.0  ;;  %v2393_v59 = vmul.f32 %v6149_v33, %v6723_v35 }
0x110a   :  { %v6153_v43 = vpop.eup %6152  ;;  %2401 = vadd.xlane.f32.xlu1 %v2400_v45  ;;  %v2394_v49 = vmul.f32 %v6151_v9, %v6723_v35 }
0x110b   :  { %v6155_v19 = vpop.eup %6154  ;;  %v2403_v58 = vsel %vm158_vm1, %v2393_v59, 0.0  ;;  %v2396_v23 = vmul.f32 %v6153_v43, %v6723_v35 }
0x110c   :  { %v6157_v63 = vpop.eup %6156  ;;  %2404 = vadd.xlane.f32.xlu0 %v2403_v58  ;;  %v2395_v2 = vmul.f32 %v6155_v19, %v6723_v35  ;;  %v2406_v30 = vsel %vm158_vm1, %v2394_v49, 0.0 }
0x110d   :  { %v2397_v50 = vmul.f32 %v6157_v63, %v6723_v35  ;;  %v6159_v20 = vpop.eup %6158  ;;  %v2412_v37 = vsel %vm158_vm1, %v2396_v23, 0.0 }
0x110e   :  { %v2409_v62 = vsel %vm158_vm1, %v2395_v2, 0.0  ;;  %v6161_v0 = vpop.eup %6160  ;;  %v2399_v25 = vmul.f32 %v6159_v20, %v6723_v35 }
0x110f   :  { %2410 = vadd.xlane.f32.xlu1 %v2409_v62  ;;  %v2415_v16 = vsel %vm158_vm1, %v2397_v50, 0.0  ;;  %v2398_v8 = vmul.f32 %v6161_v0, %v6723_v35 }
0x1110   :  { %2407 = vadd.xlane.f32.xlu0 %v2406_v30  ;;  %v2421_v32 = vsel %vm158_vm1, %v2399_v25, 0.0 }
0x1111   :  { %v2418_v6 = vsel %vm158_vm1, %v2398_v8, 0.0 }
0x1113   :  { %2416 = vadd.xlane.f32.xlu1 %v2415_v16 }
0x1114   :  { %2413 = vadd.xlane.f32.xlu0 %v2412_v37 }
0x1117   :  { %2422 = vadd.xlane.f32.xlu1 %v2421_v32 }
0x1118   :  { %2419 = vadd.xlane.f32.xlu0 %v2418_v6 }
0x1197   :  { %v2402_v5 = vpop.xlane.xlu1 %2401 }
0x1198   :  { %v2424_v21 = vsub.f32 %v2402_v5, %v6741_v10 }
0x1199   :  { %v2405_v29 = vpop.xlane.xlu0 %2404 }
0x119a   :  { %v2425_v60 = vsub.f32 %v2405_v29, %v6741_v10  ;;  %v2432_v26 = vmul.f32 1.442695, %v2424_v21 }
0x119c   :  { %v2411_v14 = vpop.xlane.xlu1 %2410  ;;  %v2434_v7 = vmul.f32 1.442695, %v2425_v60 }
0x119d   :  { %v2408_v47 = vpop.xlane.xlu0 %2407  ;;  %v2427_v38 = vsub.f32 %v2411_v14, %v6741_v10 }
0x119e   :  { %v2426_v18 = vsub.f32 %v2408_v47, %v6741_v10  ;;  %6162 = vpow2.f32 %v2434_v7 }
0x119f   :  { %v2438_v45 = vmul.f32 1.442695, %v2427_v38  ;;  %v7450_v38 = vld [vmem:[%s8145_s0] sm:$0xff] }
0x11a0   :  { %v2436_v53 = vmul.f32 1.442695, %v2426_v18  ;;  %v2417_v13 = vpop.xlane.xlu1 %2416 }
0x11a1   :  { %v2414_v27 = vpop.xlane.xlu0 %2413  ;;  %v2429_v28 = vsub.f32 %v2417_v13, %v6741_v10 }
0x11a2   :  { %v2428_v42 = vsub.f32 %v2414_v27, %v6741_v10  ;;  %6164 = vpow2.f32 %v2436_v53 }
0x11a3   :  { %6166 = vpow2.f32 %v2432_v26  ;;  %v2442_v58 = vmul.f32 1.442695, %v2429_v28 }
0x11a4   :  { %v2440_v33 = vmul.f32 1.442695, %v2428_v42  ;;  %v2423_v9 = vpop.xlane.xlu1 %2422  ;;  %v7456_v42 = vld [vmem:[%s8145_s0 + $0x8] sm:$0xff] }
0x11a5   :  { %v2431_v59 = vsub.f32 %v2423_v9, %v6741_v10  ;;  %v2420_v43 = vpop.xlane.xlu0 %2419  ;;  %8202 = vst [vmem:[#allocation20_spill] sm:$0xff] %v7456_v42 }
0x11a6   :  { %v2430_v19 = vsub.f32 %v2420_v43, %v6741_v10  ;;  %6168 = vpow2.f32 %v2440_v33  ;;  %v7462_v33 = vld [vmem:[%s8145_s0 + $0x18] sm:$0xff]  ;;  %v7474_v43 = vld [vmem:[%s8145_s0 + $0x28] sm:$0xff] }
0x11a7   :  { %6170 = vpow2.f32 %v2438_v45  ;;  %v2446_v63 = vmul.f32 1.442695, %v2431_v59  ;;  %8203 = vst [vmem:[#allocation18_spill] sm:$0xff] %v7462_v33  ;;  %v7468_v45 = vld [vmem:[%s8145_s0 + $0x10] sm:$0xff]  ;;  %8205 = vst [vmem:[#allocation19_spill] sm:$0xff] %v7474_v43 }
0x11a8   :  { %v2444_v49 = vmul.f32 1.442695, %v2430_v19  ;;  %v6163_v2 = vpop.eup %6162  ;;  %8204 = vst [vmem:[#allocation22_spill] sm:$0xff] %v7468_v45 }
0x11a9   :  { %v2463_v20 = vrot.slane %v6163_v2, %v6753_v61  ;;  %v2500_v28 = vmul.f32 %v7456_v42, %v6163_v2 }
0x11aa   :  { %6172 = vpow2.f32 %v2444_v49 }
0x11ab   :  { %6174 = vpow2.f32 %v2442_v58  ;;  %v7480_v58 = vld [vmem:[%s8145_s0 + $0x20] sm:$0xff] }
0x11ac   :  { %6176 = vpow2.f32 %v2446_v63  ;;  %v6165_v62 = vpop.eup %6164  ;;  %8206 = vst [vmem:[#allocation23_spill] sm:$0xff] %v7480_v58  ;;  %v7486_v63 = vld [vmem:[%s8145_s0 + $0x38] sm:$0xff] }
0x11ad   :  { %v6167_v50 = vpop.eup %6166  ;;  %v2467_v30 = vrot.slane %v6165_v62, %v6753_v61  ;;  %v2501_v59 = vmul.f32 %v7468_v45, %v6165_v62  ;;  %8207 = vst [vmem:[#allocation21_spill] sm:$0xff] %v7486_v63  ;;  %v7492_v62 = vld [vmem:[%s8145_s0 + $0x30] sm:$0xff] }
0x11ae   :  { %v2459_v0 = vrot.slane %v6167_v50, %v6753_v61  ;;  %v2499_v27 = vmul.f32 %v7450_v38, %v6167_v50  ;;  %8208 = vst [vmem:[#allocation12_spill] sm:$0xff] %v7492_v62 }
0x11b0   :  { %v6169_v23 = vpop.eup %6168  ;;  %v2488_v37 = vsel %vm645_vm2, %v2463_v20, %v2459_v0  ;;  %v2507_v20 = vsel %vm158_vm1, %v2499_v27, 0.0  ;;  %v2521_v0 = vsel %vm158_vm1, %v2501_v59, 0.0 }
0x11b1   :  { %v6171_v16 = vpop.eup %6170  ;;  %v2475_v32 = vrot.slane %v6169_v23, %v6753_v61  ;;  %v2489_v6 = vsel %vm647_vm3, %v2467_v30, %v2488_v37  ;;  %v2503_v49 = vmul.f32 %v7480_v58, %v6169_v23  ;;  %v2514_v30 = vsel %vm158_vm1, %v2500_v28, 0.0 }
0x11b2   :  { %v2471_v5 = vrot.slane %v6171_v16, %v6753_v61  ;;  %v2502_v9 = vmul.f32 %v7462_v33, %v6171_v16 }
0x11b3   :  { %v2535_v37 = vsel %vm158_vm1, %v2503_v49, 0.0 }
0x11b4   :  { %v6173_v25 = vpop.eup %6172  ;;  %v2490_v21 = vsel %vm649_vm4, %v2471_v5, %v2489_v6  ;;  %v2528_v23 = vsel %vm158_vm1, %v2502_v9, 0.0  ;;  %v2508_v6 = vrot.slane %v2507_v20, 4  ;;  %v2515_v5 = vrot.slane %v2514_v30, 4 }
0x11b5   :  { %v6175_v8 = vpop.eup %6174  ;;  %v2483_v60 = vrot.slane %v6173_v25, %v6753_v61  ;;  %v2491_v47 = vsel %vm651_vm5, %v2475_v32, %v2490_v21  ;;  %v2505_v50 = vmul.f32 %v7492_v62, %v6173_v25  ;;  %v2522_v25 = vrot.slane %v2521_v0, 4 }
0x11b6   :  { %v6177_v29 = vpop.eup %6176  ;;  %v2479_v14 = vrot.slane %v6175_v8, %v6753_v61  ;;  %v2504_v19 = vmul.f32 %v7474_v43, %v6175_v8 }
0x11b7   :  { %v2487_v18 = vrot.slane %v6177_v29, %v6753_v61  ;;  %v2506_v2 = vmul.f32 %v7486_v63, %v6177_v29  ;;  %v2549_v32 = vsel %vm158_vm1, %v2505_v50, 0.0  ;;  %v2529_v29 = vrot.slane %v2528_v23, 4 }
0x11b8   :  { %v2492_v7 = vsel %vm653_vm6, %v2479_v14, %v2491_v47  ;;  %v2542_v16 = vsel %vm158_vm1, %v2504_v19, 0.0  ;;  %v2536_v14 = vrot.slane %v2535_v37, 4  ;;  %v2550_v47 = vrot.slane %v2549_v32, 4 }
0x11b9   :  { %v2493_v53 = vsel %vm655_vm7, %v2483_v60, %v2492_v7  ;;  %v2556_v8 = vsel %vm158_vm1, %v2506_v2, 0.0  ;;  %v2543_v60 = vrot.slane %v2542_v16, 4  ;;  %v2516_v7 = vadd.f32 %v2515_v5, %v2514_v30 }
0x11ba   :  { %v2494_v13 = vsel %vm657_vm8, %v2487_v18, %v2493_v53  ;;  %v2557_v21 = vrot.slane %v2556_v8, 4  ;;  %v2509_v18 = vadd.f32 %v2508_v6, %v2507_v20  ;;  %v2530_v53 = vadd.f32 %v2529_v29, %v2528_v23 }
0x11bb   :  { %v2496_v26 = vsel %vm660_vm9, %v2494_v13, 0.0  ;;  %v2523_v13 = vadd.f32 %v2522_v25, %v2521_v0  ;;  %v2537_v27 = vadd.f32 %v2536_v14, %v2535_v37  ;;  %v2551_v28 = vadd.f32 %v2550_v47, %v2549_v32 }
0x11bc   :  { %2497 = vadd.xlane.f32.xlu0 %v2496_v26  ;;  %v2544_v26 = vadd.f32 %v2543_v60, %v2542_v16  ;;  %v2558_v9 = vadd.f32 %v2557_v21, %v2556_v8  ;;  %v2510_v59 = vrot.slane %v2509_v18, 2  ;;  %v2517_v19 = vrot.slane %v2516_v7, 2 }
0x11bd   :  { %v2531_v49 = vrot.slane %v2530_v53, 2  ;;  %v2524_v2 = vrot.slane %v2523_v13, 2  ;;  %v2538_v62 = vrot.slane %v2537_v27, 2  ;;  %v2552_v63 = vrot.slane %v2551_v28, 2 }
0x11be   :  { %v2545_v50 = vrot.slane %v2544_v26, 2  ;;  %v2559_v58 = vrot.slane %v2558_v9, 2  ;;  %v2511_v45 = vadd.f32 %v2510_v59, %v2509_v18  ;;  %v2518_v33 = vadd.f32 %v2517_v19, %v2516_v7 }
0x11bf   :  { %v2532_v20 = vadd.f32 %v2531_v49, %v2530_v53  ;;  %v2525_v30 = vadd.f32 %v2524_v2, %v2523_v13  ;;  %v2539_v23 = vadd.f32 %v2538_v62, %v2537_v27  ;;  %v2553_v16 = vadd.f32 %v2552_v63, %v2551_v28 }
0x11c0   :  { %v2546_v0 = vadd.f32 %v2545_v50, %v2544_v26  ;;  %v2560_v37 = vadd.f32 %v2559_v58, %v2558_v9  ;;  %v2512_v32 = vrot.slane %v2511_v45, 1  ;;  %v2519_v8 = vrot.slane %v2518_v33, 1 }
0x11c1   :  { %v2533_v6 = vrot.slane %v2532_v20, 1  ;;  %v2526_v5 = vrot.slane %v2525_v30, 1  ;;  %v2540_v29 = vrot.slane %v2539_v23, 1  ;;  %v2554_v60 = vrot.slane %v2553_v16, 1 }
0x11c2   :  { %v2547_v25 = vrot.slane %v2546_v0, 1  ;;  %v2561_v14 = vrot.slane %v2560_v37, 1  ;;  %v2513_v21 = vadd.f32 %v2512_v32, %v2511_v45  ;;  %v2520_v47 = vadd.f32 %v2519_v8, %v2518_v33 }
0x11c3   :  { %v2527_v42 = vadd.f32 %v2526_v5, %v2525_v30  ;;  %v2541_v7 = vadd.f32 %v2540_v29, %v2539_v23  ;;  %v2555_v13 = vadd.f32 %v2554_v60, %v2553_v16 }
0x11c4   :  { %v2548_v53 = vadd.f32 %v2547_v25, %v2546_v0  ;;  %v2562_v62 = vadd.f32 %v2561_v14, %v2560_v37 }
0x1249   :  { %v2498_v43 = vpop.xlane.xlu0 %2497 }
0x124a   :  { %6178 = vrcp.f32 %v2498_v43  ;;  %v2534_v43 = vadd.f32 %v2533_v6, %v2532_v20 }
0x1254   :  { %v6179_v18 = vpop.eup %6178 }
0x1255   :  { %v2565_v26 = vrot.slane %v6179_v18, 1  ;;  %v2566_v63 = vrot.slane %v6179_v18, 2  ;;  %v2567_v58 = vrot.slane %v6179_v18, 3  ;;  %v2568_v27 = vrot.slane %v6179_v18, 4 }
0x1256   :  { %v2569_v28 = vrot.slane %v6179_v18, 5  ;;  %v2570_v9 = vrot.slane %v6179_v18, 6  ;;  %v2571_v59 = vrot.slane %v6179_v18, 7  ;;  %v2580_v19 = vmul.f32 %v6179_v18, %v2513_v21 }
0x1257   :  { %v2581_v49 = vmul.f32 %v2565_v26, %v2520_v47  ;;  %v2582_v2 = vmul.f32 %v2566_v63, %v2527_v42  ;;  %v2583_v50 = vmul.f32 %v2567_v58, %v2534_v43  ;;  %v2584_v45 = vmul.f32 %v2568_v27, %v2541_v7  ;;  %v8209_v27 = vld [vmem:[#allocation13_spill] sm:$0xff] }
0x1258   :  { %v2585_v33 = vmul.f32 %v2569_v28, %v2548_v53  ;;  %v2586_v30 = vmul.f32 %v2570_v9, %v2555_v13  ;;  %v2587_v20 = vmul.f32 %v2571_v59, %v2562_v62  ;;  %v2588_v32 = vmul.f32 %v2580_v19, %v6870_v12 }
0x1259   :  { %v2589_v23 = vmul.f32 %v2581_v49, %v6870_v12  ;;  %v2590_v0 = vmul.f32 %v2582_v2, %v6870_v12  ;;  %v2591_v16 = vmul.f32 %v2583_v50, %v6870_v12  ;;  %v2592_v37 = vmul.f32 %v2584_v45, %v6870_v12 }
0x125a   :  { %v2593_v8 = vmul.f32 %v2585_v33, %v6870_v12  ;;  %v2594_v42 = vmul.f32 %v2586_v30, %v6870_v12  ;;  %v2595_v29 = vmul.f32 %v2587_v20, %v6870_v12 }
0x125b   :  { %v2604_v6 = vrot.slane %v2589_v23, 7  ;;  %v2606_v5 = vrot.slane %v2590_v0, 6  ;;  %v2608_v60 = vrot.slane %v2591_v16, 5  ;;  %v2610_v21 = vrot.slane %v2592_v37, 4 }
0x125c   :  { %v2612_v43 = vrot.slane %v2593_v8, 3  ;;  %v2614_v7 = vrot.slane %v2594_v42, 2  ;;  %v2616_v13 = vrot.slane %v2595_v29, 1 }
0x125d   :  { %v2605_v25 = vsel %vm645_vm2, %v2604_v6, %v2588_v32 }
0x125e   :  { %v2607_v14 = vsel %vm647_vm3, %v2606_v5, %v2605_v25 }
0x125f   :  { %v2609_v47 = vsel %vm649_vm4, %v2608_v60, %v2607_v14 }
0x1260   :  { %v2611_v18 = vsel %vm651_vm5, %v2610_v21, %v2609_v47 }
0x1261   :  { %v2613_v53 = vsel %vm653_vm6, %v2612_v43, %v2611_v18 }
0x1262   :  { %v2615_v62 = vsel %vm655_vm7, %v2614_v7, %v2613_v53 }
0x1263   :  { %v2617_v26 = vsel %vm657_vm8, %v2616_v13, %v2615_v62 }
0x1264   :  { %v2619_v63 = vsel %vm158_vm1, %v2617_v26, 0.0 }
0x1265   :  { %2620 = vadd.xlane.f32.xlu1 %v2619_v63 }
0x12f2   :  { %v2621_v58 = vpop.xlane.xlu1 %2620 }
0x12f3   :  { %v2637_v28 = vadd.f32 %v8209_v27, %v2621_v58 }
0x12f5   :  { %2640 = vperm.xlu0 %6019, %v2637_v28  }
0x1374   :  { %v2641_v9 = vpop.permute.xlu0 %2640 }
0x1375   :  { %v2643_v59 = vmul.f32 %v2641_v9, %v7040_v55 }
0x1377   :  { %v2714_v19 = vadd.f32 %v7382_v15, %v2643_v59 }
0x1379   :  { %v2715_v49 = vadd.f32 %v2714_v19, %v7045_v1 }
0x137b   :  { %6180 = vtanh.f32 %v2715_v49  ;;  %v5375_v50 = vmul.f32 -1.442695, %v2715_v49 }
0x137d   :  { %6182 = vpow2.f32 %v5375_v50 }
0x1385   :  { %v6181_v2 = vpop.eup %6180 }
0x1386   :  { %2725 = vrot.lane.b32.xlu1 %v6181_v2, %s6461_s3 }
0x1387   :  { %v6183_v45 = vpop.eup %6182 }
0x1388   :  { %v2719_v33 = vadd.f32 1.0, %v6183_v45 }
0x138a   :  { %6184 = vrcp.f32 %v2719_v33 }
0x1394   :  { %v6185_v30 = vpop.eup %6184 }
0x1395   :  { %v2723_v0 = vmul.f32 %v6185_v30, %v7354_v24 }
0x13f8   :  { %v2726_v20 = vpop.permute.xlu1 %2725 }
0x13f9   :  { %v2728_v23 = vmul.f32 %v6185_v30, %v2726_v20 }
0x13fb   :  { %2730 = vrot.lane.b32.xlu1 %v2728_v23, %s6461_s3 }
0x146d   :  { %v2731_v16 = vpop.permute.xlu1 %2730 }
0x146e   :  { %v7526_v15 = vadd.f32 %v2731_v16, %v2723_v0 }
0x1470   :  { %6186 = vtanh.f32 %v7526_v15  ;;  %2741 = vrot.lane.b32.xlu1 %v7526_v15, %s6462_s15 }
0x147a   :  { %v6187_v37 = vpop.eup %6186 }
0x147b   :  { %2736 = vrot.lane.b32.xlu0 %v6187_v37, %s6461_s3 }
0x14e2   :  { %v2742_v32 = vpop.permute.xlu1 %2741 }
0x14e3   :  { %5697 = vmatmul.mubr.msk.f32.vlgmr.msra.gmra.mrb[18].mxu0 %vm158_vm1, %v2742_v32 }
0x14e4   :  { %5936 = vmatpush3.bf16.msra.mxu0 %v6829_v54  ;;  %5718 = vmatprep.mubr.msk.f32.mxu0 %vm6457_vm0, %v8193_v3 }
0x14e5   :  { %5937 = vmatprep.subr.bf16.mxu0 %v8194_v31 }
0x14e8   :  { %5939 = vmatpush3.bf16.msra.mxu0 %v6832_v57 }
0x14e9   :  { %5946 = vmatprep.subr.bf16.mxu0 %v8194_v31 }
0x14ed   :  { %v2737_v24 = vpop.permute.xlu0 %2736 }
0x14ee   :  { %v2739_v8 = vmul.f32 %v6185_v30, %v2737_v24 }
0x14f0   :  { %2816 = vrot.lane.b32.xlu0 %v2739_v8, %s6463_s16 }
0x1562   :  { %v2817_v6 = vpop.permute.xlu0 %2816 }
0x1563   :  { %5708 = vmatmul.mubr.msk.f32.vlgmr.msra.gmra.mrb[14].mxu1 %vm158_vm1, %v2817_v6  ;;  %5719 = vmatmul.mubr.msk.f32.vlgmr.msra.gmra.mrb[20].mxu0 %vm158_vm1, %v2817_v6 }
0x1564   :  { %5942 = vmatpush3.bf16.msra.mxu1 %v6553_v4  ;;  %5729 = vmatprep.mubr.msk.f32.mxu1 %vm6457_vm0, %v8193_v3 }
0x1565   :  { %5943 = vmatprep.subr.bf16.mxu1 %v8194_v31  ;;  %5948 = vmatpush3.bf16.msra.mxu0 %v6590_v17 }
0x1566   :  { %5949 = vmatprep.subr.bf16.mxu0 %v8194_v31  ;;  %5740 = vmatprep.mubr.msk.f32.mxu0 %vm6457_vm0, %v8193_v3 }
0x1568   :  { %5945 = vmatpush3.bf16.msra.mxu1 %v6570_v11 }
0x1569   :  { %5952 = vmatprep.subr.bf16.mxu1 %v8194_v31  ;;  %5951 = vmatpush3.bf16.msra.mxu0 %v6612_v22 }
0x156a   :  { %5958 = vmatprep.subr.bf16.mxu0 %v8194_v31 }
0x15b6   :  { %v2811_v5 = vpop.f32.mrb[18].mxu0 }
0x15b7   :  { %v5698_v42 = vpop.f32.mrb[19].mxu0 }
0x1636   :  { %v2886_v29 = vpop.f32.mrb[14].mxu1  ;;  %v7554_v25 = vpop.f32.mrb[20].mxu0 }
0x1637   :  { %v2887_v60 = vadd.f32 %v2886_v29, %v2811_v5  ;;  %v5709_v14 = vpop.f32.mrb[15].mxu1  ;;  %v5720_v21 = vpop.f32.mrb[21].mxu0 }
0x1639   :  { %v2890_v47 = vadd.f32 %v2887_v60, %v6680_v40 }
0x163b   :  { %v2892_v43 = vcombine.high %v2890_v47, %v2890_v47  ;;  %v2899_v18 = vrot.slane %v2890_v47, %v6685_v44 }
0x163d   :  { %v2906_v7 = vrot.slane %v2892_v43, %v6685_v44  ;;  %v2907_v53 = vcombine.high %v2899_v18, %v2899_v18  ;;  %v2915_v13 = vrot.slane %v2899_v18, %v6685_v44 }
0x163f   :  { %v2908_v62 = vcombine.high %v2906_v7, %v2906_v7  ;;  %v2922_v26 = vrot.slane %v2906_v7, %v6685_v44  ;;  %v2929_v63 = vrot.slane %v2907_v53, %v6685_v44  ;;  %v2937_v58 = vcombine.high %v2915_v13, %v2915_v13 }
0x1640   :  { %v2944_v27 = vrot.slane %v2915_v13, %v6694_v51 }
0x1641   :  { %v2936_v28 = vrot.slane %v2908_v62, %v6685_v44  ;;  %v2938_v9 = vcombine.high %v2922_v26, %v2922_v26  ;;  %v2939_v59 = vcombine.high %v2929_v63, %v2929_v63  ;;  %v2948_v19 = vrot.slane %v2929_v63, %v6694_v51 }
0x1642   :  { %v2952_v49 = vrot.slane %v2937_v58, %v6694_v51  ;;  %v2960_v2 = vrot.slane %v2922_v26, %v6694_v51  ;;  %v2981_v50 = vadd.f32 %v2944_v27, %v6673_v36 }
0x1643   :  { %v2940_v45 = vcombine.high %v2936_v28, %v2936_v28  ;;  %v2956_v33 = vrot.slane %v2939_v59, %v6694_v51  ;;  %v2964_v30 = vrot.slane %v2936_v28, %v6694_v51  ;;  %v2968_v20 = vrot.slane %v2938_v9, %v6694_v51 }
0x1644   :  { %v2982_v23 = vadd.f32 %v6670_v34, %v2948_v19  ;;  %v2983_v0 = vadd.f32 %v2952_v49, %v6682_v41  ;;  %v2985_v16 = vadd.f32 %v2960_v2, %v6690_v48  ;;  %6188 = vtanh.f32 %v2981_v50 }
0x1645   :  { %v2972_v37 = vrot.slane %v2940_v45, %v6694_v51  ;;  %v2984_v32 = vadd.f32 %v6677_v39, %v2956_v33  ;;  %v2986_v24 = vadd.f32 %v6687_v46, %v2964_v30  ;;  %v2987_v8 = vadd.f32 %v2968_v20, %v6700_v56 }
0x1646   :  { %6190 = vtanh.f32 %v2982_v23 }
0x1647   :  { %6192 = vtanh.f32 %v2983_v0  ;;  %v2988_v6 = vadd.f32 %v6696_v52, %v2972_v37 }
0x1648   :  { %6194 = vtanh.f32 %v2985_v16 }
0x1649   :  { %6196 = vtanh.f32 %v2984_v32 }
0x164a   :  { %6198 = vtanh.f32 %v2986_v24 }
0x164b   :  { %6200 = vtanh.f32 %v2988_v6 }
0x164c   :  { %6202 = vtanh.f32 %v2987_v8 }
0x164e   :  { %v6189_v5 = vpop.eup %6188 }
0x164f   :  { %v2997_v42 = vmul.f32 %v6189_v5, %v6723_v35 }
0x1650   :  { %v6191_v29 = vpop.eup %6190 }
0x1651   :  { %v6193_v60 = vpop.eup %6192  ;;  %v3005_v14 = vsel %vm158_vm1, %v2997_v42, 0.0  ;;  %v2998_v21 = vmul.f32 %v6191_v29, %v6723_v35 }
0x1652   :  { %v6195_v47 = vpop.eup %6194  ;;  %3006 = vadd.xlane.f32.xlu1 %v3005_v14  ;;  %v2999_v7 = vmul.f32 %v6193_v60, %v6723_v35 }
0x1653   :  { %v6197_v43 = vpop.eup %6196  ;;  %v3008_v18 = vsel %vm158_vm1, %v2998_v21, 0.0  ;;  %v3001_v27 = vmul.f32 %v6195_v47, %v6723_v35 }
0x1654   :  { %v6199_v53 = vpop.eup %6198  ;;  %3009 = vadd.xlane.f32.xlu0 %v3008_v18  ;;  %v3000_v13 = vmul.f32 %v6197_v43, %v6723_v35  ;;  %v3011_v58 = vsel %vm158_vm1, %v2999_v7, 0.0 }
0x1655   :  { %v3002_v26 = vmul.f32 %v6199_v53, %v6723_v35  ;;  %v6201_v63 = vpop.eup %6200  ;;  %v3017_v19 = vsel %vm158_vm1, %v3001_v27, 0.0 }
0x1656   :  { %v3014_v62 = vsel %vm158_vm1, %v3000_v13, 0.0  ;;  %v6203_v28 = vpop.eup %6202  ;;  %v3004_v59 = vmul.f32 %v6201_v63, %v6723_v35 }
0x1657   :  { %3015 = vadd.xlane.f32.xlu1 %v3014_v62  ;;  %v3020_v9 = vsel %vm158_vm1, %v3002_v26, 0.0  ;;  %v3003_v49 = vmul.f32 %v6203_v28, %v6723_v35 }
0x1658   :  { %3012 = vadd.xlane.f32.xlu0 %v3011_v58  ;;  %v3026_v2 = vsel %vm158_vm1, %v3004_v59, 0.0 }
0x1659   :  { %v3023_v50 = vsel %vm158_vm1, %v3003_v49, 0.0 }
0x165b   :  { %3021 = vadd.xlane.f32.xlu1 %v3020_v9 }
0x165c   :  { %3018 = vadd.xlane.f32.xlu0 %v3017_v19 }
0x165f   :  { %3027 = vadd.xlane.f32.xlu1 %v3026_v2 }
0x1660   :  { %3024 = vadd.xlane.f32.xlu0 %v3023_v50 }
0x16df   :  { %v3007_v45 = vpop.xlane.xlu1 %3006 }
0x16e0   :  { %v3029_v23 = vsub.f32 %v3007_v45, %v6741_v10 }
0x16e1   :  { %v3010_v33 = vpop.xlane.xlu0 %3009 }
0x16e2   :  { %v3030_v30 = vsub.f32 %v3010_v33, %v6741_v10  ;;  %v3037_v8 = vmul.f32 1.442695, %v3029_v23 }
0x16e4   :  { %v3016_v20 = vpop.xlane.xlu1 %3015  ;;  %v3039_v37 = vmul.f32 1.442695, %v3030_v30 }
0x16e5   :  { %v3013_v0 = vpop.xlane.xlu0 %3012  ;;  %v3032_v6 = vsub.f32 %v3016_v20, %v6741_v10 }
0x16e6   :  { %v3031_v16 = vsub.f32 %v3013_v0, %v6741_v10  ;;  %6204 = vpow2.f32 %v3039_v37 }
0x16e7   :  { %v3043_v21 = vmul.f32 1.442695, %v3032_v6 }
0x16e8   :  { %v3041_v32 = vmul.f32 1.442695, %v3031_v16  ;;  %v3022_v24 = vpop.xlane.xlu1 %3021 }
0x16e9   :  { %v3019_v5 = vpop.xlane.xlu0 %3018  ;;  %v3034_v29 = vsub.f32 %v3022_v24, %v6741_v10 }
0x16ea   :  { %v3033_v42 = vsub.f32 %v3019_v5, %v6741_v10  ;;  %6206 = vpow2.f32 %v3041_v32 }
0x16eb   :  { %6208 = vpow2.f32 %v3037_v8  ;;  %v3047_v7 = vmul.f32 1.442695, %v3034_v29 }
0x16ec   :  { %v3045_v60 = vmul.f32 1.442695, %v3033_v42  ;;  %v3028_v14 = vpop.xlane.xlu1 %3027  ;;  %v8210_v42 = vld [vmem:[#allocation20_spill] sm:$0xff] }
0x16ed   :  { %v3036_v47 = vsub.f32 %v3028_v14, %v6741_v10  ;;  %v3025_v43 = vpop.xlane.xlu0 %3024 }
0x16ee   :  { %v3035_v18 = vsub.f32 %v3025_v43, %v6741_v10  ;;  %6210 = vpow2.f32 %v3045_v60  ;;  %v8211_v60 = vld [vmem:[#allocation18_spill] sm:$0xff]  ;;  %v8213_v43 = vld [vmem:[#allocation19_spill] sm:$0xff] }
0x16ef   :  { %6212 = vpow2.f32 %v3043_v21  ;;  %v3051_v13 = vmul.f32 1.442695, %v3036_v47  ;;  %v8212_v21 = vld [vmem:[#allocation22_spill] sm:$0xff] }
0x16f0   :  { %v3049_v53 = vmul.f32 1.442695, %v3035_v18  ;;  %v6205_v62 = vpop.eup %6204 }
0x16f1   :  { %v3068_v58 = vrot.slane %v6205_v62, %v6753_v61  ;;  %v3105_v29 = vmul.f32 %v8210_v42, %v6205_v62 }
0x16f2   :  { %6214 = vpow2.f32 %v3049_v53 }
0x16f3   :  { %6216 = vpow2.f32 %v3047_v7  ;;  %v8214_v7 = vld [vmem:[#allocation23_spill] sm:$0xff] }
0x16f4   :  { %6218 = vpow2.f32 %v3051_v13  ;;  %v6207_v26 = vpop.eup %6206  ;;  %v8215_v13 = vld [vmem:[#allocation21_spill] sm:$0xff] }
0x16f5   :  { %v6209_v63 = vpop.eup %6208  ;;  %v3072_v27 = vrot.slane %v6207_v26, %v6753_v61  ;;  %v3106_v47 = vmul.f32 %v8212_v21, %v6207_v26 }
0x16f6   :  { %v3064_v9 = vrot.slane %v6209_v63, %v6753_v61  ;;  %v3104_v5 = vmul.f32 %v7450_v38, %v6209_v63 }
0x16f7   :  { %v3126_v62 = vsel %vm158_vm1, %v3106_v47, 0.0 }
0x16f8   :  { %v6211_v28 = vpop.eup %6210  ;;  %v3093_v49 = vsel %vm645_vm2, %v3068_v58, %v3064_v9 }
0x16f9   :  { %v6213_v59 = vpop.eup %6212  ;;  %v3080_v50 = vrot.slane %v6211_v28, %v6753_v61  ;;  %v3094_v45 = vsel %vm647_vm3, %v3072_v27, %v3093_v49  ;;  %v3108_v53 = vmul.f32 %v8214_v7, %v6211_v28  ;;  %v8216_v27 = vld [vmem:[#allocation12_spill] sm:$0xff]  ;;  %v3112_v49 = vsel %vm158_vm1, %v3104_v5, 0.0 }
0x16fa   :  { %v3076_v33 = vrot.slane %v6213_v59, %v6753_v61  ;;  %v3107_v14 = vmul.f32 %v8211_v60, %v6213_v59 }
0x16fb   :  { %v3140_v26 = vsel %vm158_vm1, %v3108_v53, 0.0 }
0x16fc   :  { %v6215_v19 = vpop.eup %6214  ;;  %v3095_v0 = vsel %vm649_vm4, %v3076_v33, %v3094_v45  ;;  %v3133_v38 = vsel %vm158_vm1, %v3107_v14, 0.0 }
0x16fd   :  { %v6217_v2 = vpop.eup %6216  ;;  %v3088_v20 = vrot.slane %v6215_v19, %v6753_v61  ;;  %v3096_v16 = vsel %vm651_vm5, %v3080_v50, %v3095_v0  ;;  %v3110_v9 = vmul.f32 %v8216_v27, %v6215_v19  ;;  %v3119_v50 = vsel %vm158_vm1, %v3105_v29, 0.0 }
0x16fe   :  { %v6219_v30 = vpop.eup %6218  ;;  %v3084_v23 = vrot.slane %v6217_v2, %v6753_v61  ;;  %v3109_v18 = vmul.f32 %v8213_v43, %v6217_v2  ;;  %v3113_v2 = vrot.slane %v3112_v49, 4  ;;  %v3120_v45 = vrot.slane %v3119_v50, 4 }
0x16ff   :  { %v3092_v37 = vrot.slane %v6219_v30, %v6753_v61  ;;  %v3111_v58 = vmul.f32 %v8215_v13, %v6219_v30  ;;  %v3154_v28 = vsel %vm158_vm1, %v3110_v9, 0.0  ;;  %v3134_v33 = vrot.slane %v3133_v38, 4 }
0x1700   :  { %v3097_v32 = vsel %vm653_vm6, %v3084_v23, %v3096_v16  ;;  %v3147_v63 = vsel %vm158_vm1, %v3109_v18, 0.0  ;;  %v3127_v19 = vrot.slane %v3126_v62, 4  ;;  %v3155_v0 = vrot.slane %v3154_v28, 4 }
0x1701   :  { %v3098_v24 = vsel %vm655_vm7, %v3088_v20, %v3097_v32  ;;  %v3161_v59 = vsel %vm158_vm1, %v3111_v58, 0.0  ;;  %v3148_v30 = vrot.slane %v3147_v63, 4  ;;  %v3141_v20 = vrot.slane %v3140_v26, 4 }
0x1702   :  { %v3099_v8 = vsel %vm657_vm8, %v3092_v37, %v3098_v24  ;;  %v3162_v23 = vrot.slane %v3161_v59, 4  ;;  %v3114_v16 = vadd.f32 %v3113_v2, %v3112_v49  ;;  %v3121_v37 = vadd.f32 %v3120_v45, %v3119_v50 }
0x1703   :  { %v3101_v6 = vsel %vm660_vm9, %v3099_v8, 0.0  ;;  %v3135_v32 = vadd.f32 %v3134_v33, %v3133_v38  ;;  %v3128_v24 = vadd.f32 %v3127_v19, %v3126_v62  ;;  %v3149_v8 = vadd.f32 %v3148_v30, %v3147_v63 }
0x1704   :  { %3102 = vadd.xlane.f32.xlu0 %v3101_v6  ;;  %v3142_v6 = vadd.f32 %v3141_v20, %v3140_v26  ;;  %v3156_v5 = vadd.f32 %v3155_v0, %v3154_v28  ;;  %v3163_v42 = vadd.f32 %v3162_v23, %v3161_v59  ;;  %v3115_v29 = vrot.slane %v3114_v16, 2 }
0x1705   :  { %v3122_v60 = vrot.slane %v3121_v37, 2  ;;  %v3136_v14 = vrot.slane %v3135_v32, 2  ;;  %v3129_v21 = vrot.slane %v3128_v24, 2  ;;  %v3150_v47 = vrot.slane %v3149_v8, 2 }
0x1706   :  { %v3143_v43 = vrot.slane %v3142_v6, 2  ;;  %v3157_v18 = vrot.slane %v3156_v5, 2  ;;  %v3164_v7 = vrot.slane %v3163_v42, 2  ;;  %v3116_v13 = vadd.f32 %v3115_v29, %v3114_v16 }
0x1707   :  { %v3123_v58 = vadd.f32 %v3122_v60, %v3121_v37  ;;  %v3137_v27 = vadd.f32 %v3136_v14, %v3135_v32  ;;  %v3130_v9 = vadd.f32 %v3129_v21, %v3128_v24  ;;  %v3151_v50 = vadd.f32 %v3150_v47, %v3149_v8 }
0x1708   :  { %v3144_v49 = vadd.f32 %v3143_v43, %v3142_v6  ;;  %v3158_v38 = vadd.f32 %v3157_v18, %v3156_v5  ;;  %v3165_v62 = vadd.f32 %v3164_v7, %v3163_v42  ;;  %v3117_v63 = vrot.slane %v3116_v13, 1 }
0x1709   :  { %v3124_v26 = vrot.slane %v3123_v58, 1  ;;  %v3138_v59 = vrot.slane %v3137_v27, 1  ;;  %v3131_v28 = vrot.slane %v3130_v9, 1  ;;  %v3152_v45 = vrot.slane %v3151_v50, 1 }
0x170a   :  { %v3145_v2 = vrot.slane %v3144_v49, 1  ;;  %v3159_v33 = vrot.slane %v3158_v38, 1  ;;  %v3166_v19 = vrot.slane %v3165_v62, 1  ;;  %v3118_v30 = vadd.f32 %v3117_v63, %v3116_v13 }
0x170b   :  { %v3125_v20 = vadd.f32 %v3124_v26, %v3123_v58  ;;  %v3132_v23 = vadd.f32 %v3131_v28, %v3130_v9  ;;  %v3139_v0 = vadd.f32 %v3138_v59, %v3137_v27  ;;  %v3153_v32 = vadd.f32 %v3152_v45, %v3151_v50 }
0x170c   :  { %v3146_v37 = vadd.f32 %v3145_v2, %v3144_v49  ;;  %v3160_v24 = vadd.f32 %v3159_v33, %v3158_v38  ;;  %v3167_v6 = vadd.f32 %v3166_v19, %v3165_v62 }
0x1791   :  { %v3103_v53 = vpop.xlane.xlu0 %3102 }
0x1792   :  { %6220 = vrcp.f32 %v3103_v53 }
0x179c   :  { %v6221_v16 = vpop.eup %6220 }
0x179d   :  { %v3170_v8 = vrot.slane %v6221_v16, 1  ;;  %v3171_v5 = vrot.slane %v6221_v16, 2  ;;  %v3172_v42 = vrot.slane %v6221_v16, 3  ;;  %v3173_v29 = vrot.slane %v6221_v16, 4 }
0x179e   :  { %v3174_v60 = vrot.slane %v6221_v16, 5  ;;  %v3175_v14 = vrot.slane %v6221_v16, 6  ;;  %v3176_v21 = vrot.slane %v6221_v16, 7  ;;  %v3185_v47 = vmul.f32 %v6221_v16, %v3118_v30 }
0x179f   :  { %v3186_v43 = vmul.f32 %v3170_v8, %v3125_v20  ;;  %v3187_v18 = vmul.f32 %v3171_v5, %v3132_v23  ;;  %v3188_v7 = vmul.f32 %v3172_v42, %v3139_v0  ;;  %v3189_v53 = vmul.f32 %v3173_v29, %v3146_v37  ;;  %v8217_v42 = vld [vmem:[#allocation14_spill] sm:$0xff] }
0x17a0   :  { %v3190_v13 = vmul.f32 %v3174_v60, %v3153_v32  ;;  %v3191_v58 = vmul.f32 %v3175_v14, %v3160_v24  ;;  %v3192_v27 = vmul.f32 %v3176_v21, %v3167_v6  ;;  %v3193_v62 = vmul.f32 %v3185_v47, %v6870_v12 }
0x17a1   :  { %v3194_v9 = vmul.f32 %v3186_v43, %v6870_v12  ;;  %v3195_v49 = vmul.f32 %v3187_v18, %v6870_v12  ;;  %v3196_v50 = vmul.f32 %v3188_v7, %v6870_v12  ;;  %v3197_v38 = vmul.f32 %v3189_v53, %v6870_v12 }
0x17a2   :  { %v3198_v63 = vmul.f32 %v3190_v13, %v6870_v12  ;;  %v3199_v28 = vmul.f32 %v3191_v58, %v6870_v12  ;;  %v3200_v2 = vmul.f32 %v3192_v27, %v6870_v12 }
0x17a3   :  { %v3209_v26 = vrot.slane %v3194_v9, 7  ;;  %v3211_v59 = vrot.slane %v3195_v49, 6  ;;  %v3213_v33 = vrot.slane %v3196_v50, 5  ;;  %v3215_v30 = vrot.slane %v3197_v38, 4 }
0x17a4   :  { %v3217_v23 = vrot.slane %v3198_v63, 3  ;;  %v3219_v16 = vrot.slane %v3199_v28, 2  ;;  %v3221_v32 = vrot.slane %v3200_v2, 1 }
0x17a5   :  { %v3210_v45 = vsel %vm645_vm2, %v3209_v26, %v3193_v62 }
0x17a6   :  { %v3212_v19 = vsel %vm647_vm3, %v3211_v59, %v3210_v45 }
0x17a7   :  { %v3214_v20 = vsel %vm649_vm4, %v3213_v33, %v3212_v19 }
0x17a8   :  { %v3216_v0 = vsel %vm651_vm5, %v3215_v30, %v3214_v20 }
0x17a9   :  { %v3218_v37 = vsel %vm653_vm6, %v3217_v23, %v3216_v0 }
0x17aa   :  { %v3220_v24 = vsel %vm655_vm7, %v3219_v16, %v3218_v37 }
0x17ab   :  { %v3222_v6 = vsel %vm657_vm8, %v3221_v32, %v3220_v24 }
0x17ac   :  { %v3224_v8 = vsel %vm158_vm1, %v3222_v6, 0.0 }
0x17ad   :  { %3225 = vadd.xlane.f32.xlu1 %v3224_v8 }
0x183a   :  { %v3226_v5 = vpop.xlane.xlu1 %3225 }
0x183b   :  { %v3242_v29 = vadd.f32 %v8217_v42, %v3226_v5 }
0x183d   :  { %3245 = vperm.xlu0 %6019, %v3242_v29  }
0x18bc   :  { %v3246_v60 = vpop.permute.xlu0 %3245 }
0x18bd   :  { %v3248_v14 = vmul.f32 %v3246_v60, %v7040_v55 }
0x18bf   :  { %v3319_v21 = vadd.f32 %v7554_v25, %v3248_v14 }
0x18c1   :  { %v3320_v47 = vadd.f32 %v3319_v21, %v7045_v1 }
0x18c3   :  { %6222 = vtanh.f32 %v3320_v47  ;;  %v5379_v18 = vmul.f32 -1.442695, %v3320_v47 }
0x18c5   :  { %6224 = vpow2.f32 %v5379_v18 }
0x18cd   :  { %v6223_v43 = vpop.eup %6222 }
0x18ce   :  { %3330 = vrot.lane.b32.xlu1 %v6223_v43, %s6461_s3 }
0x18cf   :  { %v6225_v7 = vpop.eup %6224 }
0x18d0   :  { %v3324_v53 = vadd.f32 1.0, %v6225_v7 }
0x18d2   :  { %6226 = vrcp.f32 %v3324_v53 }
0x18dc   :  { %v6227_v13 = vpop.eup %6226 }
0x18dd   :  { %v3328_v9 = vmul.f32 %v6227_v13, %v7526_v15 }
0x1940   :  { %v3331_v58 = vpop.permute.xlu1 %3330 }
0x1941   :  { %v3333_v27 = vmul.f32 %v6227_v13, %v3331_v58 }
0x1943   :  { %3335 = vrot.lane.b32.xlu1 %v3333_v27, %s6461_s3 }
0x19b5   :  { %v3336_v49 = vpop.permute.xlu1 %3335 }
0x19b6   :  { %v7658_v25 = vadd.f32 %v3336_v49, %v3328_v9 }
0x19b8   :  { %6228 = vtanh.f32 %v7658_v25  ;;  %3346 = vrot.lane.b32.xlu1 %v7658_v25, %s6462_s15 }
0x19c2   :  { %v6229_v50 = vpop.eup %6228 }
0x19c3   :  { %3341 = vrot.lane.b32.xlu0 %v6229_v50, %s6461_s3 }
0x1a2a   :  { %v3347_v38 = vpop.permute.xlu1 %3346 }
0x1a2b   :  { %5730 = vmatmul.mubr.msk.f32.vlgmr.msra.gmra.mrb[16].mxu1 %vm158_vm1, %v3347_v38 }
0x1a2c   :  { %5954 = vmatpush3.bf16.msra.mxu1 %v6829_v54  ;;  %5751 = vmatprep.mubr.msk.f32.mxu1 %vm6457_vm0, %v8193_v3 }
0x1a2d   :  { %5955 = vmatprep.subr.bf16.mxu1 %v8194_v31 }
0x1a30   :  { %5957 = vmatpush3.bf16.msra.mxu1 %v6832_v57 }
0x1a31   :  { %5964 = vmatprep.subr.bf16.mxu1 %v8194_v31 }
0x1a35   :  { %v3342_v15 = vpop.permute.xlu0 %3341 }
0x1a36   :  { %v3344_v62 = vmul.f32 %v6227_v13, %v3342_v15 }
0x1a38   :  { %3421 = vrot.lane.b32.xlu0 %v3344_v62, %s6463_s16 }
0x1aaa   :  { %v3422_v63 = vpop.permute.xlu0 %3421 }
0x1aab   :  { %5741 = vmatmul.mubr.msk.f32.vlgmr.msra.gmra.mrb[22].mxu0 %vm158_vm1, %v3422_v63  ;;  %5752 = vmatmul.mubr.msk.f32.vlgmr.msra.gmra.mrb[18].mxu1 %vm158_vm1, %v3422_v63 }
0x1aac   :  { %5960 = vmatpush3.bf16.msra.mxu0 %v6553_v4  ;;  %5762 = vmatprep.mubr.msk.f32.mxu0 %vm6457_vm0, %v8193_v3 }
0x1aad   :  { %5961 = vmatprep.subr.bf16.mxu0 %v8194_v31  ;;  %5966 = vmatpush3.bf16.msra.mxu1 %v6590_v17 }
0x1aae   :  { %5967 = vmatprep.subr.bf16.mxu1 %v8194_v31  ;;  %5773 = vmatprep.mubr.msk.f32.mxu1 %vm6457_vm0, %v8193_v3 }
0x1ab0   :  { %5963 = vmatpush3.bf16.msra.mxu0 %v6570_v11 }
0x1ab1   :  { %5970 = vmatprep.subr.bf16.mxu0 %v8194_v31  ;;  %5969 = vmatpush3.bf16.msra.mxu1 %v6612_v22 }
0x1ab2   :  { %5976 = vmatprep.subr.bf16.mxu1 %v8194_v31 }
0x1afe   :  { %v3416_v26 = vpop.f32.mrb[16].mxu1 }
0x1aff   :  { %v5731_v59 = vpop.f32.mrb[17].mxu1 }
0x1b7e   :  { %v3491_v28 = vpop.f32.mrb[22].mxu0  ;;  %v7686_v2 = vpop.f32.mrb[18].mxu1 }
0x1b7f   :  { %v3492_v45 = vadd.f32 %v3491_v28, %v3416_v26  ;;  %v5742_v33 = vpop.f32.mrb[23].mxu0  ;;  %v5753_v19 = vpop.f32.mrb[19].mxu1 }
0x1b81   :  { %v3495_v30 = vadd.f32 %v3492_v45, %v6680_v40 }
0x1b83   :  { %v3497_v20 = vcombine.high %v3495_v30, %v3495_v30  ;;  %v3504_v23 = vrot.slane %v3495_v30, %v6685_v44 }
0x1b85   :  { %v3511_v0 = vrot.slane %v3497_v20, %v6685_v44  ;;  %v3512_v16 = vcombine.high %v3504_v23, %v3504_v23  ;;  %v3520_v37 = vrot.slane %v3504_v23, %v6685_v44 }
0x1b87   :  { %v3513_v32 = vcombine.high %v3511_v0, %v3511_v0  ;;  %v3527_v24 = vrot.slane %v3511_v0, %v6685_v44  ;;  %v3534_v6 = vrot.slane %v3512_v16, %v6685_v44  ;;  %v3542_v8 = vcombine.high %v3520_v37, %v3520_v37 }
0x1b88   :  { %v3549_v5 = vrot.slane %v3520_v37, %v6694_v51 }
0x1b89   :  { %v3541_v42 = vrot.slane %v3513_v32, %v6685_v44  ;;  %v3543_v29 = vcombine.high %v3527_v24, %v3527_v24  ;;  %v3544_v60 = vcombine.high %v3534_v6, %v3534_v6  ;;  %v3553_v14 = vrot.slane %v3534_v6, %v6694_v51 }
0x1b8a   :  { %v3557_v21 = vrot.slane %v3542_v8, %v6694_v51  ;;  %v3565_v47 = vrot.slane %v3527_v24, %v6694_v51  ;;  %v3586_v43 = vadd.f32 %v3549_v5, %v6673_v36 }
0x1b8b   :  { %v3545_v18 = vcombine.high %v3541_v42, %v3541_v42  ;;  %v3561_v7 = vrot.slane %v3544_v60, %v6694_v51  ;;  %v3569_v53 = vrot.slane %v3541_v42, %v6694_v51  ;;  %v3573_v13 = vrot.slane %v3543_v29, %v6694_v51 }
0x1b8c   :  { %v3587_v58 = vadd.f32 %v6670_v34, %v3553_v14  ;;  %v3588_v27 = vadd.f32 %v3557_v21, %v6682_v41  ;;  %v3590_v9 = vadd.f32 %v3565_v47, %v6690_v48  ;;  %6230 = vtanh.f32 %v3586_v43 }
0x1b8d   :  { %v3577_v49 = vrot.slane %v3545_v18, %v6694_v51  ;;  %v3591_v50 = vadd.f32 %v6687_v46, %v3569_v53  ;;  %v3589_v38 = vadd.f32 %v6677_v39, %v3561_v7  ;;  %v3592_v15 = vadd.f32 %v3573_v13, %v6700_v56 }
0x1b8e   :  { %6232 = vtanh.f32 %v3587_v58 }
0x1b8f   :  { %6234 = vtanh.f32 %v3588_v27  ;;  %v3593_v62 = vadd.f32 %v6696_v52, %v3577_v49 }
0x1b90   :  { %6236 = vtanh.f32 %v3590_v9 }
0x1b91   :  { %6238 = vtanh.f32 %v3589_v38 }
0x1b92   :  { %6240 = vtanh.f32 %v3591_v50 }
0x1b93   :  { %6242 = vtanh.f32 %v3593_v62 }
0x1b94   :  { %6244 = vtanh.f32 %v3592_v15 }
0x1b96   :  { %v6231_v63 = vpop.eup %6230 }
0x1b97   :  { %v3602_v26 = vmul.f32 %v6231_v63, %v6723_v35 }
0x1b98   :  { %v6233_v59 = vpop.eup %6232 }
0x1b99   :  { %v6235_v28 = vpop.eup %6234  ;;  %v3610_v45 = vsel %vm158_vm1, %v3602_v26, 0.0  ;;  %v3603_v33 = vmul.f32 %v6233_v59, %v6723_v35 }
0x1b9a   :  { %v6237_v19 = vpop.eup %6236  ;;  %3611 = vadd.xlane.f32.xlu1 %v3610_v45  ;;  %v3604_v23 = vmul.f32 %v6235_v28, %v6723_v35 }
0x1b9b   :  { %v6239_v30 = vpop.eup %6238  ;;  %v3613_v20 = vsel %vm158_vm1, %v3603_v33, 0.0  ;;  %v3606_v8 = vmul.f32 %v6237_v19, %v6723_v35 }
0x1b9c   :  { %v6241_v0 = vpop.eup %6240  ;;  %3614 = vadd.xlane.f32.xlu0 %v3613_v20  ;;  %v3605_v16 = vmul.f32 %v6239_v30, %v6723_v35  ;;  %v3616_v6 = vsel %vm158_vm1, %v3604_v23, 0.0 }
0x1b9d   :  { %v3607_v32 = vmul.f32 %v6241_v0, %v6723_v35  ;;  %v6243_v24 = vpop.eup %6242  ;;  %v3622_v60 = vsel %vm158_vm1, %v3606_v8, 0.0 }
0x1b9e   :  { %v3619_v37 = vsel %vm158_vm1, %v3605_v16, 0.0  ;;  %v6245_v5 = vpop.eup %6244  ;;  %v3609_v29 = vmul.f32 %v6243_v24, %v6723_v35 }
0x1b9f   :  { %3620 = vadd.xlane.f32.xlu1 %v3619_v37  ;;  %v3625_v42 = vsel %vm158_vm1, %v3607_v32, 0.0  ;;  %v3608_v14 = vmul.f32 %v6245_v5, %v6723_v35 }
0x1ba0   :  { %3617 = vadd.xlane.f32.xlu0 %v3616_v6  ;;  %v3631_v21 = vsel %vm158_vm1, %v3609_v29, 0.0 }
0x1ba1   :  { %v3628_v47 = vsel %vm158_vm1, %v3608_v14, 0.0 }
0x1ba3   :  { %3626 = vadd.xlane.f32.xlu1 %v3625_v42 }
0x1ba4   :  { %3623 = vadd.xlane.f32.xlu0 %v3622_v60 }
0x1ba7   :  { %3632 = vadd.xlane.f32.xlu1 %v3631_v21 }
0x1ba8   :  { %3629 = vadd.xlane.f32.xlu0 %v3628_v47 }
0x1c27   :  { %v3612_v43 = vpop.xlane.xlu1 %3611 }
0x1c28   :  { %v3634_v13 = vsub.f32 %v3612_v43, %v6741_v10 }
0x1c29   :  { %v3615_v18 = vpop.xlane.xlu0 %3614 }
0x1c2a   :  { %v3635_v7 = vsub.f32 %v3615_v18, %v6741_v10  ;;  %v3642_v38 = vmul.f32 1.442695, %v3634_v13 }
0x1c2c   :  { %v3621_v53 = vpop.xlane.xlu1 %3620  ;;  %v3644_v9 = vmul.f32 1.442695, %v3635_v7 }
0x1c2d   :  { %v3618_v58 = vpop.xlane.xlu0 %3617  ;;  %v3637_v15 = vsub.f32 %v3621_v53, %v6741_v10 }
0x1c2e   :  { %v3636_v27 = vsub.f32 %v3618_v58, %v6741_v10  ;;  %6246 = vpow2.f32 %v3644_v9 }
0x1c2f   :  { %v3648_v45 = vmul.f32 1.442695, %v3637_v15  ;;  %v7754_v15 = vld [vmem:[%s8145_s0] sm:$0xff] }
0x1c30   :  { %v3646_v49 = vmul.f32 1.442695, %v3636_v27  ;;  %v3627_v50 = vpop.xlane.xlu1 %3626 }
0x1c31   :  { %v3624_v62 = vpop.xlane.xlu0 %3623  ;;  %v3639_v26 = vsub.f32 %v3627_v50, %v6741_v10 }
0x1c32   :  { %v3638_v63 = vsub.f32 %v3624_v62, %v6741_v10  ;;  %6248 = vpow2.f32 %v3646_v49 }
0x1c33   :  { %6250 = vpow2.f32 %v3642_v38  ;;  %v3652_v20 = vmul.f32 1.442695, %v3639_v26 }
0x1c34   :  { %v3650_v59 = vmul.f32 1.442695, %v3638_v63  ;;  %v3633_v28 = vpop.xlane.xlu1 %3632  ;;  %v7760_v63 = vld [vmem:[%s8145_s0 + $0x8] sm:$0xff] }
0x1c35   :  { %v3630_v33 = vpop.xlane.xlu0 %3629  ;;  %v3641_v19 = vsub.f32 %v3633_v28, %v6741_v10  ;;  %8218 = vst [vmem:[#allocation13_spill] sm:$0xff] %v7760_v63 }
0x1c36   :  { %v3640_v30 = vsub.f32 %v3630_v33, %v6741_v10  ;;  %6252 = vpow2.f32 %v3650_v59  ;;  %v7766_v59 = vld [vmem:[%s8145_s0 + $0x18] sm:$0xff] }
0x1c37   :  { %6254 = vpow2.f32 %v3648_v45  ;;  %v3656_v0 = vmul.f32 1.442695, %v3641_v19  ;;  %8219 = vst [vmem:[#allocation20_spill] sm:$0xff] %v7766_v59  ;;  %v7772_v45 = vld [vmem:[%s8145_s0 + $0x10] sm:$0xff]  ;;  %v7778_v19 = vld [vmem:[%s8145_s0 + $0x28] sm:$0xff] }
0x1c38   :  { %v3654_v23 = vmul.f32 1.442695, %v3640_v30  ;;  %v6247_v16 = vpop.eup %6246  ;;  %8220 = vst [vmem:[#allocation18_spill] sm:$0xff] %v7772_v45  ;;  %8221 = vst [vmem:[#allocation22_spill] sm:$0xff] %v7778_v19 }
0x1c39   :  { %v3673_v24 = vrot.slane %v6247_v16, %v6753_v61  ;;  %v3710_v26 = vmul.f32 %v7760_v63, %v6247_v16 }
0x1c3a   :  { %6256 = vpow2.f32 %v3654_v23 }
0x1c3b   :  { %6258 = vpow2.f32 %v3652_v20  ;;  %v7784_v20 = vld [vmem:[%s8145_s0 + $0x20] sm:$0xff] }
0x1c3c   :  { %v6249_v37 = vpop.eup %6248  ;;  %6260 = vpow2.f32 %v3656_v0  ;;  %8222 = vst [vmem:[#allocation19_spill] sm:$0xff] %v7784_v20  ;;  %v7790_v0 = vld [vmem:[%s8145_s0 + $0x38] sm:$0xff] }
0x1c3d   :  { %v6251_v32 = vpop.eup %6250  ;;  %v3677_v6 = vrot.slane %v6249_v37, %v6753_v61  ;;  %v3711_v33 = vmul.f32 %v7772_v45, %v6249_v37  ;;  %8223 = vst [vmem:[#allocation23_spill] sm:$0xff] %v7790_v0  ;;  %v7796_v37 = vld [vmem:[%s8145_s0 + $0x30] sm:$0xff] }
0x1c3e   :  { %v3669_v5 = vrot.slane %v6251_v32, %v6753_v61  ;;  %v3709_v62 = vmul.f32 %v7754_v15, %v6251_v32  ;;  %8224 = vst [vmem:[#allocation21_spill] sm:$0xff] %v7796_v37 }
0x1c40   :  { %v6253_v8 = vpop.eup %6252  ;;  %v3698_v29 = vsel %vm645_vm2, %v3673_v24, %v3669_v5  ;;  %v3717_v24 = vsel %vm158_vm1, %v3709_v62, 0.0  ;;  %v3731_v5 = vsel %vm158_vm1, %v3711_v33, 0.0 }
0x1c41   :  { %v6255_v42 = vpop.eup %6254  ;;  %v3685_v14 = vrot.slane %v6253_v8, %v6753_v61  ;;  %v3699_v21 = vsel %vm647_vm3, %v3677_v6, %v3698_v29  ;;  %v3713_v23 = vmul.f32 %v7784_v20, %v6253_v8  ;;  %v3724_v6 = vsel %vm158_vm1, %v3710_v26, 0.0 }
0x1c42   :  { %v3681_v43 = vrot.slane %v6255_v42, %v6753_v61  ;;  %v3712_v28 = vmul.f32 %v7766_v59, %v6255_v42 }
0x1c43   :  { %v3745_v29 = vsel %vm158_vm1, %v3713_v23, 0.0 }
0x1c44   :  { %v6257_v60 = vpop.eup %6256  ;;  %v3700_v53 = vsel %vm649_vm4, %v3681_v43, %v3699_v21  ;;  %v3738_v8 = vsel %vm158_vm1, %v3712_v28, 0.0  ;;  %v3725_v43 = vrot.slane %v3724_v6, 4 }
0x1c45   :  { %v6259_v47 = vpop.eup %6258  ;;  %v3693_v7 = vrot.slane %v6257_v60, %v6753_v61  ;;  %v3701_v58 = vsel %vm651_vm5, %v3685_v14, %v3700_v53  ;;  %v3715_v32 = vmul.f32 %v7796_v37, %v6257_v60  ;;  %v3732_v60 = vrot.slane %v3731_v5, 4 }
0x1c46   :  { %v6261_v18 = vpop.eup %6260  ;;  %v3689_v13 = vrot.slane %v6259_v47, %v6753_v61  ;;  %v3714_v30 = vmul.f32 %v7778_v19, %v6259_v47  ;;  %v3718_v47 = vrot.slane %v3717_v24, 4  ;;  %v3746_v53 = vrot.slane %v3745_v29, 4 }
0x1c47   :  { %v3697_v27 = vrot.slane %v6261_v18, %v6753_v61  ;;  %v3716_v16 = vmul.f32 %v7790_v0, %v6261_v18  ;;  %v3759_v21 = vsel %vm158_vm1, %v3715_v32, 0.0  ;;  %v3739_v18 = vrot.slane %v3738_v8, 4 }
0x1c48   :  { %v3702_v9 = vsel %vm653_vm6, %v3689_v13, %v3701_v58  ;;  %v3752_v42 = vsel %vm158_vm1, %v3714_v30, 0.0  ;;  %v3760_v58 = vrot.slane %v3759_v21, 4  ;;  %v3747_v62 = vadd.f32 %v3746_v53, %v3745_v29 }
0x1c49   :  { %v3703_v49 = vsel %vm655_vm7, %v3693_v7, %v3702_v9  ;;  %v3766_v14 = vsel %vm158_vm1, %v3716_v16, 0.0  ;;  %v3753_v7 = vrot.slane %v3752_v42, 4  ;;  %v3726_v9 = vadd.f32 %v3725_v43, %v3724_v6 }
0x1c4a   :  { %v3704_v50 = vsel %vm657_vm8, %v3697_v27, %v3703_v49  ;;  %v3767_v13 = vrot.slane %v3766_v14, 4  ;;  %v3719_v27 = vadd.f32 %v3718_v47, %v3717_v24  ;;  %v3740_v49 = vadd.f32 %v3739_v18, %v3738_v8 }
0x1c4b   :  { %v3706_v38 = vsel %vm660_vm9, %v3704_v50, 0.0  ;;  %v3733_v50 = vadd.f32 %v3732_v60, %v3731_v5  ;;  %v3761_v28 = vadd.f32 %v3760_v58, %v3759_v21  ;;  %v3727_v30 = vrot.slane %v3726_v9, 2 }
0x1c4c   :  { %3707 = vadd.xlane.f32.xlu0 %v3706_v38  ;;  %v3754_v38 = vadd.f32 %v3753_v7, %v3752_v42  ;;  %v3768_v26 = vadd.f32 %v3767_v13, %v3766_v14  ;;  %v3720_v33 = vrot.slane %v3719_v27, 2  ;;  %v3741_v23 = vrot.slane %v3740_v49, 2 }
0x1c4d   :  { %v3734_v16 = vrot.slane %v3733_v50, 2  ;;  %v3748_v37 = vrot.slane %v3747_v62, 2  ;;  %v3762_v0 = vrot.slane %v3761_v28, 2  ;;  %v3728_v59 = vadd.f32 %v3727_v30, %v3726_v9 }
0x1c4e   :  { %v3755_v32 = vrot.slane %v3754_v38, 2  ;;  %v3769_v20 = vrot.slane %v3768_v26, 2  ;;  %v3721_v45 = vadd.f32 %v3720_v33, %v3719_v27  ;;  %v3742_v24 = vadd.f32 %v3741_v23, %v3740_v49 }
0x1c4f   :  { %v3735_v6 = vadd.f32 %v3734_v16, %v3733_v50  ;;  %v3749_v5 = vadd.f32 %v3748_v37, %v3747_v62  ;;  %v3763_v42 = vadd.f32 %v3762_v0, %v3761_v28  ;;  %v3729_v21 = vrot.slane %v3728_v59, 1 }
0x1c50   :  { %v3756_v8 = vadd.f32 %v3755_v32, %v3754_v38  ;;  %v3770_v29 = vadd.f32 %v3769_v20, %v3768_v26  ;;  %v3722_v14 = vrot.slane %v3721_v45, 1  ;;  %v3743_v47 = vrot.slane %v3742_v24, 1 }
0x1c51   :  { %v3736_v43 = vrot.slane %v3735_v6, 1  ;;  %v3750_v18 = vrot.slane %v3749_v5, 1  ;;  %v3764_v7 = vrot.slane %v3763_v42, 1  ;;  %v3730_v58 = vadd.f32 %v3729_v21, %v3728_v59 }
0x1c52   :  { %v3757_v60 = vrot.slane %v3756_v8, 1  ;;  %v3771_v53 = vrot.slane %v3770_v29, 1  ;;  %v3723_v13 = vadd.f32 %v3722_v14, %v3721_v45  ;;  %v3744_v63 = vadd.f32 %v3743_v47, %v3742_v24 }
0x1c53   :  { %v3751_v9 = vadd.f32 %v3750_v18, %v3749_v5  ;;  %v3765_v50 = vadd.f32 %v3764_v7, %v3763_v42 }
0x1c54   :  { %v3758_v49 = vadd.f32 %v3757_v60, %v3756_v8  ;;  %v3772_v38 = vadd.f32 %v3771_v53, %v3770_v29 }
0x1cd9   :  { %v3708_v19 = vpop.xlane.xlu0 %3707 }
0x1cda   :  { %6262 = vrcp.f32 %v3708_v19  ;;  %v3737_v19 = vadd.f32 %v3736_v43, %v3735_v6 }
0x1ce4   :  { %v6263_v27 = vpop.eup %6262 }
0x1ce5   :  { %v3775_v37 = vrot.slane %v6263_v27, 1  ;;  %v3776_v0 = vrot.slane %v6263_v27, 2  ;;  %v3777_v20 = vrot.slane %v6263_v27, 3  ;;  %v3778_v62 = vrot.slane %v6263_v27, 4 }
0x1ce6   :  { %v3779_v26 = vrot.slane %v6263_v27, 5  ;;  %v3780_v28 = vrot.slane %v6263_v27, 6  ;;  %v3781_v33 = vrot.slane %v6263_v27, 7  ;;  %v3790_v30 = vmul.f32 %v6263_v27, %v3723_v13 }
0x1ce7   :  { %v3791_v23 = vmul.f32 %v3775_v37, %v3730_v58  ;;  %v3792_v16 = vmul.f32 %v3776_v0, %v3737_v19  ;;  %v3793_v32 = vmul.f32 %v3777_v20, %v3744_v63  ;;  %v3794_v45 = vmul.f32 %v3778_v62, %v3751_v9  ;;  %v8225_v62 = vld [vmem:[#allocation15_spill] sm:$0xff] }
0x1ce8   :  { %v3795_v59 = vmul.f32 %v3779_v26, %v3758_v49  ;;  %v3796_v24 = vmul.f32 %v3780_v28, %v3765_v50  ;;  %v3797_v6 = vmul.f32 %v3781_v33, %v3772_v38  ;;  %v3798_v14 = vmul.f32 %v3790_v30, %v6870_v12 }
0x1ce9   :  { %v3799_v5 = vmul.f32 %v3791_v23, %v6870_v12  ;;  %v3800_v8 = vmul.f32 %v3792_v16, %v6870_v12  ;;  %v3801_v42 = vmul.f32 %v3793_v32, %v6870_v12  ;;  %v3802_v29 = vmul.f32 %v3794_v45, %v6870_v12 }
0x1cea   :  { %v3803_v21 = vmul.f32 %v3795_v59, %v6870_v12  ;;  %v3804_v63 = vmul.f32 %v3796_v24, %v6870_v12  ;;  %v3805_v18 = vmul.f32 %v3797_v6, %v6870_v12 }
0x1ceb   :  { %v3814_v47 = vrot.slane %v3799_v5, 7  ;;  %v3816_v43 = vrot.slane %v3800_v8, 6  ;;  %v3818_v7 = vrot.slane %v3801_v42, 5  ;;  %v3820_v13 = vrot.slane %v3802_v29, 4 }
0x1cec   :  { %v3822_v19 = vrot.slane %v3803_v21, 3  ;;  %v3824_v9 = vrot.slane %v3804_v63, 2  ;;  %v3826_v50 = vrot.slane %v3805_v18, 1 }
0x1ced   :  { %v3815_v60 = vsel %vm645_vm2, %v3814_v47, %v3798_v14 }
0x1cee   :  { %v3817_v53 = vsel %vm647_vm3, %v3816_v43, %v3815_v60 }
0x1cef   :  { %v3819_v58 = vsel %vm649_vm4, %v3818_v7, %v3817_v53 }
0x1cf0   :  { %v3821_v27 = vsel %vm651_vm5, %v3820_v13, %v3819_v58 }
0x1cf1   :  { %v3823_v49 = vsel %vm653_vm6, %v3822_v19, %v3821_v27 }
0x1cf2   :  { %v3825_v38 = vsel %vm655_vm7, %v3824_v9, %v3823_v49 }
0x1cf3   :  { %v3827_v37 = vsel %vm657_vm8, %v3826_v50, %v3825_v38 }
0x1cf4   :  { %v3829_v0 = vsel %vm158_vm1, %v3827_v37, 0.0 }
0x1cf5   :  { %3830 = vadd.xlane.f32.xlu1 %v3829_v0 }
0x1d82   :  { %v3831_v20 = vpop.xlane.xlu1 %3830 }
0x1d83   :  { %v3847_v26 = vadd.f32 %v8225_v62, %v3831_v20 }
0x1d85   :  { %3850 = vperm.xlu0 %6019, %v3847_v26  }
0x1e04   :  { %v3851_v28 = vpop.permute.xlu0 %3850 }
0x1e05   :  { %v3853_v33 = vmul.f32 %v3851_v28, %v7040_v55 }
0x1e07   :  { %v3924_v30 = vadd.f32 %v7686_v2, %v3853_v33 }
0x1e09   :  { %v3925_v23 = vadd.f32 %v3924_v30, %v7045_v1 }
0x1e0b   :  { %6264 = vtanh.f32 %v3925_v23  ;;  %v5383_v32 = vmul.f32 -1.442695, %v3925_v23 }
0x1e0d   :  { %6266 = vpow2.f32 %v5383_v32 }
0x1e15   :  { %v6265_v16 = vpop.eup %6264 }
0x1e16   :  { %3935 = vrot.lane.b32.xlu1 %v6265_v16, %s6461_s3 }
0x1e17   :  { %v6267_v45 = vpop.eup %6266 }
0x1e18   :  { %v3929_v59 = vadd.f32 1.0, %v6267_v45 }
0x1e1a   :  { %6268 = vrcp.f32 %v3929_v59 }
0x1e24   :  { %v6269_v24 = vpop.eup %6268 }
0x1e25   :  { %v3933_v8 = vmul.f32 %v6269_v24, %v7658_v25 }
0x1e88   :  { %v3936_v6 = vpop.permute.xlu1 %3935 }
0x1e89   :  { %v3938_v5 = vmul.f32 %v6269_v24, %v3936_v6 }
0x1e8b   :  { %3940 = vrot.lane.b32.xlu1 %v3938_v5, %s6461_s3 }
0x1efd   :  { %v3941_v42 = vpop.permute.xlu1 %3940 }
0x1efe   :  { %v7830_v2 = vadd.f32 %v3941_v42, %v3933_v8 }
0x1f00   :  { %6270 = vtanh.f32 %v7830_v2  ;;  %3951 = vrot.lane.b32.xlu1 %v7830_v2, %s6462_s15 }
0x1f0a   :  { %v6271_v29 = vpop.eup %6270 }
0x1f0b   :  { %3946 = vrot.lane.b32.xlu0 %v6271_v29, %s6461_s3 }
0x1f72   :  { %v3952_v14 = vpop.permute.xlu1 %3951 }
0x1f73   :  { %5763 = vmatmul.mubr.msk.f32.vlgmr.msra.gmra.mrb[24].mxu0 %vm158_vm1, %v3952_v14 }
0x1f74   :  { %5972 = vmatpush3.bf16.msra.mxu0 %v6829_v54  ;;  %5784 = vmatprep.mubr.msk.f32.mxu0 %vm6457_vm0, %v8193_v3 }
0x1f75   :  { %5973 = vmatprep.subr.bf16.mxu0 %v8194_v31 }
0x1f78   :  { %5975 = vmatpush3.bf16.msra.mxu0 %v6832_v57 }
0x1f79   :  { %5982 = vmatprep.subr.bf16.mxu0 %v8194_v31 }
0x1f7d   :  { %v3947_v25 = vpop.permute.xlu0 %3946 }
0x1f7e   :  { %v3949_v21 = vmul.f32 %v6269_v24, %v3947_v25 }
0x1f80   :  { %4026 = vrot.lane.b32.xlu0 %v3949_v21, %s6463_s16 }
0x1ff2   :  { %v4027_v47 = vpop.permute.xlu0 %4026 }
0x1ff3   :  { %5774 = vmatmul.mubr.msk.f32.vlgmr.msra.gmra.mrb[20].mxu1 %vm158_vm1, %v4027_v47  ;;  %5785 = vmatmul.mubr.msk.f32.vlgmr.msra.gmra.mrb[26].mxu0 %vm158_vm1, %v4027_v47 }
0x1ff4   :  { %5978 = vmatpush3.bf16.msra.mxu1 %v6553_v4  ;;  %5795 = vmatprep.mubr.msk.f32.mxu1 %vm6457_vm0, %v8193_v3 }
0x1ff5   :  { %5979 = vmatprep.subr.bf16.mxu1 %v8194_v31  ;;  %5984 = vmatpush3.bf16.msra.mxu0 %v6590_v17 }
0x1ff6   :  { %5985 = vmatprep.subr.bf16.mxu0 %v8194_v31  ;;  %5806 = vmatprep.mubr.msk.f32.mxu0 %vm6457_vm0, %v8193_v3 }
0x1ff8   :  { %5981 = vmatpush3.bf16.msra.mxu1 %v6570_v11 }
0x1ff9   :  { %5988 = vmatprep.subr.bf16.mxu1 %v8194_v31  ;;  %5987 = vmatpush3.bf16.msra.mxu0 %v6612_v22 }
0x1ffa   :  { %5994 = vmatprep.subr.bf16.mxu0 %v8194_v31 }
0x2046   :  { %v4021_v4 = vpop.f32.mrb[24].mxu0 }
0x2047   :  { %v5764_v43 = vpop.f32.mrb[25].mxu0 }
0x20c6   :  { %v4096_v63 = vpop.f32.mrb[20].mxu1  ;;  %v7858_v18 = vpop.f32.mrb[26].mxu0 }
0x20c7   :  { %v4097_v60 = vadd.f32 %v4096_v63, %v4021_v4  ;;  %v5775_v17 = vpop.f32.mrb[21].mxu1  ;;  %v5786_v7 = vpop.f32.mrb[27].mxu0 }
0x20c9   :  { %v4100_v53 = vadd.f32 %v4097_v60, %v6680_v40 }
0x20cb   :  { %v4102_v13 = vcombine.high %v4100_v53, %v4100_v53  ;;  %v4109_v58 = vrot.slane %v4100_v53, %v6685_v44 }
0x20cd   :  { %v4116_v11 = vrot.slane %v4102_v13, %v6685_v44  ;;  %v4117_v19 = vcombine.high %v4109_v58, %v4109_v58  ;;  %v4125_v22 = vrot.slane %v4109_v58, %v6685_v44 }
0x20cf   :  { %v4118_v27 = vcombine.high %v4116_v11, %v4116_v11  ;;  %v4132_v9 = vrot.slane %v4116_v11, %v6685_v44  ;;  %v4139_v49 = vrot.slane %v4117_v19, %v6685_v44  ;;  %v4147_v50 = vcombine.high %v4125_v22, %v4125_v22 }
0x20d0   :  { %v4154_v38 = vrot.slane %v4125_v22, %v6694_v51 }
0x20d1   :  { %v4146_v37 = vrot.slane %v4118_v27, %v6685_v44  ;;  %v4148_v0 = vcombine.high %v4132_v9, %v4132_v9  ;;  %v4149_v20 = vcombine.high %v4139_v49, %v4139_v49  ;;  %v4158_v62 = vrot.slane %v4139_v49, %v6694_v51 }
0x20d2   :  { %v4162_v26 = vrot.slane %v4147_v50, %v6694_v51  ;;  %v4170_v28 = vrot.slane %v4132_v9, %v6694_v51  ;;  %v4191_v33 = vadd.f32 %v4154_v38, %v6673_v36 }
0x20d3   :  { %v4150_v30 = vcombine.high %v4146_v37, %v4146_v37  ;;  %v4166_v23 = vrot.slane %v4149_v20, %v6694_v51  ;;  %v4174_v16 = vrot.slane %v4146_v37, %v6694_v51  ;;  %v4178_v32 = vrot.slane %v4148_v0, %v6694_v51 }
0x20d4   :  { %v4192_v45 = vadd.f32 %v6670_v34, %v4158_v62  ;;  %v4193_v59 = vadd.f32 %v4162_v26, %v6682_v41  ;;  %v4195_v24 = vadd.f32 %v4170_v28, %v6690_v48  ;;  %6272 = vtanh.f32 %v4191_v33 }
0x20d5   :  { %v4182_v6 = vrot.slane %v4150_v30, %v6694_v51  ;;  %v4194_v5 = vadd.f32 %v6677_v39, %v4166_v23  ;;  %v4196_v8 = vadd.f32 %v6687_v46, %v4174_v16  ;;  %v4197_v42 = vadd.f32 %v4178_v32, %v6700_v56 }
0x20d6   :  { %6274 = vtanh.f32 %v4192_v45 }
0x20d7   :  { %6276 = vtanh.f32 %v4193_v59  ;;  %v4198_v29 = vadd.f32 %v6696_v52, %v4182_v6 }
0x20d8   :  { %6278 = vtanh.f32 %v4195_v24 }
0x20d9   :  { %6280 = vtanh.f32 %v4194_v5 }
0x20da   :  { %6282 = vtanh.f32 %v4196_v8 }
0x20db   :  { %6284 = vtanh.f32 %v4198_v29 }
0x20dc   :  { %6286 = vtanh.f32 %v4197_v42 }
0x20de   :  { %v6273_v14 = vpop.eup %6272 }
0x20df   :  { %v4207_v25 = vmul.f32 %v6273_v14, %v6723_v35 }
0x20e0   :  { %v6275_v21 = vpop.eup %6274 }
0x20e1   :  { %v6277_v47 = vpop.eup %6276  ;;  %v4215_v4 = vsel %vm158_vm1, %v4207_v25, 0.0  ;;  %v4208_v43 = vmul.f32 %v6275_v21, %v6723_v35 }
0x20e2   :  { %v6279_v63 = vpop.eup %6278  ;;  %4216 = vadd.xlane.f32.xlu1 %v4215_v4  ;;  %v4209_v7 = vmul.f32 %v6277_v47, %v6723_v35 }
0x20e3   :  { %v6281_v60 = vpop.eup %6280  ;;  %v4218_v17 = vsel %vm158_vm1, %v4208_v43, 0.0  ;;  %v4211_v27 = vmul.f32 %v6279_v63, %v6723_v35 }
0x20e4   :  { %v6283_v53 = vpop.eup %6282  ;;  %4219 = vadd.xlane.f32.xlu0 %v4218_v17  ;;  %v4210_v13 = vmul.f32 %v6281_v60, %v6723_v35  ;;  %v4221_v22 = vsel %vm158_vm1, %v4209_v7, 0.0 }
0x20e5   :  { %v4212_v11 = vmul.f32 %v6283_v53, %v6723_v35  ;;  %v6285_v19 = vpop.eup %6284  ;;  %v4227_v38 = vsel %vm158_vm1, %v4211_v27, 0.0 }
0x20e6   :  { %v4224_v58 = vsel %vm158_vm1, %v4210_v13, 0.0  ;;  %v6287_v9 = vpop.eup %6286  ;;  %v4214_v50 = vmul.f32 %v6285_v19, %v6723_v35 }
0x20e7   :  { %4225 = vadd.xlane.f32.xlu1 %v4224_v58  ;;  %v4230_v49 = vsel %vm158_vm1, %v4212_v11, 0.0  ;;  %v4213_v37 = vmul.f32 %v6287_v9, %v6723_v35 }
0x20e8   :  { %4222 = vadd.xlane.f32.xlu0 %v4221_v22  ;;  %v4236_v0 = vsel %vm158_vm1, %v4214_v50, 0.0 }
0x20e9   :  { %v4233_v20 = vsel %vm158_vm1, %v4213_v37, 0.0 }
0x20eb   :  { %4231 = vadd.xlane.f32.xlu1 %v4230_v49 }
0x20ec   :  { %4228 = vadd.xlane.f32.xlu0 %v4227_v38 }
0x20ef   :  { %4237 = vadd.xlane.f32.xlu1 %v4236_v0 }
0x20f0   :  { %4234 = vadd.xlane.f32.xlu0 %v4233_v20 }
0x216f   :  { %v4217_v62 = vpop.xlane.xlu1 %4216 }
0x2170   :  { %v4239_v30 = vsub.f32 %v4217_v62, %v6741_v10 }
0x2171   :  { %v4220_v26 = vpop.xlane.xlu0 %4219 }
0x2172   :  { %v4240_v28 = vsub.f32 %v4220_v26, %v6741_v10  ;;  %v4247_v24 = vmul.f32 1.442695, %v4239_v30 }
0x2174   :  { %v4226_v33 = vpop.xlane.xlu1 %4225  ;;  %v4249_v32 = vmul.f32 1.442695, %v4240_v28 }
0x2175   :  { %v4223_v23 = vpop.xlane.xlu0 %4222  ;;  %v4242_v6 = vsub.f32 %v4226_v33, %v6741_v10 }
0x2176   :  { %v4241_v16 = vsub.f32 %v4223_v23, %v6741_v10  ;;  %6288 = vpow2.f32 %v4249_v32 }
0x2177   :  { %v4253_v25 = vmul.f32 1.442695, %v4242_v6  ;;  %v8227_v6 = vld [vmem:[#allocation20_spill] sm:$0xff] }
0x2178   :  { %v4251_v45 = vmul.f32 1.442695, %v4241_v16  ;;  %v4232_v59 = vpop.xlane.xlu1 %4231 }
0x2179   :  { %v4229_v5 = vpop.xlane.xlu0 %4228  ;;  %v4244_v42 = vsub.f32 %v4232_v59, %v6741_v10  ;;  %v8226_v59 = vld [vmem:[#allocation13_spill] sm:$0xff] }
0x217a   :  { %v4243_v8 = vsub.f32 %v4229_v5, %v6741_v10  ;;  %6290 = vpow2.f32 %v4251_v45 }
0x217b   :  { %6292 = vpow2.f32 %v4247_v24  ;;  %v4257_v43 = vmul.f32 1.442695, %v4244_v42 }
0x217c   :  { %v4255_v29 = vmul.f32 1.442695, %v4243_v8  ;;  %v4238_v14 = vpop.xlane.xlu1 %4237  ;;  %v8228_v8 = vld [vmem:[#allocation18_spill] sm:$0xff] }
0x217d   :  { %v4235_v21 = vpop.xlane.xlu0 %4234  ;;  %v4246_v47 = vsub.f32 %v4238_v14, %v6741_v10 }
0x217e   :  { %v4245_v4 = vsub.f32 %v4235_v21, %v6741_v10  ;;  %6294 = vpow2.f32 %v4255_v29  ;;  %v8229_v29 = vld [vmem:[#allocation22_spill] sm:$0xff] }
0x217f   :  { %6296 = vpow2.f32 %v4253_v25  ;;  %v4261_v60 = vmul.f32 1.442695, %v4246_v47  ;;  %v8230_v25 = vld [vmem:[#allocation19_spill] sm:$0xff] }
0x2180   :  { %v4259_v63 = vmul.f32 1.442695, %v4245_v4  ;;  %v6289_v17 = vpop.eup %6288  ;;  %v8231_v47 = vld [vmem:[#allocation23_spill] sm:$0xff] }
0x2181   :  { %v4278_v13 = vrot.slane %v6289_v17, %v6753_v61  ;;  %v4315_v24 = vmul.f32 %v8226_v59, %v6289_v17 }
0x2182   :  { %6298 = vpow2.f32 %v4259_v63 }
0x2183   :  { %6300 = vpow2.f32 %v4257_v43  ;;  %v8232_v43 = vld [vmem:[#allocation21_spill] sm:$0xff] }
0x2184   :  { %v6291_v7 = vpop.eup %6290  ;;  %6302 = vpow2.f32 %v4261_v60 }
0x2185   :  { %v6293_v53 = vpop.eup %6292  ;;  %v4282_v58 = vrot.slane %v6291_v7, %v6753_v61  ;;  %v4316_v42 = vmul.f32 %v8228_v8, %v6291_v7 }
0x2186   :  { %v4274_v19 = vrot.slane %v6293_v53, %v6753_v61  ;;  %v4314_v45 = vmul.f32 %v7754_v15, %v6293_v53 }
0x2187   :  { %v4336_v17 = vsel %vm158_vm1, %v4316_v42, 0.0 }
0x2188   :  { %v6295_v11 = vpop.eup %6294  ;;  %v4303_v27 = vsel %vm645_vm2, %v4278_v13, %v4274_v19  ;;  %v4322_v60 = vsel %vm158_vm1, %v4314_v45, 0.0  ;;  %v4329_v13 = vsel %vm158_vm1, %v4315_v24, 0.0 }
0x2189   :  { %v6297_v22 = vpop.eup %6296  ;;  %v4290_v49 = vrot.slane %v6295_v11, %v6753_v61  ;;  %v4304_v50 = vsel %vm647_vm3, %v4282_v58, %v4303_v27  ;;  %v4318_v21 = vmul.f32 %v8230_v25, %v6295_v11  ;;  %v4323_v19 = vrot.slane %v4322_v60, 4 }
0x218a   :  { %v4286_v37 = vrot.slane %v6297_v22, %v6753_v61  ;;  %v4317_v5 = vmul.f32 %v8227_v6, %v6297_v22  ;;  %v4330_v22 = vrot.slane %v4329_v13, 4 }
0x218b   :  { %v4350_v7 = vsel %vm158_vm1, %v4318_v21, 0.0 }
0x218c   :  { %v6299_v9 = vpop.eup %6298  ;;  %v4305_v62 = vsel %vm649_vm4, %v4286_v37, %v4304_v50  ;;  %v4343_v15 = vsel %vm158_vm1, %v4317_v5, 0.0  ;;  %v4351_v50 = vrot.slane %v4350_v7, 4 }
0x218d   :  { %v6301_v38 = vpop.eup %6300  ;;  %v4298_v20 = vrot.slane %v6299_v9, %v6753_v61  ;;  %v4306_v28 = vsel %vm651_vm5, %v4290_v49, %v4305_v62  ;;  %v4320_v63 = vmul.f32 %v8232_v43, %v6299_v9  ;;  %v4344_v27 = vrot.slane %v4343_v15, 4 }
0x218e   :  { %v6303_v0 = vpop.eup %6302  ;;  %v4294_v26 = vrot.slane %v6301_v38, %v6753_v61  ;;  %v4319_v14 = vmul.f32 %v8229_v29, %v6301_v38  ;;  %v4337_v9 = vrot.slane %v4336_v17, 4 }
0x218f   :  { %v4302_v33 = vrot.slane %v6303_v0, %v6753_v61  ;;  %v4321_v4 = vmul.f32 %v8231_v47, %v6303_v0  ;;  %v4364_v11 = vsel %vm158_vm1, %v4320_v63, 0.0  ;;  %v4324_v0 = vadd.f32 %v4323_v19, %v4322_v60 }
0x2190   :  { %v4307_v30 = vsel %vm653_vm6, %v4294_v26, %v4306_v28  ;;  %v4357_v53 = vsel %vm158_vm1, %v4319_v14, 0.0  ;;  %v4365_v37 = vrot.slane %v4364_v11, 4  ;;  %v4345_v62 = vadd.f32 %v4344_v27, %v4343_v15 }
0x2191   :  { %v4308_v23 = vsel %vm655_vm7, %v4298_v20, %v4307_v30  ;;  %v4371_v58 = vsel %vm158_vm1, %v4321_v4, 0.0  ;;  %v4358_v49 = vrot.slane %v4357_v53, 4  ;;  %v4331_v20 = vadd.f32 %v4330_v22, %v4329_v13 }
0x2192   :  { %v4309_v16 = vsel %vm657_vm8, %v4302_v33, %v4308_v23  ;;  %v4372_v38 = vrot.slane %v4371_v58, 4  ;;  %v4338_v26 = vadd.f32 %v4337_v9, %v4336_v17  ;;  %v4352_v33 = vadd.f32 %v4351_v50, %v4350_v7 }
0x2193   :  { %v4311_v32 = vsel %vm660_vm9, %v4309_v16, 0.0  ;;  %v4359_v28 = vadd.f32 %v4358_v49, %v4357_v53  ;;  %v4366_v23 = vadd.f32 %v4365_v37, %v4364_v11  ;;  %v4325_v16 = vrot.slane %v4324_v0, 2 }
0x2194   :  { %4312 = vadd.xlane.f32.xlu0 %v4311_v32  ;;  %v4373_v30 = vadd.f32 %v4372_v38, %v4371_v58  ;;  %v4332_v32 = vrot.slane %v4331_v20, 2  ;;  %v4346_v45 = vrot.slane %v4345_v62, 2  ;;  %v4339_v59 = vrot.slane %v4338_v26, 2 }
0x2195   :  { %v4360_v24 = vrot.slane %v4359_v28, 2  ;;  %v4353_v6 = vrot.slane %v4352_v33, 2  ;;  %v4367_v5 = vrot.slane %v4366_v23, 2  ;;  %v4326_v29 = vadd.f32 %v4325_v16, %v4324_v0 }
0x2196   :  { %v4374_v8 = vrot.slane %v4373_v30, 2  ;;  %v4333_v14 = vadd.f32 %v4332_v32, %v4331_v20  ;;  %v4347_v25 = vadd.f32 %v4346_v45, %v4345_v62  ;;  %v4340_v21 = vadd.f32 %v4339_v59, %v4338_v26 }
0x2197   :  { %v4361_v47 = vadd.f32 %v4360_v24, %v4359_v28  ;;  %v4354_v4 = vadd.f32 %v4353_v6, %v4352_v33  ;;  %v4368_v43 = vadd.f32 %v4367_v5, %v4366_v23  ;;  %v4327_v60 = vrot.slane %v4326_v29, 1 }
0x2198   :  { %v4375_v63 = vadd.f32 %v4374_v8, %v4373_v30  ;;  %v4334_v13 = vrot.slane %v4333_v14, 1  ;;  %v4348_v15 = vrot.slane %v4347_v25, 1  ;;  %v4341_v17 = vrot.slane %v4340_v21, 1 }
0x2199   :  { %v4355_v53 = vrot.slane %v4354_v4, 1  ;;  %v4362_v7 = vrot.slane %v4361_v47, 1  ;;  %v4369_v58 = vrot.slane %v4368_v43, 1  ;;  %v4328_v19 = vadd.f32 %v4327_v60, %v4326_v29 }
0x219a   :  { %v4376_v11 = vrot.slane %v4375_v63, 1  ;;  %v4335_v22 = vadd.f32 %v4334_v13, %v4333_v14  ;;  %v4349_v27 = vadd.f32 %v4348_v15, %v4347_v25  ;;  %v4342_v9 = vadd.f32 %v4341_v17, %v4340_v21 }
0x219b   :  { %v4356_v50 = vadd.f32 %v4355_v53, %v4354_v4  ;;  %v4363_v38 = vadd.f32 %v4362_v7, %v4361_v47  ;;  %v4370_v37 = vadd.f32 %v4369_v58, %v4368_v43 }
0x219c   :  { %v4377_v0 = vadd.f32 %v4376_v11, %v4375_v63 }
0x2221   :  { %v4313_v42 = vpop.xlane.xlu0 %4312 }
0x2222   :  { %6304 = vrcp.f32 %v4313_v42 }
0x222c   :  { %v6305_v49 = vpop.eup %6304 }
0x222d   :  { %v4380_v20 = vrot.slane %v6305_v49, 1  ;;  %v4381_v62 = vrot.slane %v6305_v49, 2  ;;  %v4382_v26 = vrot.slane %v6305_v49, 3  ;;  %v4383_v28 = vrot.slane %v6305_v49, 4 }
0x222e   :  { %v4384_v33 = vrot.slane %v6305_v49, 5  ;;  %v4385_v30 = vrot.slane %v6305_v49, 6  ;;  %v4386_v23 = vrot.slane %v6305_v49, 7  ;;  %v4395_v16 = vmul.f32 %v6305_v49, %v4328_v19 }
0x222f   :  { %v4396_v32 = vmul.f32 %v4380_v20, %v4335_v22  ;;  %v4397_v45 = vmul.f32 %v4381_v62, %v4342_v9  ;;  %v4398_v59 = vmul.f32 %v4382_v26, %v4349_v27  ;;  %v4399_v24 = vmul.f32 %v4383_v28, %v4356_v50 }
0x2230   :  { %v4400_v6 = vmul.f32 %v4384_v33, %v4363_v38  ;;  %v4401_v5 = vmul.f32 %v4385_v30, %v4370_v37  ;;  %v4402_v8 = vmul.f32 %v4386_v23, %v4377_v0  ;;  %v4403_v21 = vmul.f32 %v4395_v16, %v6870_v12  ;;  %v8233_v37 = vld [vmem:[#allocation16_spill] sm:$0xff] }
0x2231   :  { %v4404_v42 = vmul.f32 %v4396_v32, %v6870_v12  ;;  %v4405_v29 = vmul.f32 %v4397_v45, %v6870_v12  ;;  %v4406_v14 = vmul.f32 %v4398_v59, %v6870_v12  ;;  %v4407_v25 = vmul.f32 %v4399_v24, %v6870_v12 }
0x2232   :  { %v4408_v47 = vmul.f32 %v4400_v6, %v6870_v12  ;;  %v4409_v63 = vmul.f32 %v4401_v5, %v6870_v12  ;;  %v4410_v60 = vmul.f32 %v4402_v8, %v6870_v12 }
0x2233   :  { %v4419_v4 = vrot.slane %v4404_v42, 7  ;;  %v4421_v43 = vrot.slane %v4405_v29, 6  ;;  %v4423_v15 = vrot.slane %v4406_v14, 5  ;;  %v4425_v53 = vrot.slane %v4407_v25, 4 }
0x2234   :  { %v4427_v58 = vrot.slane %v4408_v47, 3  ;;  %v4429_v19 = vrot.slane %v4409_v63, 2  ;;  %v4431_v27 = vrot.slane %v4410_v60, 1 }
0x2235   :  { %v4420_v13 = vsel %vm645_vm2, %v4419_v4, %v4403_v21 }
0x2236   :  { %v4422_v17 = vsel %vm647_vm3, %v4421_v43, %v4420_v13 }
0x2237   :  { %v4424_v7 = vsel %vm649_vm4, %v4423_v15, %v4422_v17 }
0x2238   :  { %v4426_v11 = vsel %vm651_vm5, %v4425_v53, %v4424_v7 }
0x2239   :  { %v4428_v22 = vsel %vm653_vm6, %v4427_v58, %v4426_v11 }
0x223a   :  { %v4430_v9 = vsel %vm655_vm7, %v4429_v19, %v4428_v22 }
0x223b   :  { %v4432_v49 = vsel %vm657_vm8, %v4431_v27, %v4430_v9 }
0x223c   :  { %v4434_v50 = vsel %vm158_vm1, %v4432_v49, 0.0 }
0x223d   :  { %4435 = vadd.xlane.f32.xlu1 %v4434_v50 }
0x22ca   :  { %v4436_v38 = vpop.xlane.xlu1 %4435 }
0x22cb   :  { %v4452_v0 = vadd.f32 %v8233_v37, %v4436_v38 }
0x22cd   :  { %4455 = vperm.xlu0 %6019, %v4452_v0  }
0x234c   :  { %v4456_v20 = vpop.permute.xlu0 %4455 }
0x234d   :  { %v4458_v62 = vmul.f32 %v4456_v20, %v7040_v55 }
0x234f   :  { %v4529_v26 = vadd.f32 %v7858_v18, %v4458_v62 }
0x2351   :  { %v4530_v28 = vadd.f32 %v4529_v26, %v7045_v1 }
0x2353   :  { %6306 = vtanh.f32 %v4530_v28  ;;  %v5387_v30 = vmul.f32 -1.442695, %v4530_v28 }
0x2355   :  { %6308 = vpow2.f32 %v5387_v30 }
0x235d   :  { %v6307_v33 = vpop.eup %6306 }
0x235e   :  { %4540 = vrot.lane.b32.xlu1 %v6307_v33, %s6461_s3 }
0x235f   :  { %v6309_v23 = vpop.eup %6308 }
0x2360   :  { %v4534_v16 = vadd.f32 1.0, %v6309_v23 }
0x2362   :  { %6310 = vrcp.f32 %v4534_v16 }
0x236c   :  { %v6311_v32 = vpop.eup %6310 }
0x236d   :  { %v4538_v24 = vmul.f32 %v6311_v32, %v7830_v2 }
0x23d0   :  { %v4541_v45 = vpop.permute.xlu1 %4540 }
0x23d1   :  { %v4543_v59 = vmul.f32 %v6311_v32, %v4541_v45 }
0x23d3   :  { %4545 = vrot.lane.b32.xlu1 %v4543_v59, %s6461_s3 }
0x2445   :  { %v4546_v6 = vpop.permute.xlu1 %4545 }
0x2446   :  { %v7962_v18 = vadd.f32 %v4546_v6, %v4538_v24 }
0x2448   :  { %6312 = vtanh.f32 %v7962_v18  ;;  %4556 = vrot.lane.b32.xlu1 %v7962_v18, %s6462_s15 }
0x2452   :  { %v6313_v5 = vpop.eup %6312 }
0x2453   :  { %4551 = vrot.lane.b32.xlu0 %v6313_v5, %s6461_s3 }
0x24ba   :  { %v4557_v8 = vpop.permute.xlu1 %4556 }
0x24bb   :  { %5796 = vmatmul.mubr.msk.f32.vlgmr.msra.gmra.mrb[22].mxu1 %vm158_vm1, %v4557_v8 }
0x24bc   :  { %5990 = vmatpush3.bf16.msra.mxu1 %v6829_v54  ;;  %5817 = vmatprep.mubr.msk.f32.mxu1 %vm6457_vm0, %v8193_v3 }
0x24bd   :  { %5991 = vmatprep.subr.bf16.mxu1 %v8194_v31 }
0x24c0   :  { %5993 = vmatpush3.bf16.msra.mxu1 %v6832_v57 }
0x24c1   :  { %6000 = vmatprep.subr.bf16.mxu1 %v8194_v31 }
0x24c5   :  { %v4552_v2 = vpop.permute.xlu0 %4551 }
0x24c6   :  { %v4554_v42 = vmul.f32 %v6311_v32, %v4552_v2 }
0x24c8   :  { %4631 = vrot.lane.b32.xlu0 %v4554_v42, %s6463_s16 }
0x253a   :  { %v4632_v29 = vpop.permute.xlu0 %4631 }
0x253b   :  { %5807 = vmatmul.mubr.msk.f32.vlgmr.msra.gmra.mrb[28].mxu0 %vm158_vm1, %v4632_v29  ;;  %5818 = vmatmul.mubr.msk.f32.vlgmr.msra.gmra.mrb[24].mxu1 %vm158_vm1, %v4632_v29 }
0x253c   :  { %5828 = vmatprep.mubr.msk.f32.mxu0 %vm6457_vm0, %v8193_v3  ;;  %5839 = vmatprep.mubr.msk.f32.mxu1 %vm6457_vm0, %v8193_v3 }
0x258e   :  { %v4626_v54 = vpop.f32.mrb[22].mxu1 }
0x258f   :  { %v5797_v14 = vpop.f32.mrb[23].mxu1 }
0x260e   :  { %v4701_v57 = vpop.f32.mrb[28].mxu0  ;;  %v7982_v25 = vpop.f32.mrb[24].mxu1 }
0x260f   :  { %v4702_v21 = vadd.f32 %v4701_v57, %v4626_v54  ;;  %v5808_v47 = vpop.f32.mrb[29].mxu0  ;;  %v5819_v4 = vpop.f32.mrb[25].mxu1 }
0x2611   :  { %v4705_v43 = vadd.f32 %v4702_v21, %v6680_v40 }
0x2613   :  { %v4707_v63 = vcombine.high %v4705_v43, %v4705_v43  ;;  %v4714_v60 = vrot.slane %v4705_v43, %v6685_v44 }
0x2615   :  { %v4721_v13 = vrot.slane %v4707_v63, %v6685_v44  ;;  %v4722_v15 = vcombine.high %v4714_v60, %v4714_v60  ;;  %v4730_v17 = vrot.slane %v4714_v60, %v6685_v44 }
0x2617   :  { %v4723_v53 = vcombine.high %v4721_v13, %v4721_v13  ;;  %v4737_v3 = vrot.slane %v4721_v13, %v6685_v44  ;;  %v4744_v7 = vrot.slane %v4722_v15, %v6685_v44  ;;  %v4752_v58 = vcombine.high %v4730_v17, %v4730_v17 }
0x2618   :  { %v4759_v11 = vrot.slane %v4730_v17, %v6694_v51 }
0x2619   :  { %v4751_v19 = vrot.slane %v4723_v53, %v6685_v44  ;;  %v4753_v22 = vcombine.high %v4737_v3, %v4737_v3  ;;  %v4754_v40 = vcombine.high %v4744_v7, %v4744_v7  ;;  %v4763_v27 = vrot.slane %v4744_v7, %v6694_v51 }
0x261a   :  { %v4767_v9 = vrot.slane %v4752_v58, %v6694_v51  ;;  %v4775_v49 = vrot.slane %v4737_v3, %v6694_v51  ;;  %v4796_v50 = vadd.f32 %v4759_v11, %v6673_v36 }
0x261b   :  { %v4755_v38 = vcombine.high %v4751_v19, %v4751_v19  ;;  %v4771_v37 = vrot.slane %v4754_v40, %v6694_v51  ;;  %v4779_v0 = vrot.slane %v4751_v19, %v6694_v51  ;;  %v4783_v20 = vrot.slane %v4753_v22, %v6694_v51 }
0x261c   :  { %v4797_v62 = vadd.f32 %v6670_v34, %v4763_v27  ;;  %v4798_v44 = vadd.f32 %v4767_v9, %v6682_v41  ;;  %v4800_v26 = vadd.f32 %v4775_v49, %v6690_v48  ;;  %6314 = vtanh.f32 %v4796_v50 }
0x261d   :  { %v4787_v28 = vrot.slane %v4755_v38, %v6694_v51  ;;  %v4799_v33 = vadd.f32 %v6677_v39, %v4771_v37  ;;  %v4801_v36 = vadd.f32 %v6687_v46, %v4779_v0  ;;  %v4802_v30 = vadd.f32 %v4783_v20, %v6700_v56 }
0x261e   :  { %6316 = vtanh.f32 %v4797_v62 }
0x261f   :  { %6318 = vtanh.f32 %v4798_v44  ;;  %v4803_v23 = vadd.f32 %v6696_v52, %v4787_v28 }
0x2620   :  { %6320 = vtanh.f32 %v4800_v26 }
0x2621   :  { %6322 = vtanh.f32 %v4799_v33 }
0x2622   :  { %6324 = vtanh.f32 %v4801_v36 }
0x2623   :  { %6326 = vtanh.f32 %v4803_v23 }
0x2624   :  { %6328 = vtanh.f32 %v4802_v30 }
0x2626   :  { %v6315_v34 = vpop.eup %6314 }
0x2627   :  { %v4812_v41 = vmul.f32 %v6315_v34, %v6723_v35 }
0x2628   :  { %v6317_v48 = vpop.eup %6316 }
0x2629   :  { %v6319_v51 = vpop.eup %6318  ;;  %v4820_v39 = vsel %vm158_vm1, %v4812_v41, 0.0  ;;  %v4813_v46 = vmul.f32 %v6317_v48, %v6723_v35 }
0x262a   :  { %v6321_v16 = vpop.eup %6320  ;;  %4821 = vadd.xlane.f32.xlu1 %v4820_v39  ;;  %v4814_v52 = vmul.f32 %v6319_v51, %v6723_v35 }
0x262b   :  { %v6323_v56 = vpop.eup %6322  ;;  %v4823_v32 = vsel %vm158_vm1, %v4813_v46, 0.0  ;;  %v4816_v2 = vmul.f32 %v6321_v16, %v6723_v35 }
0x262c   :  { %v6325_v45 = vpop.eup %6324  ;;  %4824 = vadd.xlane.f32.xlu0 %v4823_v32  ;;  %v4815_v59 = vmul.f32 %v6323_v56, %v6723_v35  ;;  %v4826_v8 = vsel %vm158_vm1, %v4814_v52, 0.0 }
0x262d   :  { %v4817_v6 = vmul.f32 %v6325_v45, %v6723_v35  ;;  %v6327_v5 = vpop.eup %6326  ;;  %v4832_v14 = vsel %vm158_vm1, %v4816_v2, 0.0  ;;  %v106_v2 = vld [vmem:[%s8151_s6 + $0x28] sm:$0xff] }
0x262e   :  { %v4829_v24 = vsel %vm158_vm1, %v4815_v59, 0.0  ;;  %v6329_v42 = vpop.eup %6328  ;;  %v4819_v54 = vmul.f32 %v6327_v5, %v6723_v35 }
0x262f   :  { %4830 = vadd.xlane.f32.xlu1 %v4829_v24  ;;  %v4835_v29 = vsel %vm158_vm1, %v4817_v6, 0.0  ;;  %v4818_v57 = vmul.f32 %v6329_v42, %v6723_v35 }
0x2630   :  { %4827 = vadd.xlane.f32.xlu0 %v4826_v8  ;;  %v4841_v21 = vsel %vm158_vm1, %v4819_v54, 0.0  ;;  %v105_v8 = vld [vmem:[%s8151_s6 + $0x20] sm:$0xff] }
0x2631   :  { %v4838_v47 = vsel %vm158_vm1, %v4818_v57, 0.0  ;;  %v5995_v42 = vpack.c.bf16 %v106_v2, %v105_v8 }
0x2633   :  { %4836 = vadd.xlane.f32.xlu1 %v4835_v29  ;;  %v108_v29 = vld [vmem:[%s8151_s6 + $0x38] sm:$0xff]  ;;  %5996 = vmatpush3.bf16.msra.mxu0 %v5995_v42 }
0x2634   :  { %4833 = vadd.xlane.f32.xlu0 %v4832_v14  ;;  %5997 = vmatprep.subr.bf16.mxu0 %v8194_v31  ;;  %v6380_v14 = vld [vmem:[%s8145_s0] sm:$0xff] }
0x2637   :  { %4842 = vadd.xlane.f32.xlu1 %v4841_v21  ;;  %v6381_v21 = vld [vmem:[%s8145_s0 + $0x8] sm:$0xff] }
0x2638   :  { %4839 = vadd.xlane.f32.xlu0 %v4838_v47 }
0x26b7   :  { %v4822_v4 = vpop.xlane.xlu1 %4821 }
0x26b8   :  { %v4844_v13 = vsub.f32 %v4822_v4, %v6741_v10  ;;  %v6382_v4 = vld [vmem:[%s8145_s0 + $0x18] sm:$0xff] }
0x26b9   :  { %v4825_v43 = vpop.xlane.xlu0 %4824 }
0x26ba   :  { %v4845_v63 = vsub.f32 %v4825_v43, %v6741_v10  ;;  %v4852_v7 = vmul.f32 1.442695, %v4844_v13  ;;  %v6384_v13 = vld [vmem:[%s8145_s0 + $0x28] sm:$0xff] }
0x26bc   :  { %v4831_v60 = vpop.xlane.xlu1 %4830  ;;  %v4854_v53 = vmul.f32 1.442695, %v4845_v63  ;;  %v6383_v63 = vld [vmem:[%s8145_s0 + $0x10] sm:$0xff] }
0x26bd   :  { %v4828_v15 = vpop.xlane.xlu0 %4827  ;;  %v4847_v58 = vsub.f32 %v4831_v60, %v6741_v10 }
0x26be   :  { %v4846_v17 = vsub.f32 %v4828_v15, %v6741_v10  ;;  %6330 = vpow2.f32 %v4854_v53 }
0x26bf   :  { %v4858_v9 = vmul.f32 1.442695, %v4847_v58 }
0x26c0   :  { %v4856_v3 = vmul.f32 1.442695, %v4846_v17  ;;  %v4837_v35 = vpop.xlane.xlu1 %4836  ;;  %v6385_v17 = vld [vmem:[%s8145_s0 + $0x20] sm:$0xff] }
0x26c1   :  { %v4834_v11 = vpop.xlane.xlu0 %4833  ;;  %v4849_v22 = vsub.f32 %v4837_v35, %v6741_v10 }
0x26c2   :  { %v4848_v19 = vsub.f32 %v4834_v11, %v6741_v10  ;;  %6332 = vpow2.f32 %v4856_v3 }
0x26c3   :  { %6334 = vpow2.f32 %v4852_v7  ;;  %v4862_v37 = vmul.f32 1.442695, %v4849_v22  ;;  %v6386_v22 = vld [vmem:[%s8145_s0 + $0x38] sm:$0xff] }
0x26c4   :  { %v4860_v40 = vmul.f32 1.442695, %v4848_v19  ;;  %v4843_v27 = vpop.xlane.xlu1 %4842 }
0x26c5   :  { %v4840_v49 = vpop.xlane.xlu0 %4839  ;;  %v4851_v50 = vsub.f32 %v4843_v27, %v6741_v10  ;;  %v6387_v27 = vld [vmem:[%s8145_s0 + $0x30] sm:$0xff] }
0x26c6   :  { %v4850_v38 = vsub.f32 %v4840_v49, %v6741_v10  ;;  %6336 = vpow2.f32 %v4860_v40 }
0x26c7   :  { %6338 = vpow2.f32 %v4858_v9  ;;  %v4866_v20 = vmul.f32 1.442695, %v4851_v50 }
0x26c8   :  { %v4864_v0 = vmul.f32 1.442695, %v4850_v38  ;;  %v6331_v62 = vpop.eup %6330 }
0x26c9   :  { %v4883_v28 = vrot.slane %v6331_v62, %v6753_v61  ;;  %v4920_v47 = vmul.f32 %v6381_v21, %v6331_v62 }
0x26ca   :  { %6340 = vpow2.f32 %v4864_v0 }
0x26cb   :  { %6342 = vpow2.f32 %v4862_v37  ;;  %v4934_v35 = vsel %vm158_vm1, %v4920_v47, 0.0 }
0x26cc   :  { %v6333_v44 = vpop.eup %6332  ;;  %6344 = vpow2.f32 %v4866_v20  ;;  %v4935_v50 = vrot.slane %v4934_v35, 4 }
0x26cd   :  { %v6335_v26 = vpop.eup %6334  ;;  %v4887_v33 = vrot.slane %v6333_v44, %v6753_v61  ;;  %v4921_v60 = vmul.f32 %v6383_v63, %v6333_v44 }
0x26ce   :  { %v4879_v30 = vrot.slane %v6335_v26, %v6753_v61  ;;  %v4919_v57 = vmul.f32 %v6380_v14, %v6335_v26 }
0x26cf   :  { %v4941_v58 = vsel %vm158_vm1, %v4921_v60, 0.0 }
0x26d0   :  { %v6337_v36 = vpop.eup %6336  ;;  %v4908_v10 = vsel %vm645_vm2, %v4883_v28, %v4879_v30  ;;  %v4927_v3 = vsel %vm158_vm1, %v4919_v57, 0.0  ;;  %v4942_v37 = vrot.slane %v4941_v58, 4  ;;  %v4936_v28 = vadd.f32 %v4935_v50, %v4934_v35 }
0x26d1   :  { %v6339_v23 = vpop.eup %6338  ;;  %v4895_v41 = vrot.slane %v6337_v36, %v6753_v61  ;;  %v4909_v48 = vsel %vm647_vm3, %v4887_v33, %v4908_v10  ;;  %v4923_v53 = vmul.f32 %v6385_v17, %v6337_v36  ;;  %v4928_v49 = vrot.slane %v4927_v3, 4 }
0x26d2   :  { %v4891_v39 = vrot.slane %v6339_v23, %v6753_v61  ;;  %v4922_v43 = vmul.f32 %v6382_v4, %v6339_v23  ;;  %v4943_v36 = vadd.f32 %v4942_v37, %v4941_v58 }
0x26d3   :  { %v4955_v19 = vsel %vm158_vm1, %v4923_v53, 0.0  ;;  %v4929_v26 = vadd.f32 %v4928_v49, %v4927_v3 }
0x26d4   :  { %v6341_v34 = vpop.eup %6340  ;;  %v4910_v56 = vsel %vm649_vm4, %v4891_v39, %v4909_v48  ;;  %v4948_v7 = vsel %vm158_vm1, %v4922_v43, 0.0  ;;  %v4956_v20 = vrot.slane %v4955_v19, 4  ;;  %v4944_v39 = vrot.slane %v4943_v36, 2 }
0x26d5   :  { %v6343_v51 = vpop.eup %6342  ;;  %v4903_v16 = vrot.slane %v6341_v34, %v6753_v61  ;;  %v4911_v52 = vsel %vm651_vm5, %v4895_v41, %v4910_v56  ;;  %v4925_v9 = vmul.f32 %v6387_v27, %v6341_v34  ;;  %v4949_v38 = vrot.slane %v4948_v7, 4 }
0x26d6   :  { %v6345_v46 = vpop.eup %6344  ;;  %v4899_v32 = vrot.slane %v6343_v51, %v6753_v61  ;;  %v4924_v15 = vmul.f32 %v6384_v13, %v6343_v51  ;;  %v4957_v23 = vadd.f32 %v4956_v20, %v4955_v19  ;;  %v4930_v48 = vrot.slane %v4929_v26, 2 }
0x26d7   :  { %v4907_v45 = vrot.slane %v6345_v46, %v6753_v61  ;;  %v107_v61 = vld [vmem:[%s8151_s6 + $0x30] sm:$0xff]  ;;  %v4926_v40 = vmul.f32 %v6386_v22, %v6345_v46  ;;  %v4969_v44 = vsel %vm158_vm1, %v4925_v9, 0.0  ;;  %v4950_v33 = vadd.f32 %v4949_v38, %v4948_v7 }
0x26d8   :  { %v4912_v59 = vsel %vm653_vm6, %v4899_v32, %v4911_v52  ;;  %v5998_v54 = vpack.c.bf16 %v108_v29, %v107_v61  ;;  %v4962_v11 = vsel %vm158_vm1, %v4924_v15, 0.0  ;;  %v4970_v41 = vrot.slane %v4969_v44, 4 }
0x26d9   :  { %v4913_v24 = vsel %vm655_vm7, %v4903_v16, %v4912_v59  ;;  %v4963_v0 = vrot.slane %v4962_v11, 4  ;;  %v4976_v62 = vsel %vm158_vm1, %v4926_v40, 0.0  ;;  %v4937_v34 = vrot.slane %v4936_v28, 2 }
0x26da   :  { %v4914_v6 = vsel %vm657_vm8, %v4907_v45, %v4913_v24  ;;  %5999 = vmatpush3.bf16.msra.mxu0 %v5998_v54  ;;  %v4977_v10 = vrot.slane %v4976_v62, 4  ;;  %v4951_v51 = vrot.slane %v4950_v33, 2  ;;  %v4958_v16 = vrot.slane %v4957_v23, 2 }
0x26db   :  { %v4916_v5 = vsel %vm660_vm9, %v4914_v6, 0.0  ;;  %v4964_v30 = vadd.f32 %v4963_v0, %v4962_v11  ;;  %v4971_v32 = vadd.f32 %v4970_v41, %v4969_v44  ;;  %v4931_v45 = vadd.f32 %v4930_v48, %v4929_v26 }
0x26dc   :  { %4917 = vadd.xlane.f32.xlu0 %v4916_v5  ;;  %v4978_v56 = vadd.f32 %v4977_v10, %v4976_v62  ;;  %v4938_v59 = vadd.f32 %v4937_v34, %v4936_v28  ;;  %v4952_v24 = vadd.f32 %v4951_v51, %v4950_v33  ;;  %v4945_v6 = vadd.f32 %v4944_v39, %v4943_v36 }
0x26dd   :  { %v4965_v46 = vrot.slane %v4964_v30, 2  ;;  %v4959_v8 = vadd.f32 %v4958_v16, %v4957_v23  ;;  %v4972_v61 = vrot.slane %v4971_v32, 2  ;;  %v4932_v42 = vrot.slane %v4931_v45, 1 }
0x26de   :  { %v4979_v2 = vrot.slane %v4978_v56, 2  ;;  %v4939_v29 = vrot.slane %v4938_v59, 1  ;;  %v4953_v54 = vrot.slane %v4952_v24, 1  ;;  %v4946_v14 = vrot.slane %v4945_v6, 1 }
0x26df   :  { %v4966_v5 = vadd.f32 %v4965_v46, %v4964_v30  ;;  %v4960_v21 = vrot.slane %v4959_v8, 1  ;;  %v4973_v47 = vadd.f32 %v4972_v61, %v4971_v32  ;;  %v4933_v43 = vadd.f32 %v4932_v42, %v4931_v45 }
0x26e0   :  { %v4980_v4 = vadd.f32 %v4979_v2, %v4978_v56  ;;  %v4940_v63 = vadd.f32 %v4939_v29, %v4938_v59  ;;  %v4954_v60 = vadd.f32 %v4953_v54, %v4952_v24  ;;  %v4947_v13 = vadd.f32 %v4946_v14, %v4945_v6 }
0x26e1   :  { %v4967_v57 = vrot.slane %v4966_v5, 1  ;;  %v4961_v17 = vadd.f32 %v4960_v21, %v4959_v8  ;;  %v4974_v3 = vrot.slane %v4973_v47, 1 }
0x26e2   :  { %v4981_v35 = vrot.slane %v4980_v4, 1 }
0x26e3   :  { %v4968_v53 = vadd.f32 %v4967_v57, %v4966_v5  ;;  %v4975_v37 = vadd.f32 %v4974_v3, %v4973_v47 }
0x26e4   :  { %v4982_v0 = vadd.f32 %v4981_v35, %v4980_v4 }
0x2769   :  { %v4918_v52 = vpop.xlane.xlu0 %4917 }
0x276a   :  { %6346 = vrcp.f32 %v4918_v52 }
0x2774   :  { %v6347_v15 = vpop.eup %6346 }
0x2775   :  { %v4985_v7 = vrot.slane %v6347_v15, 1  ;;  %v4986_v58 = vrot.slane %v6347_v15, 2  ;;  %v4987_v11 = vrot.slane %v6347_v15, 3  ;;  %v4988_v19 = vrot.slane %v6347_v15, 4 }
0x2776   :  { %v4989_v22 = vrot.slane %v6347_v15, 5  ;;  %v4990_v40 = vrot.slane %v6347_v15, 6  ;;  %v4991_v27 = vrot.slane %v6347_v15, 7  ;;  %v5000_v9 = vmul.f32 %v6347_v15, %v4933_v43 }
0x2777   :  { %v5001_v49 = vmul.f32 %v4985_v7, %v4940_v63  ;;  %v5002_v50 = vmul.f32 %v4986_v58, %v4947_v13  ;;  %v5003_v38 = vmul.f32 %v4987_v11, %v4954_v60  ;;  %v5004_v20 = vmul.f32 %v4988_v19, %v4961_v17  ;;  %v8234_v17 = vld [vmem:[#allocation17_spill] sm:$0xff] }
0x2778   :  { %v5005_v62 = vmul.f32 %v4989_v22, %v4968_v53  ;;  %v5006_v28 = vmul.f32 %v4990_v40, %v4975_v37  ;;  %v5007_v33 = vmul.f32 %v4991_v27, %v4982_v0  ;;  %v5008_v36 = vmul.f32 %v5000_v9, %v6870_v12  ;;  %v102_v0 = vld [vmem:[%s8151_s6 + $0x8] sm:$0xff] }
0x2779   :  { %v5168_v44 = vrot.slane %v5001_v49, 7  ;;  %v5170_v26 = vrot.slane %v5002_v50, 6  ;;  %v5009_v30 = vmul.f32 %v5001_v49, %v6870_v12  ;;  %v5172_v10 = vrot.slane %v5003_v38, 5 }
0x277a   :  { %v5010_v41 = vmul.f32 %v5002_v50, %v6870_v12  ;;  %v5011_v48 = vmul.f32 %v5003_v38, %v6870_v12  ;;  %v5174_v51 = vrot.slane %v5004_v20, 4  ;;  %v5176_v39 = vrot.slane %v5005_v62, 3 }
0x277b   :  { %v5169_v23 = vsel %vm645_vm2, %v5168_v44, %v5000_v9  ;;  %v5012_v46 = vmul.f32 %v5004_v20, %v6870_v12  ;;  %v5013_v56 = vmul.f32 %v5005_v62, %v6870_v12  ;;  %v5024_v32 = vrot.slane %v5009_v30, 7  ;;  %v103_v20 = vld [vmem:[%s8151_s6 + $0x10] sm:$0xff]  ;;  %v8235_v30 = vld [vmem:[#allocation11_spill] sm:$0xff] }
0x277c   :  { %v5171_v34 = vsel %vm647_vm3, %v5170_v26, %v5169_v23  ;;  %v5026_v52 = vrot.slane %v5010_v41, 6  ;;  %v5178_v59 = vrot.slane %v5006_v28, 2  ;;  %v5180_v24 = vrot.slane %v5007_v33, 1  ;;  %v6388_v41 = vld [vmem:[#allocation2] sm:$0xff] }
0x277d   :  { %v5173_v16 = vsel %vm649_vm4, %v5172_v10, %v5171_v34  ;;  %v5014_v6 = vmul.f32 %v5006_v28, %v6870_v12  ;;  %v5015_v8 = vmul.f32 %v5007_v33, %v6870_v12  ;;  %v5025_v2 = vsel %vm645_vm2, %v5024_v32, %v5008_v36 }
0x277e   :  { %v5175_v45 = vsel %vm651_vm5, %v5174_v51, %v5173_v16  ;;  %v5028_v61 = vrot.slane %v5011_v48, 5  ;;  %v5027_v29 = vsel %vm647_vm3, %v5026_v52, %v5025_v2  ;;  %v5030_v54 = vrot.slane %v5012_v46, 4 }
0x277f   :  { %v5177_v5 = vsel %vm653_vm6, %v5176_v39, %v5175_v45  ;;  %v5032_v21 = vrot.slane %v5013_v56, 3  ;;  %v5034_v4 = vrot.slane %v5014_v6, 2  ;;  %v5036_v43 = vrot.slane %v5015_v8, 1 }
0x2780   :  { %v5179_v42 = vsel %vm655_vm7, %v5178_v59, %v5177_v5  ;;  %v5029_v57 = vsel %vm649_vm4, %v5028_v61, %v5027_v29  ;;  %v5331_v23 = vsub.s32 6, %v8235_v30  ;;  %v5336_v10 = vsub.s32 7, %v8235_v30 }
0x2781   :  { %v5181_v14 = vsel %vm657_vm8, %v5180_v24, %v5179_v42  ;;  %v5031_v47 = vsel %vm651_vm5, %v5030_v54, %v5029_v57 }
0x2782   :  { %5829 = vmatmul.mubr.msk.f32.vlgmr.msra.gmra.mrb[30].mxu0 %vm158_vm1, %v5181_v14  ;;  %v5033_v12 = vsel %vm653_vm6, %v5032_v21, %v5031_v47  ;;  %v5332_v48 = vrot.slane %v6388_v41, %v5331_v23  ;;  %v5337_v39 = vrot.slane %v6388_v41, %v5336_v10 }
0x2783   :  { %v5035_v63 = vsel %vm655_vm7, %v5034_v4, %v5033_v12 }
0x2784   :  { %v5037_v60 = vsel %vm657_vm8, %v5036_v43, %v5035_v63 }
0x2785   :  { %v5039_v13 = vsel %vm158_vm1, %v5037_v60, 0.0 }
0x2786   :  { %5040 = vadd.xlane.f32.xlu1 %v5039_v13 }
0x2813   :  { %v5041_v15 = vpop.xlane.xlu1 %5040 }
0x2814   :  { %v5057_v53 = vadd.f32 %v8234_v17, %v5041_v15 }
0x2816   :  { %5060 = vperm.xlu0 %6019, %v5057_v53  }
0x2855   :  { %v5250_v3 = vpop.f32.mrb[30].mxu0 }
0x2856   :  { %v5830_v35 = vpop.f32.mrb[31].mxu0 }
0x2895   :  { %v5061_v7 = vpop.permute.xlu0 %5060 }
0x2896   :  { %v5063_v58 = vmul.f32 %v5061_v7, %v7040_v55 }
0x2898   :  { %v5134_v11 = vadd.f32 %v7982_v25, %v5063_v58 }
0x289a   :  { %v5135_v19 = vadd.f32 %v5134_v11, %v7045_v1  ;;  %v101_v1 = vld [vmem:[%s8151_s6] sm:$0xff] }
0x289b   :  { %v6001_v62 = vpack.c.bf16 %v102_v0, %v101_v1 }
0x289c   :  { %6348 = vtanh.f32 %v5135_v19  ;;  %v5391_v40 = vmul.f32 -1.442695, %v5135_v19 }
0x289d   :  { %6002 = vmatpush3.bf16.msra.mxu1 %v6001_v62 }
0x289e   :  { %6350 = vpow2.f32 %v5391_v40  ;;  %6003 = vmatprep.subr.bf16.mxu1 %v8194_v31 }
0x28a6   :  { %v6349_v22 = vpop.eup %6348 }
0x28a7   :  { %5145 = vrot.lane.b32.xlu1 %v6349_v22, %s6461_s3 }
0x28a8   :  { %v6351_v27 = vpop.eup %6350 }
0x28a9   :  { %v5139_v9 = vadd.f32 1.0, %v6351_v27 }
0x28ab   :  { %6352 = vrcp.f32 %v5139_v9 }
0x28b5   :  { %v6353_v49 = vpop.eup %6352 }
0x28b6   :  { %v5143_v55 = vmul.f32 %v6353_v49, %v7962_v18  ;;  %v104_v18 = vld [vmem:[%s8151_s6 + $0x18] sm:$0xff]  ;;  %s5353_s6 = sld [smem:[#allocation7 + $0x1]] }
0x28b7   :  { %v6004_v44 = vpack.c.bf16 %v104_v18, %v103_v20 }
0x28b9   :  { %6005 = vmatpush3.bf16.msra.mxu1 %v6004_v44 }
0x28bc   :  { %v5342_v32 = vstv %s5353_s6 }
0x2919   :  { %v5146_v50 = vpop.permute.xlu1 %5145 }
0x291a   :  { %v5148_v38 = vmul.f32 %v6353_v49, %v5146_v50 }
0x291c   :  { %5150 = vrot.lane.b32.xlu1 %v5148_v38, %s6461_s3 }
0x298e   :  { %v5151_v37 = vpop.permute.xlu1 %5150 }
0x298f   :  { %v5153_v25 = vadd.f32 %v5151_v37, %v5143_v55 }
0x2991   :  { %6354 = vtanh.f32 %v5153_v25 }
0x299b   :  { %v6355_v26 = vpop.eup %6354 }
0x299c   :  { %5156 = vrot.lane.b32.xlu0 %v6355_v26, %s6461_s3 }
0x2a0e   :  { %v5157_v28 = vpop.permute.xlu0 %5156 }
0x2a0f   :  { %v5159_v33 = vmul.f32 %v6353_v49, %v5157_v28 }
0x2a11   :  { %5255 = vrot.lane.b32.xlu1 %v5159_v33, %s6463_s16 }
0x2a83   :  { %v5256_v36 = vpop.permute.xlu1 %5255 }
0x2a84   :  { %5840 = vmatmul.mubr.msk.f32.vlgmr.msra.gmra.mrb[26].mxu1 %vm158_vm1, %v5256_v36 }
0x2b57   :  { %v5325_v34 = vpop.f32.mrb[26].mxu1 }
0x2b58   :  { %v5326_v51 = vadd.f32 %v5325_v34, %v5250_v3  ;;  %v5841_v31 = vpop.f32.mrb[27].mxu1 }
0x2b5a   :  { %v5333_v46 = vadd.f32 %v5332_v48, %v5326_v51 }
0x2b5c   :  { %v5338_v16 = vmul.f32 %v5337_v39, %v5333_v46 }
0x2b5e   :  { %v5339_v56 = vsel %vm158_vm1, %v5338_v16, 0.0 }
0x2b5f   :  { %5340 = vadd.xlane.f32.xlu0 %v5339_v56 }
0x2bec   :  { %v5341_v52 = vpop.xlane.xlu0 %5340 }
0x2bed   :  { %v5343_v45 = vadd.f32 %v5342_v32, %v5341_v52 }
0x2bef   :  { %5345 = vst.msk [vmem:[%s8153_s8] sm:$0xff] %vm5344_vm11, %v5343_v45 }
0x2bf0   :  { %5350 = vsyncpa [#allocation3], 1 }
0x2bf1   :  { %5351 = vsyncpa [#allocation6], 1 }
0x2bf2   :  { %5352 = vsyncpa [#allocation4], 1 }

</bundles_post_ra>
